<compile_context>
chip_gen: v6e
topology: v6e:2x2x1
jax: 0.10.0
libtpu: 0.0.40
codegen_flags: <defaults>
</compile_context>

<pallas_src>
import functools
import math

import jax
import jax.numpy as jnp
from jax.experimental import pallas as pl
from jax.experimental.pallas import tpu as pltpu


# ----------------------------------------------------------------------------
# Fused kernel: all attention iterations + output head, Bt samples per grid pt.
# ----------------------------------------------------------------------------
def _graph_reason_kernel(x_ref, bias_ref, *rest, iters, num_heads, head_dim,
                         input_size, batch_tile, num_nodes):
    wqkv_refs = rest[:iters]            # iter i: ((i+1)*D, 3*D) bf16
    w_out_ref = rest[iters]             # ((iters+1)*D, O_pad) bf16
    b_ref = rest[iters + 1]             # (1, O_pad) bf16
    o_ref = rest[iters + 2]             # (Bt, N, O_pad)
    hid_ref = rest[iters + 3]           # VMEM scratch (Bt*N, (iters+1)*D) bf16

    D = input_size
    Bt = batch_tile
    N = num_nodes
    M = Bt * N

    # Seed the hidden-state scratch with the input embeddings (bf16 storage;
    # same precision as the previous version's at-dot-time casts).
    x = x_ref[...]                                           # (Bt, N, D) f32
    hid_ref[:, 0:D] = x.reshape(M, D).astype(jnp.bfloat16)

    # Additive attention bias: 0 for edges, -1e30 otherwise.
    bias = bias_ref[...].astype(jnp.float32)                 # (Bt, N, N)
    # Rows with no neighbor at all -> zero output (computed once per block).
    live = jnp.max(bias, axis=-1, keepdims=True) > -1.0      # (Bt, N, 1) bool

    for i in range(iters):              # static loop (iters known at trace)
        h = hid_ref[:, 0:(i + 1) * D]                        # (M, (i+1)*D) bf16
        # One wide MXU matmul for all of Q|K|V (bf16 feed, f32 accumulate).
        qkv = jnp.dot(h, wqkv_refs[i][...],
                      preferred_element_type=jnp.float32)    # (M, 3*D) f32
        qkv = qkv.reshape(Bt, N, 3 * D)

        base = (i + 1) * D              # column slot of this iteration's output
        for hh in range(num_heads):     # static head loop, batched over Bt
            lo = hh * head_dim
            qh = qkv[:, :, lo:lo + head_dim].astype(jnp.bfloat16)
            kh = qkv[:, :, D + lo:D + lo + head_dim].astype(jnp.bfloat16)
            vh = qkv[:, :, 2 * D + lo:2 * D + lo + head_dim].astype(jnp.bfloat16)

            # 1/sqrt(head_dim) already folded into the Q weight columns.
            s = jnp.einsum('bnd,bmd->bnm', qh, kh,
                           preferred_element_type=jnp.float32)   # (Bt,N,N) f32
            s = s + bias
            s = s - jnp.max(s, axis=-1, keepdims=True)
            # TODO(synk): on v6e/v7x exp could run in bf16 (~2x EUP); kept f32
            # for v5e portability.
            p = jnp.exp(s)              # masked entries underflow to exact 0
            denom = jnp.sum(p, axis=-1, keepdims=True)       # >= 1 by constr.
            p = p * pl.reciprocal(denom, approx=True)        # EUP reciprocal

            ctx = jnp.einsum('bnm,bmd->bnd', p.astype(jnp.bfloat16), vh,
                             preferred_element_type=jnp.float32)  # (Bt,N,hd)
            ctx = jnp.where(live, ctx, 0.0)                  # isolated rows -> 0
            hid_ref[:, base + lo:base + lo + head_dim] = (
                ctx.reshape(M, head_dim).astype(jnp.bfloat16))
        # dropout(p=graph_drop) is identity at inference time

    # Output head: y = ReLU(h_all @ W_out + b); lane-dense (O padded) store.
    h_all = hid_ref[...]                                     # (M, (iters+1)*D)
    y = jnp.dot(h_all, w_out_ref[...],
                preferred_element_type=jnp.float32)          # (M, O_pad) f32
    y = jnp.maximum(y + b_ref[...].astype(jnp.float32), 0.0)
    o_ref[...] = y.reshape(o_ref.shape).astype(o_ref.dtype)


# ----------------------------------------------------------------------------
# Host-side helpers
# ----------------------------------------------------------------------------
def _choose_batch_tile(B, N):
    """Batch elements per grid block: aim for >=256 MXU rows while keeping the
    (Bt,N,N) score block small and, when possible, >=2 grid blocks so the
    'parallel' axis can load both v7x TensorCores."""
    divisors = [d for d in range(1, B + 1) if B % d == 0]
    valid = [d for d in divisors if d * N <= 1024 and d * N * N * 4 <= (8 << 20)]
    if not valid:
        return 1
    preferred = [d for d in valid if d * N >= 256]
    return min(preferred) if preferred else max(valid)


def _vmem_limit_bytes(Bt, N, D, iters, O_pad):
    H_total = (iters + 1) * D
    M = Bt * N
    weight_bytes = sum((i + 1) * D * 3 * D for i in range(iters)) * 2
    weight_bytes += H_total * O_pad * 2 + O_pad * 2
    block_bytes = 2 * (M * D * 4) + 2 * (Bt * N * N * 2) + 2 * (M * O_pad * 4)
    scratch_bytes = M * H_total * 2
    working_bytes = M * 3 * D * 4 + 4 * Bt * N * N * 4 + M * O_pad * 4 + M * D * 4
    est = 2 * weight_bytes + block_bytes + scratch_bytes + working_bytes
    try:
        cap = int(getattr(pltpu.get_tpu_info(), "vmem_capacity_bytes",
                          64 << 20) * 3 // 4)
    except Exception:
        cap = 48 << 20          # conservative: v7x has 64 MiB per TensorCore
    cap = min(cap, 96 << 20)
    # TODO(synk): for N large enough that this cap is exceeded, add query-row
    # tiling (TQxN score blocks) instead of relying on a bigger limit.
    return min(max(int(est * 1.5), 32 << 20), cap)


def _cost_estimate(B, N, D, iters, num_heads, head_dim, O_pad):
    flops = 0
    for i in range(iters):
        din = (i + 1) * D
        flops += 2 * N * din * 3 * D                       # qkv projection
        flops += num_heads * (2 * N * N * head_dim) * 2    # scores + context
    H_total = (iters + 1) * D
    flops += 2 * N * H_total * O_pad                       # output head
    flops *= B
    transcendentals = B * iters * num_heads * N * N        # exp
    w_bytes = (sum((i + 1) * D * 3 * D for i in range(iters)) * 2
               + H_total * O_pad * 2 + O_pad * 2)
    bytes_accessed = (B * N * D * 4 + B * N * N * 2 + w_bytes
                      + B * N * O_pad * 4)
    return pl.CostEstimate(flops=flops, transcendentals=transcendentals,
                           bytes_accessed=bytes_accessed)


def graph_reason_forward(x, adj_bias, wqkv_list, w_out, b, num_heads, out_size):
    """x: (B,N,D) f32, adj_bias: (B,N,N) bf16 (0 edge / -1e30 no edge),
    wqkv_list[i]: ((i+1)*D, 3*D) bf16, w_out: ((iters+1)*D, O_pad) bf16,
    b: (1, O_pad) bf16.  Returns (B, N, out_size) f32."""
    B, N, D = x.shape
    iters = len(wqkv_list)
    H_total = (iters + 1) * D
    O_pad = w_out.shape[1]
    head_dim = D // num_heads
    Bt = _choose_batch_tile(B, N)
    num_blocks = B // Bt
    M = Bt * N

    kernel = functools.partial(_graph_reason_kernel, iters=iters,
                               num_heads=num_heads, head_dim=head_dim,
                               input_size=D, batch_tile=Bt, num_nodes=N)

    def build(weight_mode):
        wkw = {} if weight_mode is None else {"pipeline_mode": weight_mode}
        in_specs = [
            pl.BlockSpec((Bt, N, D), lambda bi: (bi, 0, 0)),
            pl.BlockSpec((Bt, N, N), lambda bi: (bi, 0, 0)),
        ]
        for i in range(iters):
            in_specs.append(pl.BlockSpec(((i + 1) * D, 3 * D),
                                         lambda bi: (0, 0), **wkw))
        in_specs.append(pl.BlockSpec((H_total, O_pad), lambda bi: (0, 0), **wkw))
        in_specs.append(pl.BlockSpec((1, O_pad), lambda bi: (0, 0), **wkw))
        return pl.pallas_call(
            kernel,
            out_shape=jax.ShapeDtypeStruct((B, N, O_pad), x.dtype),
            grid=(num_blocks,),
            in_specs=in_specs,
            out_specs=pl.BlockSpec((Bt, N, O_pad), lambda bi: (bi, 0, 0)),
            scratch_shapes=[pltpu.VMEM((M, H_total), jnp.bfloat16)],
            compiler_params=pltpu.CompilerParams(
                dimension_semantics=("parallel",),
                vmem_limit_bytes=_vmem_limit_bytes(Bt, N, D, iters, O_pad)),
            cost_estimate=_cost_estimate(B, N, D, iters, num_heads, head_dim,
                                         O_pad),
        )

    try:
        # Grid-invariant weights: single-buffered (no 2x VMEM for re-fetches).
        out = build(pl.Buffered(1))(x, adj_bias, *wqkv_list, w_out, b)
    except Exception:
        # Portability fallback for jax versions without BlockSpec pipeline_mode.
        out = build(None)(x, adj_bias, *wqkv_list, w_out, b)
    return out[..., :out_size]


# ----------------------------------------------------------------------------
# GraphReasonLayer wrapper (graph_type='atten')
# ----------------------------------------------------------------------------
class GraphReasonLayerPallas:
    def __init__(self, key, input_size, out_size, iters, graph_head=4,
                 graph_drop=0.0):
        assert input_size % graph_head == 0
        self.iters = iters
        self.graph_head = graph_head
        self.input_size = input_size
        self.out_size = out_size
        self.graph_drop = graph_drop        # identity at inference
        head_dim = input_size // graph_head
        scale = 1.0 / math.sqrt(head_dim)

        keys = jax.random.split(key, 3 * iters + 2)
        self.wqkv = []
        for i in range(iters):
            din = (i + 1) * input_size
            s = 1.0 / math.sqrt(din)
            wq = jax.random.uniform(keys[3 * i + 0], (din, input_size),
                                    jnp.float32, -s, s)
            wk = jax.random.uniform(keys[3 * i + 1], (din, input_size),
                                    jnp.float32, -s, s)
            wv = jax.random.uniform(keys[3 * i + 2], (din, input_size),
                                    jnp.float32, -s, s)
            # Fold score scale into Q, pack Q|K|V, pre-cast to bf16 (one wide
            # MXU matmul per iteration, no in-kernel weight casts).
            packed = jnp.concatenate([wq * scale, wk, wv], axis=1)
            self.wqkv.append(packed.astype(jnp.bfloat16))

        hidden = (iters + 1) * input_size
        s = 1.0 / math.sqrt(hidden)
        w = jax.random.uniform(keys[-2], (hidden, out_size), jnp.float32, -s, s)
        bb = jax.random.uniform(keys[-1], (1, out_size), jnp.float32, -s, s)
        # Pad the output head to a lane-dense multiple of 128 (unmasked stores);
        # the wrapper slices back to out_size after the call.
        o_pad = max(128, ((out_size + 127) // 128) * 128)
        self.out_w = (jnp.zeros((hidden, o_pad), jnp.float32)
                      .at[:, :out_size].set(w).astype(jnp.bfloat16))
        self.out_b = (jnp.zeros((1, o_pad), jnp.float32)
                      .at[:, :out_size].set(bb).astype(jnp.bfloat16))

    def __call__(self, nodes_embed, node_adj, node_info=None,
                 context_output=None, sent_info=None, entity_info=None,
                 input_lengths=None, global_step=None):
        # Float adjacency -> bf16 additive attention bias (halves the largest
        # per-batch DMA, removes both in-kernel (N,N) mask selects).
        adj_bias = jnp.where(node_adj > 0.0, 0.0, -1e30).astype(jnp.bfloat16)
        return graph_reason_forward(nodes_embed, adj_bias, self.wqkv,
                                    self.out_w, self.out_b, self.graph_head,
                                    self.out_size)


if __name__ == "__main__":
    key = jax.random.PRNGKey(0)
    k_param, k_x, k_adj = jax.random.split(key, 3)

    B, N = 2, 16          # batch, number of graph nodes
    input_size = 32
    out_size = 32
    iters = 2
    graph_head = 4

    layer = GraphReasonLayerPallas(k_param, input_size, out_size, iters,
                                   graph_head=graph_head, graph_drop=0.1)

    nodes_embed = jax.random.normal(k_x, (B, N, input_size), jnp.float32)
    # random binary adjacency with self-loops so every row has >=1 neighbor
    adj_rand = (jax.random.uniform(k_adj, (B, N, N)) > 0.5).astype(jnp.float32)
    eye = jnp.broadcast_to(jnp.eye(N, dtype=jnp.float32), (B, N, N))
    node_adj = jnp.maximum(adj_rand, eye)

    out = layer(nodes_embed, node_adj, node_info=None, context_output=None,
                sent_info=None, entity_info=None, input_lengths=None,
                global_step=0)
    out = jax.block_until_ready(out)

    assert out.shape == (B, N, out_size), out.shape
    assert bool(jnp.all(jnp.isfinite(out)))
    print("KERNEL_OK")
</pallas_src>

<mosaic_0001>
module attributes {stable_mosaic.version = 11 : i64} {
  func.func @_graph_reason_kernel(%arg0: i32, %arg1: memref<2x16x32xf32, #tpu.memory_space<vmem>>, %arg2: memref<2x16x16xbf16, #tpu.memory_space<vmem>>, %arg3: memref<32x96xbf16, #tpu.memory_space<vmem>>, %arg4: memref<64x96xbf16, #tpu.memory_space<vmem>>, %arg5: memref<96x128xbf16, #tpu.memory_space<vmem>>, %arg6: memref<1x128xbf16, #tpu.memory_space<vmem>>, %arg7: memref<2x16x128xf32, #tpu.memory_space<vmem>>, %arg8: memref<32x96xbf16, #tpu.memory_space<vmem>>) attributes {dimension_semantics = [#tpu.dimension_semantics<parallel>], iteration_bounds = array<i64: 1>, scalar_prefetch = 0 : i64, scratch_operands = 1 : i64, tpu.core_type = #tpu.core_type<tc>, window_params = [{transform_indices = @transform_0, window_bounds = array<i64: 2, 16, 32>}, {transform_indices = @transform_1, window_bounds = array<i64: 2, 16, 16>}, {pipeline_mode = #tpu.pipeline_mode<synchronous>, transform_indices = @transform_2, window_bounds = array<i64: 32, 96>}, {pipeline_mode = #tpu.pipeline_mode<synchronous>, transform_indices = @transform_3, window_bounds = array<i64: 64, 96>}, {pipeline_mode = #tpu.pipeline_mode<synchronous>, transform_indices = @transform_4, window_bounds = array<i64: 96, 128>}, {pipeline_mode = #tpu.pipeline_mode<synchronous>, transform_indices = @transform_5, window_bounds = array<i64: 1, 128>}, {transform_indices = @transform_6, window_bounds = array<i64: 2, 16, 128>}]} {
    %c0 = arith.constant 0 : index
    %c0_0 = arith.constant 0 : index
    %c0_1 = arith.constant 0 : index
    %0 = vector.load %arg1[%c0, %c0_0, %c0_1] : memref<2x16x32xf32, #tpu.memory_space<vmem>>, vector<2x16x32xf32>
    %1 = vector.shape_cast %0 : vector<2x16x32xf32> to vector<32x32xf32>
    %2 = arith.truncf %1 : vector<32x32xf32> to vector<32x32xbf16>
    %c0_2 = arith.constant 0 : index
    %c0_3 = arith.constant 0 : index
    %3 = vector.load %arg8[%c0_2, %c0_3] : memref<32x96xbf16, #tpu.memory_space<vmem>>, vector<32x32xbf16>
    tpu.vector_store %arg8[%c0_2, %c0_3], %2 {strides = array<i32>} : memref<32x96xbf16, #tpu.memory_space<vmem>>, vector<32x32xbf16>,
    %c0_4 = arith.constant 0 : index
    %c0_5 = arith.constant 0 : index
    %c0_6 = arith.constant 0 : index
    %4 = vector.load %arg2[%c0_4, %c0_5, %c0_6] : memref<2x16x16xbf16, #tpu.memory_space<vmem>>, vector<2x16x16xbf16>
    %5 = arith.extf %4 : vector<2x16x16xbf16> to vector<2x16x16xf32>
    %cst = arith.constant dense<0xFF800000> : vector<2x16xf32>
    %6 = vector.multi_reduction <maximumf>, %5, %cst [2] : vector<2x16x16xf32> to vector<2x16xf32>
    %7 = vector.shape_cast %6 : vector<2x16xf32> to vector<2x16x1xf32>
    %cst_7 = arith.constant -1.000000e+00 : f32
    %8 = vector.broadcast %cst_7 : f32 to vector<2x16x1xf32>
    %9 = arith.cmpf ogt, %7, %8 : vector<2x16x1xf32>
    %c0_8 = arith.constant 0 : index
    %c0_9 = arith.constant 0 : index
    %10 = vector.load %arg8[%c0_8, %c0_9] : memref<32x96xbf16, #tpu.memory_space<vmem>>, vector<32x32xbf16>
    %c0_10 = arith.constant 0 : index
    %c0_11 = arith.constant 0 : index
    %11 = vector.load %arg3[%c0_10, %c0_11] : memref<32x96xbf16, #tpu.memory_space<vmem>>, vector<32x96xbf16>
    %cst_12 = arith.constant dense<0.000000e+00> : vector<32x96xf32>
    %12 = tpu.matmul %10, %11, %cst_12 {dimension_numbers = #tpu.dot_dimension_numbers<[1], [0], [0], [1], [0, 0, 1, 1], [], []>} : vector<32x32xbf16>, vector<32x96xbf16>, vector<32x96xf32> -> vector<32x96xf32>
    %13 = vector.shape_cast %12 : vector<32x96xf32> to vector<2x16x96xf32>
    %14 = vector.extract_strided_slice %13 {offsets = [0, 0, 0], sizes = [2, 16, 8], strides = [1, 1, 1]} : vector<2x16x96xf32> to vector<2x16x8xf32>
    %15 = arith.truncf %14 : vector<2x16x8xf32> to vector<2x16x8xbf16>
    %16 = vector.extract_strided_slice %13 {offsets = [0, 0, 32], sizes = [2, 16, 8], strides = [1, 1, 1]} : vector<2x16x96xf32> to vector<2x16x8xf32>
    %17 = arith.truncf %16 : vector<2x16x8xf32> to vector<2x16x8xbf16>
    %18 = vector.extract_strided_slice %13 {offsets = [0, 0, 64], sizes = [2, 16, 8], strides = [1, 1, 1]} : vector<2x16x96xf32> to vector<2x16x8xf32>
    %19 = arith.truncf %18 : vector<2x16x8xf32> to vector<2x16x8xbf16>
    "tpu.trace_start"() <{level = 10 : i32, message = "bnd,bmd->bnm"}> : () -> ()
    %cst_13 = arith.constant dense<0.000000e+00> : vector<2x16x16xf32>
    %20 = tpu.matmul %15, %17, %cst_13 {dimension_numbers = #tpu.dot_dimension_numbers<[2], [2], [1], [1], [0, 0, 0, 1, 1, 1], [0], [0]>} : vector<2x16x8xbf16>, vector<2x16x8xbf16>, vector<2x16x16xf32> -> vector<2x16x16xf32>
    "tpu.trace_stop"() : () -> ()
    %21 = arith.addf %20, %5 : vector<2x16x16xf32>
    %cst_14 = arith.constant dense<0xFF800000> : vector<2x16xf32>
    %22 = vector.multi_reduction <maximumf>, %21, %cst_14 [2] : vector<2x16x16xf32> to vector<2x16xf32>
    %23 = vector.shape_cast %22 : vector<2x16xf32> to vector<2x16x1xf32>
    %24 = vector.broadcast %23 : vector<2x16x1xf32> to vector<2x16x16xf32>
    %25 = arith.subf %21, %24 : vector<2x16x16xf32>
    %26 = math.exp %25 : vector<2x16x16xf32>
    %cst_15 = arith.constant dense<0.000000e+00> : vector<2x16xf32>
    %27 = vector.multi_reduction <add>, %26, %cst_15 [2] : vector<2x16x16xf32> to vector<2x16xf32>
    %28 = vector.shape_cast %27 : vector<2x16xf32> to vector<2x16x1xf32>
    %29 = tpu.reciprocal %28 {approx = true} : vector<2x16x1xf32> -> vector<2x16x1xf32>
    %30 = vector.broadcast %29 : vector<2x16x1xf32> to vector<2x16x16xf32>
    %31 = arith.mulf %26, %30 : vector<2x16x16xf32>
    %32 = arith.truncf %31 : vector<2x16x16xf32> to vector<2x16x16xbf16>
    "tpu.trace_start"() <{level = 10 : i32, message = "bnm,bmd->bnd"}> : () -> ()
    %cst_16 = arith.constant dense<0.000000e+00> : vector<2x16x8xf32>
    %33 = tpu.matmul %32, %19, %cst_16 {dimension_numbers = #tpu.dot_dimension_numbers<[2], [1], [1], [2], [0, 0, 0, 1, 1, 2], [0], [0]>} : vector<2x16x16xbf16>, vector<2x16x8xbf16>, vector<2x16x8xf32> -> vector<2x16x8xf32>
    %cst_17 = arith.constant 0.000000e+00 : f32
    "tpu.trace_stop"() : () -> ()
    %34 = vector.shape_cast %9 : vector<2x16x1xi1> to vector<2x16x1xi1>
    %35 = vector.broadcast %34 : vector<2x16x1xi1> to vector<2x16x8xi1>
    %36 = vector.broadcast %cst_17 : f32 to vector<2x16x8xf32>
    %37 = arith.select %35, %33, %36 : vector<2x16x8xi1>, vector<2x16x8xf32>
    %38 = vector.shape_cast %37 : vector<2x16x8xf32> to vector<32x8xf32>
    %39 = arith.truncf %38 : vector<32x8xf32> to vector<32x8xbf16>
    %c0_18 = arith.constant 0 : index
    %c32 = arith.constant 32 : index
    %40 = vector.load %arg8[%c0_18, %c32] : memref<32x96xbf16, #tpu.memory_space<vmem>>, vector<32x8xbf16>
    tpu.vector_store %arg8[%c0_18, %c32], %39 {strides = array<i32>} : memref<32x96xbf16, #tpu.memory_space<vmem>>, vector<32x8xbf16>,
    %41 = vector.extract_strided_slice %13 {offsets = [0, 0, 8], sizes = [2, 16, 8], strides = [1, 1, 1]} : vector<2x16x96xf32> to vector<2x16x8xf32>
    %42 = arith.truncf %41 : vector<2x16x8xf32> to vector<2x16x8xbf16>
    %43 = vector.extract_strided_slice %13 {offsets = [0, 0, 40], sizes = [2, 16, 8], strides = [1, 1, 1]} : vector<2x16x96xf32> to vector<2x16x8xf32>
    %44 = arith.truncf %43 : vector<2x16x8xf32> to vector<2x16x8xbf16>
    %45 = vector.extract_strided_slice %13 {offsets = [0, 0, 72], sizes = [2, 16, 8], strides = [1, 1, 1]} : vector<2x16x96xf32> to vector<2x16x8xf32>
    %46 = arith.truncf %45 : vector<2x16x8xf32> to vector<2x16x8xbf16>
    "tpu.trace_start"() <{level = 10 : i32, message = "bnd,bmd->bnm"}> : () -> ()
    %cst_19 = arith.constant dense<0.000000e+00> : vector<2x16x16xf32>
    %47 = tpu.matmul %42, %44, %cst_19 {dimension_numbers = #tpu.dot_dimension_numbers<[2], [2], [1], [1], [0, 0, 0, 1, 1, 1], [0], [0]>} : vector<2x16x8xbf16>, vector<2x16x8xbf16>, vector<2x16x16xf32> -> vector<2x16x16xf32>
    "tpu.trace_stop"() : () -> ()
    %48 = arith.addf %47, %5 : vector<2x16x16xf32>
    %cst_20 = arith.constant dense<0xFF800000> : vector<2x16xf32>
    %49 = vector.multi_reduction <maximumf>, %48, %cst_20 [2] : vector<2x16x16xf32> to vector<2x16xf32>
    %50 = vector.shape_cast %49 : vector<2x16xf32> to vector<2x16x1xf32>
    %51 = vector.broadcast %50 : vector<2x16x1xf32> to vector<2x16x16xf32>
    %52 = arith.subf %48, %51 : vector<2x16x16xf32>
    %53 = math.exp %52 : vector<2x16x16xf32>
    %cst_21 = arith.constant dense<0.000000e+00> : vector<2x16xf32>
    %54 = vector.multi_reduction <add>, %53, %cst_21 [2] : vector<2x16x16xf32> to vector<2x16xf32>
    %55 = vector.shape_cast %54 : vector<2x16xf32> to vector<2x16x1xf32>
    %56 = tpu.reciprocal %55 {approx = true} : vector<2x16x1xf32> -> vector<2x16x1xf32>
    %57 = vector.broadcast %56 : vector<2x16x1xf32> to vector<2x16x16xf32>
    %58 = arith.mulf %53, %57 : vector<2x16x16xf32>
    %59 = arith.truncf %58 : vector<2x16x16xf32> to vector<2x16x16xbf16>
    "tpu.trace_start"() <{level = 10 : i32, message = "bnm,bmd->bnd"}> : () -> ()
    %cst_22 = arith.constant dense<0.000000e+00> : vector<2x16x8xf32>
    %60 = tpu.matmul %59, %46, %cst_22 {dimension_numbers = #tpu.dot_dimension_numbers<[2], [1], [1], [2], [0, 0, 0, 1, 1, 2], [0], [0]>} : vector<2x16x16xbf16>, vector<2x16x8xbf16>, vector<2x16x8xf32> -> vector<2x16x8xf32>
    %cst_23 = arith.constant 0.000000e+00 : f32
    "tpu.trace_stop"() : () -> ()
    %61 = vector.shape_cast %9 : vector<2x16x1xi1> to vector<2x16x1xi1>
    %62 = vector.broadcast %61 : vector<2x16x1xi1> to vector<2x16x8xi1>
    %63 = vector.broadcast %cst_23 : f32 to vector<2x16x8xf32>
    %64 = arith.select %62, %60, %63 : vector<2x16x8xi1>, vector<2x16x8xf32>
    %65 = vector.shape_cast %64 : vector<2x16x8xf32> to vector<32x8xf32>
    %66 = arith.truncf %65 : vector<32x8xf32> to vector<32x8xbf16>
    %c0_24 = arith.constant 0 : index
    %c40 = arith.constant 40 : index
    %67 = vector.load %arg8[%c0_24, %c40] : memref<32x96xbf16, #tpu.memory_space<vmem>>, vector<32x8xbf16>
    tpu.vector_store %arg8[%c0_24, %c40], %66 {strides = array<i32>} : memref<32x96xbf16, #tpu.memory_space<vmem>>, vector<32x8xbf16>,
    %68 = vector.extract_strided_slice %13 {offsets = [0, 0, 16], sizes = [2, 16, 8], strides = [1, 1, 1]} : vector<2x16x96xf32> to vector<2x16x8xf32>
    %69 = arith.truncf %68 : vector<2x16x8xf32> to vector<2x16x8xbf16>
    %70 = vector.extract_strided_slice %13 {offsets = [0, 0, 48], sizes = [2, 16, 8], strides = [1, 1, 1]} : vector<2x16x96xf32> to vector<2x16x8xf32>
    %71 = arith.truncf %70 : vector<2x16x8xf32> to vector<2x16x8xbf16>
    %72 = vector.extract_strided_slice %13 {offsets = [0, 0, 80], sizes = [2, 16, 8], strides = [1, 1, 1]} : vector<2x16x96xf32> to vector<2x16x8xf32>
    %73 = arith.truncf %72 : vector<2x16x8xf32> to vector<2x16x8xbf16>
    "tpu.trace_start"() <{level = 10 : i32, message = "bnd,bmd->bnm"}> : () -> ()
    %cst_25 = arith.constant dense<0.000000e+00> : vector<2x16x16xf32>
    %74 = tpu.matmul %69, %71, %cst_25 {dimension_numbers = #tpu.dot_dimension_numbers<[2], [2], [1], [1], [0, 0, 0, 1, 1, 1], [0], [0]>} : vector<2x16x8xbf16>, vector<2x16x8xbf16>, vector<2x16x16xf32> -> vector<2x16x16xf32>
    "tpu.trace_stop"() : () -> ()
    %75 = arith.addf %74, %5 : vector<2x16x16xf32>
    %cst_26 = arith.constant dense<0xFF800000> : vector<2x16xf32>
    %76 = vector.multi_reduction <maximumf>, %75, %cst_26 [2] : vector<2x16x16xf32> to vector<2x16xf32>
    %77 = vector.shape_cast %76 : vector<2x16xf32> to vector<2x16x1xf32>
    %78 = vector.broadcast %77 : vector<2x16x1xf32> to vector<2x16x16xf32>
    %79 = arith.subf %75, %78 : vector<2x16x16xf32>
    %80 = math.exp %79 : vector<2x16x16xf32>
    %cst_27 = arith.constant dense<0.000000e+00> : vector<2x16xf32>
    %81 = vector.multi_reduction <add>, %80, %cst_27 [2] : vector<2x16x16xf32> to vector<2x16xf32>
    %82 = vector.shape_cast %81 : vector<2x16xf32> to vector<2x16x1xf32>
    %83 = tpu.reciprocal %82 {approx = true} : vector<2x16x1xf32> -> vector<2x16x1xf32>
    %84 = vector.broadcast %83 : vector<2x16x1xf32> to vector<2x16x16xf32>
    %85 = arith.mulf %80, %84 : vector<2x16x16xf32>
    %86 = arith.truncf %85 : vector<2x16x16xf32> to vector<2x16x16xbf16>
    "tpu.trace_start"() <{level = 10 : i32, message = "bnm,bmd->bnd"}> : () -> ()
    %cst_28 = arith.constant dense<0.000000e+00> : vector<2x16x8xf32>
    %87 = tpu.matmul %86, %73, %cst_28 {dimension_numbers = #tpu.dot_dimension_numbers<[2], [1], [1], [2], [0, 0, 0, 1, 1, 2], [0], [0]>} : vector<2x16x16xbf16>, vector<2x16x8xbf16>, vector<2x16x8xf32> -> vector<2x16x8xf32>
    %cst_29 = arith.constant 0.000000e+00 : f32
    "tpu.trace_stop"() : () -> ()
    %88 = vector.shape_cast %9 : vector<2x16x1xi1> to vector<2x16x1xi1>
    %89 = vector.broadcast %88 : vector<2x16x1xi1> to vector<2x16x8xi1>
    %90 = vector.broadcast %cst_29 : f32 to vector<2x16x8xf32>
    %91 = arith.select %89, %87, %90 : vector<2x16x8xi1>, vector<2x16x8xf32>
    %92 = vector.shape_cast %91 : vector<2x16x8xf32> to vector<32x8xf32>
    %93 = arith.truncf %92 : vector<32x8xf32> to vector<32x8xbf16>
    %c0_30 = arith.constant 0 : index
    %c48 = arith.constant 48 : index
    %94 = vector.load %arg8[%c0_30, %c48] : memref<32x96xbf16, #tpu.memory_space<vmem>>, vector<32x8xbf16>
    tpu.vector_store %arg8[%c0_30, %c48], %93 {strides = array<i32>} : memref<32x96xbf16, #tpu.memory_space<vmem>>, vector<32x8xbf16>,
    %95 = vector.extract_strided_slice %13 {offsets = [0, 0, 24], sizes = [2, 16, 8], strides = [1, 1, 1]} : vector<2x16x96xf32> to vector<2x16x8xf32>
    %96 = arith.truncf %95 : vector<2x16x8xf32> to vector<2x16x8xbf16>
    %97 = vector.extract_strided_slice %13 {offsets = [0, 0, 56], sizes = [2, 16, 8], strides = [1, 1, 1]} : vector<2x16x96xf32> to vector<2x16x8xf32>
    %98 = arith.truncf %97 : vector<2x16x8xf32> to vector<2x16x8xbf16>
    %99 = vector.extract_strided_slice %13 {offsets = [0, 0, 88], sizes = [2, 16, 8], strides = [1, 1, 1]} : vector<2x16x96xf32> to vector<2x16x8xf32>
    %100 = arith.truncf %99 : vector<2x16x8xf32> to vector<2x16x8xbf16>
    "tpu.trace_start"() <{level = 10 : i32, message = "bnd,bmd->bnm"}> : () -> ()
    %cst_31 = arith.constant dense<0.000000e+00> : vector<2x16x16xf32>
    %101 = tpu.matmul %96, %98, %cst_31 {dimension_numbers = #tpu.dot_dimension_numbers<[2], [2], [1], [1], [0, 0, 0, 1, 1, 1], [0], [0]>} : vector<2x16x8xbf16>, vector<2x16x8xbf16>, vector<2x16x16xf32> -> vector<2x16x16xf32>
    "tpu.trace_stop"() : () -> ()
    %102 = arith.addf %101, %5 : vector<2x16x16xf32>
    %cst_32 = arith.constant dense<0xFF800000> : vector<2x16xf32>
    %103 = vector.multi_reduction <maximumf>, %102, %cst_32 [2] : vector<2x16x16xf32> to vector<2x16xf32>
    %104 = vector.shape_cast %103 : vector<2x16xf32> to vector<2x16x1xf32>
    %105 = vector.broadcast %104 : vector<2x16x1xf32> to vector<2x16x16xf32>
    %106 = arith.subf %102, %105 : vector<2x16x16xf32>
    %107 = math.exp %106 : vector<2x16x16xf32>
    %cst_33 = arith.constant dense<0.000000e+00> : vector<2x16xf32>
    %108 = vector.multi_reduction <add>, %107, %cst_33 [2] : vector<2x16x16xf32> to vector<2x16xf32>
    %109 = vector.shape_cast %108 : vector<2x16xf32> to vector<2x16x1xf32>
    %110 = tpu.reciprocal %109 {approx = true} : vector<2x16x1xf32> -> vector<2x16x1xf32>
    %111 = vector.broadcast %110 : vector<2x16x1xf32> to vector<2x16x16xf32>
    %112 = arith.mulf %107, %111 : vector<2x16x16xf32>
    %113 = arith.truncf %112 : vector<2x16x16xf32> to vector<2x16x16xbf16>
    "tpu.trace_start"() <{level = 10 : i32, message = "bnm,bmd->bnd"}> : () -> ()
    %cst_34 = arith.constant dense<0.000000e+00> : vector<2x16x8xf32>
    %114 = tpu.matmul %113, %100, %cst_34 {dimension_numbers = #tpu.dot_dimension_numbers<[2], [1], [1], [2], [0, 0, 0, 1, 1, 2], [0], [0]>} : vector<2x16x16xbf16>, vector<2x16x8xbf16>, vector<2x16x8xf32> -> vector<2x16x8xf32>
    %cst_35 = arith.constant 0.000000e+00 : f32
    "tpu.trace_stop"() : () -> ()
    %115 = vector.shape_cast %9 : vector<2x16x1xi1> to vector<2x16x1xi1>
    %116 = vector.broadcast %115 : vector<2x16x1xi1> to vector<2x16x8xi1>
    %117 = vector.broadcast %cst_35 : f32 to vector<2x16x8xf32>
    %118 = arith.select %116, %114, %117 : vector<2x16x8xi1>, vector<2x16x8xf32>
    %119 = vector.shape_cast %118 : vector<2x16x8xf32> to vector<32x8xf32>
    %120 = arith.truncf %119 : vector<32x8xf32> to vector<32x8xbf16>
    %c0_36 = arith.constant 0 : index
    %c56 = arith.constant 56 : index
    %121 = vector.load %arg8[%c0_36, %c56] : memref<32x96xbf16, #tpu.memory_space<vmem>>, vector<32x8xbf16>
    tpu.vector_store %arg8[%c0_36, %c56], %120 {strides = array<i32>} : memref<32x96xbf16, #tpu.memory_space<vmem>>, vector<32x8xbf16>,
    %c0_37 = arith.constant 0 : index
    %c0_38 = arith.constant 0 : index
    %122 = vector.load %arg8[%c0_37, %c0_38] : memref<32x96xbf16, #tpu.memory_space<vmem>>, vector<32x64xbf16>
    %c0_39 = arith.constant 0 : index
    %c0_40 = arith.constant 0 : index
    %123 = vector.load %arg4[%c0_39, %c0_40] : memref<64x96xbf16, #tpu.memory_space<vmem>>, vector<64x96xbf16>
    %cst_41 = arith.constant dense<0.000000e+00> : vector<32x96xf32>
    %124 = tpu.matmul %122, %123, %cst_41 {dimension_numbers = #tpu.dot_dimension_numbers<[1], [0], [0], [1], [0, 0, 1, 1], [], []>} : vector<32x64xbf16>, vector<64x96xbf16>, vector<32x96xf32> -> vector<32x96xf32>
    %125 = vector.shape_cast %124 : vector<32x96xf32> to vector<2x16x96xf32>
    %126 = vector.extract_strided_slice %125 {offsets = [0, 0, 0], sizes = [2, 16, 8], strides = [1, 1, 1]} : vector<2x16x96xf32> to vector<2x16x8xf32>
    %127 = arith.truncf %126 : vector<2x16x8xf32> to vector<2x16x8xbf16>
    %128 = vector.extract_strided_slice %125 {offsets = [0, 0, 32], sizes = [2, 16, 8], strides = [1, 1, 1]} : vector<2x16x96xf32> to vector<2x16x8xf32>
    %129 = arith.truncf %128 : vector<2x16x8xf32> to vector<2x16x8xbf16>
    %130 = vector.extract_strided_slice %125 {offsets = [0, 0, 64], sizes = [2, 16, 8], strides = [1, 1, 1]} : vector<2x16x96xf32> to vector<2x16x8xf32>
    %131 = arith.truncf %130 : vector<2x16x8xf32> to vector<2x16x8xbf16>
    "tpu.trace_start"() <{level = 10 : i32, message = "bnd,bmd->bnm"}> : () -> ()
    %cst_42 = arith.constant dense<0.000000e+00> : vector<2x16x16xf32>
    %132 = tpu.matmul %127, %129, %cst_42 {dimension_numbers = #tpu.dot_dimension_numbers<[2], [2], [1], [1], [0, 0, 0, 1, 1, 1], [0], [0]>} : vector<2x16x8xbf16>, vector<2x16x8xbf16>, vector<2x16x16xf32> -> vector<2x16x16xf32>
    "tpu.trace_stop"() : () -> ()
    %133 = arith.addf %132, %5 : vector<2x16x16xf32>
    %cst_43 = arith.constant dense<0xFF800000> : vector<2x16xf32>
    %134 = vector.multi_reduction <maximumf>, %133, %cst_43 [2] : vector<2x16x16xf32> to vector<2x16xf32>
    %135 = vector.shape_cast %134 : vector<2x16xf32> to vector<2x16x1xf32>
    %136 = vector.broadcast %135 : vector<2x16x1xf32> to vector<2x16x16xf32>
    %137 = arith.subf %133, %136 : vector<2x16x16xf32>
    %138 = math.exp %137 : vector<2x16x16xf32>
    %cst_44 = arith.constant dense<0.000000e+00> : vector<2x16xf32>
    %139 = vector.multi_reduction <add>, %138, %cst_44 [2] : vector<2x16x16xf32> to vector<2x16xf32>
    %140 = vector.shape_cast %139 : vector<2x16xf32> to vector<2x16x1xf32>
    %141 = tpu.reciprocal %140 {approx = true} : vector<2x16x1xf32> -> vector<2x16x1xf32>
    %142 = vector.broadcast %141 : vector<2x16x1xf32> to vector<2x16x16xf32>
    %143 = arith.mulf %138, %142 : vector<2x16x16xf32>
    %144 = arith.truncf %143 : vector<2x16x16xf32> to vector<2x16x16xbf16>
    "tpu.trace_start"() <{level = 10 : i32, message = "bnm,bmd->bnd"}> : () -> ()
    %cst_45 = arith.constant dense<0.000000e+00> : vector<2x16x8xf32>
    %145 = tpu.matmul %144, %131, %cst_45 {dimension_numbers = #tpu.dot_dimension_numbers<[2], [1], [1], [2], [0, 0, 0, 1, 1, 2], [0], [0]>} : vector<2x16x16xbf16>, vector<2x16x8xbf16>, vector<2x16x8xf32> -> vector<2x16x8xf32>
    %cst_46 = arith.constant 0.000000e+00 : f32
    "tpu.trace_stop"() : () -> ()
    %146 = vector.shape_cast %9 : vector<2x16x1xi1> to vector<2x16x1xi1>
    %147 = vector.broadcast %146 : vector<2x16x1xi1> to vector<2x16x8xi1>
    %148 = vector.broadcast %cst_46 : f32 to vector<2x16x8xf32>
    %149 = arith.select %147, %145, %148 : vector<2x16x8xi1>, vector<2x16x8xf32>
    %150 = vector.shape_cast %149 : vector<2x16x8xf32> to vector<32x8xf32>
    %151 = arith.truncf %150 : vector<32x8xf32> to vector<32x8xbf16>
    %c0_47 = arith.constant 0 : index
    %c64 = arith.constant 64 : index
    %152 = vector.load %arg8[%c0_47, %c64] : memref<32x96xbf16, #tpu.memory_space<vmem>>, vector<32x8xbf16>
    tpu.vector_store %arg8[%c0_47, %c64], %151 {strides = array<i32>} : memref<32x96xbf16, #tpu.memory_space<vmem>>, vector<32x8xbf16>,
    %153 = vector.extract_strided_slice %125 {offsets = [0, 0, 8], sizes = [2, 16, 8], strides = [1, 1, 1]} : vector<2x16x96xf32> to vector<2x16x8xf32>
    %154 = arith.truncf %153 : vector<2x16x8xf32> to vector<2x16x8xbf16>
    %155 = vector.extract_strided_slice %125 {offsets = [0, 0, 40], sizes = [2, 16, 8], strides = [1, 1, 1]} : vector<2x16x96xf32> to vector<2x16x8xf32>
    %156 = arith.truncf %155 : vector<2x16x8xf32> to vector<2x16x8xbf16>
    %157 = vector.extract_strided_slice %125 {offsets = [0, 0, 72], sizes = [2, 16, 8], strides = [1, 1, 1]} : vector<2x16x96xf32> to vector<2x16x8xf32>
    %158 = arith.truncf %157 : vector<2x16x8xf32> to vector<2x16x8xbf16>
    "tpu.trace_start"() <{level = 10 : i32, message = "bnd,bmd->bnm"}> : () -> ()
    %cst_48 = arith.constant dense<0.000000e+00> : vector<2x16x16xf32>
    %159 = tpu.matmul %154, %156, %cst_48 {dimension_numbers = #tpu.dot_dimension_numbers<[2], [2], [1], [1], [0, 0, 0, 1, 1, 1], [0], [0]>} : vector<2x16x8xbf16>, vector<2x16x8xbf16>, vector<2x16x16xf32> -> vector<2x16x16xf32>
    "tpu.trace_stop"() : () -> ()
    %160 = arith.addf %159, %5 : vector<2x16x16xf32>
    %cst_49 = arith.constant dense<0xFF800000> : vector<2x16xf32>
    %161 = vector.multi_reduction <maximumf>, %160, %cst_49 [2] : vector<2x16x16xf32> to vector<2x16xf32>
    %162 = vector.shape_cast %161 : vector<2x16xf32> to vector<2x16x1xf32>
    %163 = vector.broadcast %162 : vector<2x16x1xf32> to vector<2x16x16xf32>
    %164 = arith.subf %160, %163 : vector<2x16x16xf32>
    %165 = math.exp %164 : vector<2x16x16xf32>
    %cst_50 = arith.constant dense<0.000000e+00> : vector<2x16xf32>
    %166 = vector.multi_reduction <add>, %165, %cst_50 [2] : vector<2x16x16xf32> to vector<2x16xf32>
    %167 = vector.shape_cast %166 : vector<2x16xf32> to vector<2x16x1xf32>
    %168 = tpu.reciprocal %167 {approx = true} : vector<2x16x1xf32> -> vector<2x16x1xf32>
    %169 = vector.broadcast %168 : vector<2x16x1xf32> to vector<2x16x16xf32>
    %170 = arith.mulf %165, %169 : vector<2x16x16xf32>
    %171 = arith.truncf %170 : vector<2x16x16xf32> to vector<2x16x16xbf16>
    "tpu.trace_start"() <{level = 10 : i32, message = "bnm,bmd->bnd"}> : () -> ()
    %cst_51 = arith.constant dense<0.000000e+00> : vector<2x16x8xf32>
    %172 = tpu.matmul %171, %158, %cst_51 {dimension_numbers = #tpu.dot_dimension_numbers<[2], [1], [1], [2], [0, 0, 0, 1, 1, 2], [0], [0]>} : vector<2x16x16xbf16>, vector<2x16x8xbf16>, vector<2x16x8xf32> -> vector<2x16x8xf32>
    %cst_52 = arith.constant 0.000000e+00 : f32
    "tpu.trace_stop"() : () -> ()
    %173 = vector.shape_cast %9 : vector<2x16x1xi1> to vector<2x16x1xi1>
    %174 = vector.broadcast %173 : vector<2x16x1xi1> to vector<2x16x8xi1>
    %175 = vector.broadcast %cst_52 : f32 to vector<2x16x8xf32>
    %176 = arith.select %174, %172, %175 : vector<2x16x8xi1>, vector<2x16x8xf32>
    %177 = vector.shape_cast %176 : vector<2x16x8xf32> to vector<32x8xf32>
    %178 = arith.truncf %177 : vector<32x8xf32> to vector<32x8xbf16>
    %c0_53 = arith.constant 0 : index
    %c72 = arith.constant 72 : index
    %179 = vector.load %arg8[%c0_53, %c72] : memref<32x96xbf16, #tpu.memory_space<vmem>>, vector<32x8xbf16>
    tpu.vector_store %arg8[%c0_53, %c72], %178 {strides = array<i32>} : memref<32x96xbf16, #tpu.memory_space<vmem>>, vector<32x8xbf16>,
    %180 = vector.extract_strided_slice %125 {offsets = [0, 0, 16], sizes = [2, 16, 8], strides = [1, 1, 1]} : vector<2x16x96xf32> to vector<2x16x8xf32>
    %181 = arith.truncf %180 : vector<2x16x8xf32> to vector<2x16x8xbf16>
    %182 = vector.extract_strided_slice %125 {offsets = [0, 0, 48], sizes = [2, 16, 8], strides = [1, 1, 1]} : vector<2x16x96xf32> to vector<2x16x8xf32>
    %183 = arith.truncf %182 : vector<2x16x8xf32> to vector<2x16x8xbf16>
    %184 = vector.extract_strided_slice %125 {offsets = [0, 0, 80], sizes = [2, 16, 8], strides = [1, 1, 1]} : vector<2x16x96xf32> to vector<2x16x8xf32>
    %185 = arith.truncf %184 : vector<2x16x8xf32> to vector<2x16x8xbf16>
    "tpu.trace_start"() <{level = 10 : i32, message = "bnd,bmd->bnm"}> : () -> ()
    %cst_54 = arith.constant dense<0.000000e+00> : vector<2x16x16xf32>
    %186 = tpu.matmul %181, %183, %cst_54 {dimension_numbers = #tpu.dot_dimension_numbers<[2], [2], [1], [1], [0, 0, 0, 1, 1, 1], [0], [0]>} : vector<2x16x8xbf16>, vector<2x16x8xbf16>, vector<2x16x16xf32> -> vector<2x16x16xf32>
    "tpu.trace_stop"() : () -> ()
    %187 = arith.addf %186, %5 : vector<2x16x16xf32>
    %cst_55 = arith.constant dense<0xFF800000> : vector<2x16xf32>
    %188 = vector.multi_reduction <maximumf>, %187, %cst_55 [2] : vector<2x16x16xf32> to vector<2x16xf32>
    %189 = vector.shape_cast %188 : vector<2x16xf32> to vector<2x16x1xf32>
    %190 = vector.broadcast %189 : vector<2x16x1xf32> to vector<2x16x16xf32>
    %191 = arith.subf %187, %190 : vector<2x16x16xf32>
    %192 = math.exp %191 : vector<2x16x16xf32>
    %cst_56 = arith.constant dense<0.000000e+00> : vector<2x16xf32>
    %193 = vector.multi_reduction <add>, %192, %cst_56 [2] : vector<2x16x16xf32> to vector<2x16xf32>
    %194 = vector.shape_cast %193 : vector<2x16xf32> to vector<2x16x1xf32>
    %195 = tpu.reciprocal %194 {approx = true} : vector<2x16x1xf32> -> vector<2x16x1xf32>
    %196 = vector.broadcast %195 : vector<2x16x1xf32> to vector<2x16x16xf32>
    %197 = arith.mulf %192, %196 : vector<2x16x16xf32>
    %198 = arith.truncf %197 : vector<2x16x16xf32> to vector<2x16x16xbf16>
    "tpu.trace_start"() <{level = 10 : i32, message = "bnm,bmd->bnd"}> : () -> ()
    %cst_57 = arith.constant dense<0.000000e+00> : vector<2x16x8xf32>
    %199 = tpu.matmul %198, %185, %cst_57 {dimension_numbers = #tpu.dot_dimension_numbers<[2], [1], [1], [2], [0, 0, 0, 1, 1, 2], [0], [0]>} : vector<2x16x16xbf16>, vector<2x16x8xbf16>, vector<2x16x8xf32> -> vector<2x16x8xf32>
    %cst_58 = arith.constant 0.000000e+00 : f32
    "tpu.trace_stop"() : () -> ()
    %200 = vector.shape_cast %9 : vector<2x16x1xi1> to vector<2x16x1xi1>
    %201 = vector.broadcast %200 : vector<2x16x1xi1> to vector<2x16x8xi1>
    %202 = vector.broadcast %cst_58 : f32 to vector<2x16x8xf32>
    %203 = arith.select %201, %199, %202 : vector<2x16x8xi1>, vector<2x16x8xf32>
    %204 = vector.shape_cast %203 : vector<2x16x8xf32> to vector<32x8xf32>
    %205 = arith.truncf %204 : vector<32x8xf32> to vector<32x8xbf16>
    %c0_59 = arith.constant 0 : index
    %c80 = arith.constant 80 : index
    %206 = vector.load %arg8[%c0_59, %c80] : memref<32x96xbf16, #tpu.memory_space<vmem>>, vector<32x8xbf16>
    tpu.vector_store %arg8[%c0_59, %c80], %205 {strides = array<i32>} : memref<32x96xbf16, #tpu.memory_space<vmem>>, vector<32x8xbf16>,
    %207 = vector.extract_strided_slice %125 {offsets = [0, 0, 24], sizes = [2, 16, 8], strides = [1, 1, 1]} : vector<2x16x96xf32> to vector<2x16x8xf32>
    %208 = arith.truncf %207 : vector<2x16x8xf32> to vector<2x16x8xbf16>
    %209 = vector.extract_strided_slice %125 {offsets = [0, 0, 56], sizes = [2, 16, 8], strides = [1, 1, 1]} : vector<2x16x96xf32> to vector<2x16x8xf32>
    %210 = arith.truncf %209 : vector<2x16x8xf32> to vector<2x16x8xbf16>
    %211 = vector.extract_strided_slice %125 {offsets = [0, 0, 88], sizes = [2, 16, 8], strides = [1, 1, 1]} : vector<2x16x96xf32> to vector<2x16x8xf32>
    %212 = arith.truncf %211 : vector<2x16x8xf32> to vector<2x16x8xbf16>
    "tpu.trace_start"() <{level = 10 : i32, message = "bnd,bmd->bnm"}> : () -> ()
    %cst_60 = arith.constant dense<0.000000e+00> : vector<2x16x16xf32>
    %213 = tpu.matmul %208, %210, %cst_60 {dimension_numbers = #tpu.dot_dimension_numbers<[2], [2], [1], [1], [0, 0, 0, 1, 1, 1], [0], [0]>} : vector<2x16x8xbf16>, vector<2x16x8xbf16>, vector<2x16x16xf32> -> vector<2x16x16xf32>
    "tpu.trace_stop"() : () -> ()
    %214 = arith.addf %213, %5 : vector<2x16x16xf32>
    %cst_61 = arith.constant dense<0xFF800000> : vector<2x16xf32>
    %215 = vector.multi_reduction <maximumf>, %214, %cst_61 [2] : vector<2x16x16xf32> to vector<2x16xf32>
    %216 = vector.shape_cast %215 : vector<2x16xf32> to vector<2x16x1xf32>
    %217 = vector.broadcast %216 : vector<2x16x1xf32> to vector<2x16x16xf32>
    %218 = arith.subf %214, %217 : vector<2x16x16xf32>
    %219 = math.exp %218 : vector<2x16x16xf32>
    %cst_62 = arith.constant dense<0.000000e+00> : vector<2x16xf32>
    %220 = vector.multi_reduction <add>, %219, %cst_62 [2] : vector<2x16x16xf32> to vector<2x16xf32>
    %221 = vector.shape_cast %220 : vector<2x16xf32> to vector<2x16x1xf32>
    %222 = tpu.reciprocal %221 {approx = true} : vector<2x16x1xf32> -> vector<2x16x1xf32>
    %223 = vector.broadcast %222 : vector<2x16x1xf32> to vector<2x16x16xf32>
    %224 = arith.mulf %219, %223 : vector<2x16x16xf32>
    %225 = arith.truncf %224 : vector<2x16x16xf32> to vector<2x16x16xbf16>
    "tpu.trace_start"() <{level = 10 : i32, message = "bnm,bmd->bnd"}> : () -> ()
    %cst_63 = arith.constant dense<0.000000e+00> : vector<2x16x8xf32>
    %226 = tpu.matmul %225, %212, %cst_63 {dimension_numbers = #tpu.dot_dimension_numbers<[2], [1], [1], [2], [0, 0, 0, 1, 1, 2], [0], [0]>} : vector<2x16x16xbf16>, vector<2x16x8xbf16>, vector<2x16x8xf32> -> vector<2x16x8xf32>
    %cst_64 = arith.constant 0.000000e+00 : f32
    "tpu.trace_stop"() : () -> ()
    %227 = vector.shape_cast %9 : vector<2x16x1xi1> to vector<2x16x1xi1>
    %228 = vector.broadcast %227 : vector<2x16x1xi1> to vector<2x16x8xi1>
    %229 = vector.broadcast %cst_64 : f32 to vector<2x16x8xf32>
    %230 = arith.select %228, %226, %229 : vector<2x16x8xi1>, vector<2x16x8xf32>
    %231 = vector.shape_cast %230 : vector<2x16x8xf32> to vector<32x8xf32>
    %232 = arith.truncf %231 : vector<32x8xf32> to vector<32x8xbf16>
    %c0_65 = arith.constant 0 : index
    %c88 = arith.constant 88 : index
    %233 = vector.load %arg8[%c0_65, %c88] : memref<32x96xbf16, #tpu.memory_space<vmem>>, vector<32x8xbf16>
    tpu.vector_store %arg8[%c0_65, %c88], %232 {strides = array<i32>} : memref<32x96xbf16, #tpu.memory_space<vmem>>, vector<32x8xbf16>,
    %c0_66 = arith.constant 0 : index
    %c0_67 = arith.constant 0 : index
    %234 = vector.load %arg8[%c0_66, %c0_67] : memref<32x96xbf16, #tpu.memory_space<vmem>>, vector<32x96xbf16>
    %c0_68 = arith.constant 0 : index
    %c0_69 = arith.constant 0 : index
    %235 = vector.load %arg5[%c0_68, %c0_69] : memref<96x128xbf16, #tpu.memory_space<vmem>>, vector<96x128xbf16>
    %cst_70 = arith.constant dense<0.000000e+00> : vector<32x128xf32>
    %236 = tpu.matmul %234, %235, %cst_70 {dimension_numbers = #tpu.dot_dimension_numbers<[1], [0], [0], [1], [0, 0, 1, 1], [], []>} : vector<32x96xbf16>, vector<96x128xbf16>, vector<32x128xf32> -> vector<32x128xf32>
    %c0_71 = arith.constant 0 : index
    %c0_72 = arith.constant 0 : index
    %237 = vector.load %arg6[%c0_71, %c0_72] : memref<1x128xbf16, #tpu.memory_space<vmem>>, vector<1x128xbf16>
    %238 = arith.extf %237 : vector<1x128xbf16> to vector<1x128xf32>
    %239 = vector.broadcast %238 : vector<1x128xf32> to vector<32x128xf32>
    %240 = arith.addf %236, %239 : vector<32x128xf32>
    %cst_73 = arith.constant 0.000000e+00 : f32
    %241 = vector.broadcast %cst_73 : f32 to vector<32x128xf32>
    %242 = arith.maximumf %240, %241 : vector<32x128xf32>
    %243 = vector.shape_cast %242 : vector<32x128xf32> to vector<2x16x128xf32>
    %c0_74 = arith.constant 0 : index
    %c0_75 = arith.constant 0 : index
    %c0_76 = arith.constant 0 : index
    %244 = vector.load %arg7[%c0_74, %c0_75, %c0_76] : memref<2x16x128xf32, #tpu.memory_space<vmem>>, vector<2x16x128xf32>
    tpu.vector_store %arg7[%c0_74, %c0_75, %c0_76], %243 {strides = array<i32>} : memref<2x16x128xf32, #tpu.memory_space<vmem>>, vector<2x16x128xf32>,
    return
  }
  func.func @transform_0(%arg0: i32) -> (i32, i32, i32) {
    %c0_i32 = arith.constant 0 : i32
    %c0_i32_0 = arith.constant 0 : i32
    %c0_i32_1 = arith.constant 0 : i32
    return %arg0, %c0_i32, %c0_i32_0 : i32, i32, i32
  }
  func.func @transform_1(%arg0: i32) -> (i32, i32, i32) {
    %c0_i32 = arith.constant 0 : i32
    %c0_i32_0 = arith.constant 0 : i32
    %c0_i32_1 = arith.constant 0 : i32
    return %arg0, %c0_i32, %c0_i32_0 : i32, i32, i32
  }
  func.func @transform_2(%arg0: i32) -> (i32, i32) {
    %c0_i32 = arith.constant 0 : i32
    %c0_i32_0 = arith.constant 0 : i32
    %c0_i32_1 = arith.constant 0 : i32
    return %c0_i32, %c0_i32_0 : i32, i32
  }
  func.func @transform_3(%arg0: i32) -> (i32, i32) {
    %c0_i32 = arith.constant 0 : i32
    %c0_i32_0 = arith.constant 0 : i32
    %c0_i32_1 = arith.constant 0 : i32
    return %c0_i32, %c0_i32_0 : i32, i32
  }
  func.func @transform_4(%arg0: i32) -> (i32, i32) {
    %c0_i32 = arith.constant 0 : i32
    %c0_i32_0 = arith.constant 0 : i32
    %c0_i32_1 = arith.constant 0 : i32
    return %c0_i32, %c0_i32_0 : i32, i32
  }
  func.func @transform_5(%arg0: i32) -> (i32, i32) {
    %c0_i32 = arith.constant 0 : i32
    %c0_i32_0 = arith.constant 0 : i32
    %c0_i32_1 = arith.constant 0 : i32
    return %c0_i32, %c0_i32_0 : i32, i32
  }
  func.func @transform_6(%arg0: i32) -> (i32, i32, i32) {
    %c0_i32 = arith.constant 0 : i32
    %c0_i32_0 = arith.constant 0 : i32
    %c0_i32_1 = arith.constant 0 : i32
    return %arg0, %c0_i32, %c0_i32_0 : i32, i32, i32
  }
}

module attributes {stable_mosaic.version = 11 : i64} {
  func.func @_graph_reason_kernel(%arg0: i32, %arg1: memref<2x16x32xf32, #tpu.memory_space<vmem>>, %arg2: memref<2x16x16xbf16, #tpu.memory_space<vmem>>, %arg3: memref<32x96xbf16, #tpu.memory_space<vmem>>, %arg4: memref<64x96xbf16, #tpu.memory_space<vmem>>, %arg5: memref<96x128xbf16, #tpu.memory_space<vmem>>, %arg6: memref<1x128xbf16, #tpu.memory_space<vmem>>, %arg7: memref<2x16x128xf32, #tpu.memory_space<vmem>>, %arg8: memref<32x96xbf16, #tpu.memory_space<vmem>>) attributes {dimension_semantics = [#tpu.dimension_semantics<parallel>], iteration_bounds = array<i64: 1>, scalar_prefetch = 0 : i64, scratch_operands = 1 : i64, tpu.core_type = #tpu.core_type<tc>, window_params = [{transform_indices = @transform_0, window_bounds = array<i64: 2, 16, 32>}, {transform_indices = @transform_1, window_bounds = array<i64: 2, 16, 16>}, {pipeline_mode = #tpu.pipeline_mode<synchronous>, transform_indices = @transform_2, window_bounds = array<i64: 32, 96>}, {pipeline_mode = #tpu.pipeline_mode<synchronous>, transform_indices = @transform_3, window_bounds = array<i64: 64, 96>}, {pipeline_mode = #tpu.pipeline_mode<synchronous>, transform_indices = @transform_4, window_bounds = array<i64: 96, 128>}, {pipeline_mode = #tpu.pipeline_mode<synchronous>, transform_indices = @transform_5, window_bounds = array<i64: 1, 128>}, {transform_indices = @transform_6, window_bounds = array<i64: 2, 16, 128>}]} {
    %c0 = arith.constant 0 : index
    %c0_0 = arith.constant 0 : index
    %c0_1 = arith.constant 0 : index
    %0 = vector.load %arg1[%c0, %c0_0, %c0_1] : memref<2x16x32xf32, #tpu.memory_space<vmem>>, vector<2x16x32xf32>
    %1 = vector.shape_cast %0 : vector<2x16x32xf32> to vector<32x32xf32>
    %2 = arith.truncf %1 : vector<32x32xf32> to vector<32x32xbf16>
    %c0_2 = arith.constant 0 : index
    %c0_3 = arith.constant 0 : index
    %3 = vector.load %arg8[%c0_2, %c0_3] : memref<32x96xbf16, #tpu.memory_space<vmem>>, vector<32x32xbf16>
    tpu.vector_store %arg8[%c0_2, %c0_3], %2 {strides = array<i32>} : memref<32x96xbf16, #tpu.memory_space<vmem>>, vector<32x32xbf16>,
    %c0_4 = arith.constant 0 : index
    %c0_5 = arith.constant 0 : index
    %c0_6 = arith.constant 0 : index
    %4 = vector.load %arg2[%c0_4, %c0_5, %c0_6] : memref<2x16x16xbf16, #tpu.memory_space<vmem>>, vector<2x16x16xbf16>
    %5 = arith.extf %4 : vector<2x16x16xbf16> to vector<2x16x16xf32>
    %cst = arith.constant dense<0xFF800000> : vector<2x16xf32>
    %6 = vector.multi_reduction <maximumf>, %5, %cst [2] : vector<2x16x16xf32> to vector<2x16xf32>
    %7 = vector.shape_cast %6 : vector<2x16xf32> to vector<2x16x1xf32>
    %cst_7 = arith.constant -1.000000e+00 : f32
    %8 = vector.broadcast %cst_7 : f32 to vector<2x16x1xf32>
    %9 = arith.cmpf ogt, %7, %8 : vector<2x16x1xf32>
    %c0_8 = arith.constant 0 : index
    %c0_9 = arith.constant 0 : index
    %10 = vector.load %arg8[%c0_8, %c0_9] : memref<32x96xbf16, #tpu.memory_space<vmem>>, vector<32x32xbf16>
    %c0_10 = arith.constant 0 : index
    %c0_11 = arith.constant 0 : index
    %11 = vector.load %arg3[%c0_10, %c0_11] : memref<32x96xbf16, #tpu.memory_space<vmem>>, vector<32x96xbf16>
    %cst_12 = arith.constant dense<0.000000e+00> : vector<32x96xf32>
    %12 = tpu.matmul %10, %11, %cst_12 {dimension_numbers = #tpu.dot_dimension_numbers<[1], [0], [0], [1], [0, 0, 1, 1], [], []>} : vector<32x32xbf16>, vector<32x96xbf16>, vector<32x96xf32> -> vector<32x96xf32>
    %13 = vector.shape_cast %12 : vector<32x96xf32> to vector<2x16x96xf32>
    %14 = vector.extract_strided_slice %13 {offsets = [0, 0, 0], sizes = [2, 16, 8], strides = [1, 1, 1]} : vector<2x16x96xf32> to vector<2x16x8xf32>
    %15 = arith.truncf %14 : vector<2x16x8xf32> to vector<2x16x8xbf16>
    %16 = vector.extract_strided_slice %13 {offsets = [0, 0, 32], sizes = [2, 16, 8], strides = [1, 1, 1]} : vector<2x16x96xf32> to vector<2x16x8xf32>
    %17 = arith.truncf %16 : vector<2x16x8xf32> to vector<2x16x8xbf16>
    %18 = vector.extract_strided_slice %13 {offsets = [0, 0, 64], sizes = [2, 16, 8], strides = [1, 1, 1]} : vector<2x16x96xf32> to vector<2x16x8xf32>
    %19 = arith.truncf %18 : vector<2x16x8xf32> to vector<2x16x8xbf16>
    "tpu.trace_start"() <{level = 10 : i32, message = "bnd,bmd->bnm"}> : () -> ()
    %cst_13 = arith.constant dense<0.000000e+00> : vector<2x16x16xf32>
    %20 = tpu.matmul %15, %17, %cst_13 {dimension_numbers = #tpu.dot_dimension_numbers<[2], [2], [1], [1], [0, 0, 0, 1, 1, 1], [0], [0]>} : vector<2x16x8xbf16>, vector<2x16x8xbf16>, vector<2x16x16xf32> -> vector<2x16x16xf32>
    "tpu.trace_stop"() : () -> ()
    %21 = arith.addf %20, %5 : vector<2x16x16xf32>
    %cst_14 = arith.constant dense<0xFF800000> : vector<2x16xf32>
    %22 = vector.multi_reduction <maximumf>, %21, %cst_14 [2] : vector<2x16x16xf32> to vector<2x16xf32>
    %23 = vector.shape_cast %22 : vector<2x16xf32> to vector<2x16x1xf32>
    %24 = vector.broadcast %23 : vector<2x16x1xf32> to vector<2x16x16xf32>
    %25 = arith.subf %21, %24 : vector<2x16x16xf32>
    %26 = math.exp %25 : vector<2x16x16xf32>
    %cst_15 = arith.constant dense<0.000000e+00> : vector<2x16xf32>
    %27 = vector.multi_reduction <add>, %26, %cst_15 [2] : vector<2x16x16xf32> to vector<2x16xf32>
    %28 = vector.shape_cast %27 : vector<2x16xf32> to vector<2x16x1xf32>
    %29 = tpu.reciprocal %28 {approx = true} : vector<2x16x1xf32> -> vector<2x16x1xf32>
    %30 = vector.broadcast %29 : vector<2x16x1xf32> to vector<2x16x16xf32>
    %31 = arith.mulf %26, %30 : vector<2x16x16xf32>
    %32 = arith.truncf %31 : vector<2x16x16xf32> to vector<2x16x16xbf16>
    "tpu.trace_start"() <{level = 10 : i32, message = "bnm,bmd->bnd"}> : () -> ()
    %cst_16 = arith.constant dense<0.000000e+00> : vector<2x16x8xf32>
    %33 = tpu.matmul %32, %19, %cst_16 {dimension_numbers = #tpu.dot_dimension_numbers<[2], [1], [1], [2], [0, 0, 0, 1, 1, 2], [0], [0]>} : vector<2x16x16xbf16>, vector<2x16x8xbf16>, vector<2x16x8xf32> -> vector<2x16x8xf32>
    %cst_17 = arith.constant 0.000000e+00 : f32
    "tpu.trace_stop"() : () -> ()
    %34 = vector.shape_cast %9 : vector<2x16x1xi1> to vector<2x16x1xi1>
    %35 = vector.broadcast %34 : vector<2x16x1xi1> to vector<2x16x8xi1>
    %36 = vector.broadcast %cst_17 : f32 to vector<2x16x8xf32>
    %37 = arith.select %35, %33, %36 : vector<2x16x8xi1>, vector<2x16x8xf32>
    %38 = vector.shape_cast %37 : vector<2x16x8xf32> to vector<32x8xf32>
    %39 = arith.truncf %38 : vector<32x8xf32> to vector<32x8xbf16>
    %c0_18 = arith.constant 0 : index
    %c32 = arith.constant 32 : index
    %40 = vector.load %arg8[%c0_18, %c32] : memref<32x96xbf16, #tpu.memory_space<vmem>>, vector<32x8xbf16>
    tpu.vector_store %arg8[%c0_18, %c32], %39 {strides = array<i32>} : memref<32x96xbf16, #tpu.memory_space<vmem>>, vector<32x8xbf16>,
    %41 = vector.extract_strided_slice %13 {offsets = [0, 0, 8], sizes = [2, 16, 8], strides = [1, 1, 1]} : vector<2x16x96xf32> to vector<2x16x8xf32>
    %42 = arith.truncf %41 : vector<2x16x8xf32> to vector<2x16x8xbf16>
    %43 = vector.extract_strided_slice %13 {offsets = [0, 0, 40], sizes = [2, 16, 8], strides = [1, 1, 1]} : vector<2x16x96xf32> to vector<2x16x8xf32>
    %44 = arith.truncf %43 : vector<2x16x8xf32> to vector<2x16x8xbf16>
    %45 = vector.extract_strided_slice %13 {offsets = [0, 0, 72], sizes = [2, 16, 8], strides = [1, 1, 1]} : vector<2x16x96xf32> to vector<2x16x8xf32>
    %46 = arith.truncf %45 : vector<2x16x8xf32> to vector<2x16x8xbf16>
    "tpu.trace_start"() <{level = 10 : i32, message = "bnd,bmd->bnm"}> : () -> ()
    %cst_19 = arith.constant dense<0.000000e+00> : vector<2x16x16xf32>
    %47 = tpu.matmul %42, %44, %cst_19 {dimension_numbers = #tpu.dot_dimension_numbers<[2], [2], [1], [1], [0, 0, 0, 1, 1, 1], [0], [0]>} : vector<2x16x8xbf16>, vector<2x16x8xbf16>, vector<2x16x16xf32> -> vector<2x16x16xf32>
    "tpu.trace_stop"() : () -> ()
    %48 = arith.addf %47, %5 : vector<2x16x16xf32>
    %cst_20 = arith.constant dense<0xFF800000> : vector<2x16xf32>
    %49 = vector.multi_reduction <maximumf>, %48, %cst_20 [2] : vector<2x16x16xf32> to vector<2x16xf32>
    %50 = vector.shape_cast %49 : vector<2x16xf32> to vector<2x16x1xf32>
    %51 = vector.broadcast %50 : vector<2x16x1xf32> to vector<2x16x16xf32>
    %52 = arith.subf %48, %51 : vector<2x16x16xf32>
    %53 = math.exp %52 : vector<2x16x16xf32>
    %cst_21 = arith.constant dense<0.000000e+00> : vector<2x16xf32>
    %54 = vector.multi_reduction <add>, %53, %cst_21 [2] : vector<2x16x16xf32> to vector<2x16xf32>
    %55 = vector.shape_cast %54 : vector<2x16xf32> to vector<2x16x1xf32>
    %56 = tpu.reciprocal %55 {approx = true} : vector<2x16x1xf32> -> vector<2x16x1xf32>
    %57 = vector.broadcast %56 : vector<2x16x1xf32> to vector<2x16x16xf32>
    %58 = arith.mulf %53, %57 : vector<2x16x16xf32>
    %59 = arith.truncf %58 : vector<2x16x16xf32> to vector<2x16x16xbf16>
    "tpu.trace_start"() <{level = 10 : i32, message = "bnm,bmd->bnd"}> : () -> ()
    %cst_22 = arith.constant dense<0.000000e+00> : vector<2x16x8xf32>
    %60 = tpu.matmul %59, %46, %cst_22 {dimension_numbers = #tpu.dot_dimension_numbers<[2], [1], [1], [2], [0, 0, 0, 1, 1, 2], [0], [0]>} : vector<2x16x16xbf16>, vector<2x16x8xbf16>, vector<2x16x8xf32> -> vector<2x16x8xf32>
    %cst_23 = arith.constant 0.000000e+00 : f32
    "tpu.trace_stop"() : () -> ()
    %61 = vector.shape_cast %9 : vector<2x16x1xi1> to vector<2x16x1xi1>
    %62 = vector.broadcast %61 : vector<2x16x1xi1> to vector<2x16x8xi1>
    %63 = vector.broadcast %cst_23 : f32 to vector<2x16x8xf32>
    %64 = arith.select %62, %60, %63 : vector<2x16x8xi1>, vector<2x16x8xf32>
    %65 = vector.shape_cast %64 : vector<2x16x8xf32> to vector<32x8xf32>
    %66 = arith.truncf %65 : vector<32x8xf32> to vector<32x8xbf16>
    %c0_24 = arith.constant 0 : index
    %c40 = arith.constant 40 : index
    %67 = vector.load %arg8[%c0_24, %c40] : memref<32x96xbf16, #tpu.memory_space<vmem>>, vector<32x8xbf16>
    tpu.vector_store %arg8[%c0_24, %c40], %66 {strides = array<i32>} : memref<32x96xbf16, #tpu.memory_space<vmem>>, vector<32x8xbf16>,
    %68 = vector.extract_strided_slice %13 {offsets = [0, 0, 16], sizes = [2, 16, 8], strides = [1, 1, 1]} : vector<2x16x96xf32> to vector<2x16x8xf32>
    %69 = arith.truncf %68 : vector<2x16x8xf32> to vector<2x16x8xbf16>
    %70 = vector.extract_strided_slice %13 {offsets = [0, 0, 48], sizes = [2, 16, 8], strides = [1, 1, 1]} : vector<2x16x96xf32> to vector<2x16x8xf32>
    %71 = arith.truncf %70 : vector<2x16x8xf32> to vector<2x16x8xbf16>
    %72 = vector.extract_strided_slice %13 {offsets = [0, 0, 80], sizes = [2, 16, 8], strides = [1, 1, 1]} : vector<2x16x96xf32> to vector<2x16x8xf32>
    %73 = arith.truncf %72 : vector<2x16x8xf32> to vector<2x16x8xbf16>
    "tpu.trace_start"() <{level = 10 : i32, message = "bnd,bmd->bnm"}> : () -> ()
    %cst_25 = arith.constant dense<0.000000e+00> : vector<2x16x16xf32>
    %74 = tpu.matmul %69, %71, %cst_25 {dimension_numbers = #tpu.dot_dimension_numbers<[2], [2], [1], [1], [0, 0, 0, 1, 1, 1], [0], [0]>} : vector<2x16x8xbf16>, vector<2x16x8xbf16>, vector<2x16x16xf32> -> vector<2x16x16xf32>
    "tpu.trace_stop"() : () -> ()
    %75 = arith.addf %74, %5 : vector<2x16x16xf32>
    %cst_26 = arith.constant dense<0xFF800000> : vector<2x16xf32>
    %76 = vector.multi_reduction <maximumf>, %75, %cst_26 [2] : vector<2x16x16xf32> to vector<2x16xf32>
    %77 = vector.shape_cast %76 : vector<2x16xf32> to vector<2x16x1xf32>
    %78 = vector.broadcast %77 : vector<2x16x1xf32> to vector<2x16x16xf32>
    %79 = arith.subf %75, %78 : vector<2x16x16xf32>
    %80 = math.exp %79 : vector<2x16x16xf32>
    %cst_27 = arith.constant dense<0.000000e+00> : vector<2x16xf32>
    %81 = vector.multi_reduction <add>, %80, %cst_27 [2] : vector<2x16x16xf32> to vector<2x16xf32>
    %82 = vector.shape_cast %81 : vector<2x16xf32> to vector<2x16x1xf32>
    %83 = tpu.reciprocal %82 {approx = true} : vector<2x16x1xf32> -> vector<2x16x1xf32>
    %84 = vector.broadcast %83 : vector<2x16x1xf32> to vector<2x16x16xf32>
    %85 = arith.mulf %80, %84 : vector<2x16x16xf32>
    %86 = arith.truncf %85 : vector<2x16x16xf32> to vector<2x16x16xbf16>
    "tpu.trace_start"() <{level = 10 : i32, message = "bnm,bmd->bnd"}> : () -> ()
    %cst_28 = arith.constant dense<0.000000e+00> : vector<2x16x8xf32>
    %87 = tpu.matmul %86, %73, %cst_28 {dimension_numbers = #tpu.dot_dimension_numbers<[2], [1], [1], [2], [0, 0, 0, 1, 1, 2], [0], [0]>} : vector<2x16x16xbf16>, vector<2x16x8xbf16>, vector<2x16x8xf32> -> vector<2x16x8xf32>
    %cst_29 = arith.constant 0.000000e+00 : f32
    "tpu.trace_stop"() : () -> ()
    %88 = vector.shape_cast %9 : vector<2x16x1xi1> to vector<2x16x1xi1>
    %89 = vector.broadcast %88 : vector<2x16x1xi1> to vector<2x16x8xi1>
    %90 = vector.broadcast %cst_29 : f32 to vector<2x16x8xf32>
    %91 = arith.select %89, %87, %90 : vector<2x16x8xi1>, vector<2x16x8xf32>
    %92 = vector.shape_cast %91 : vector<2x16x8xf32> to vector<32x8xf32>
    %93 = arith.truncf %92 : vector<32x8xf32> to vector<32x8xbf16>
    %c0_30 = arith.constant 0 : index
    %c48 = arith.constant 48 : index
    %94 = vector.load %arg8[%c0_30, %c48] : memref<32x96xbf16, #tpu.memory_space<vmem>>, vector<32x8xbf16>
    tpu.vector_store %arg8[%c0_30, %c48], %93 {strides = array<i32>} : memref<32x96xbf16, #tpu.memory_space<vmem>>, vector<32x8xbf16>,
    %95 = vector.extract_strided_slice %13 {offsets = [0, 0, 24], sizes = [2, 16, 8], strides = [1, 1, 1]} : vector<2x16x96xf32> to vector<2x16x8xf32>
    %96 = arith.truncf %95 : vector<2x16x8xf32> to vector<2x16x8xbf16>
    %97 = vector.extract_strided_slice %13 {offsets = [0, 0, 56], sizes = [2, 16, 8], strides = [1, 1, 1]} : vector<2x16x96xf32> to vector<2x16x8xf32>
    %98 = arith.truncf %97 : vector<2x16x8xf32> to vector<2x16x8xbf16>
    %99 = vector.extract_strided_slice %13 {offsets = [0, 0, 88], sizes = [2, 16, 8], strides = [1, 1, 1]} : vector<2x16x96xf32> to vector<2x16x8xf32>
    %100 = arith.truncf %99 : vector<2x16x8xf32> to vector<2x16x8xbf16>
    "tpu.trace_start"() <{level = 10 : i32, message = "bnd,bmd->bnm"}> : () -> ()
    %cst_31 = arith.constant dense<0.000000e+00> : vector<2x16x16xf32>
    %101 = tpu.matmul %96, %98, %cst_31 {dimension_numbers = #tpu.dot_dimension_numbers<[2], [2], [1], [1], [0, 0, 0, 1, 1, 1], [0], [0]>} : vector<2x16x8xbf16>, vector<2x16x8xbf16>, vector<2x16x16xf32> -> vector<2x16x16xf32>
    "tpu.trace_stop"() : () -> ()
    %102 = arith.addf %101, %5 : vector<2x16x16xf32>
    %cst_32 = arith.constant dense<0xFF800000> : vector<2x16xf32>
    %103 = vector.multi_reduction <maximumf>, %102, %cst_32 [2] : vector<2x16x16xf32> to vector<2x16xf32>
    %104 = vector.shape_cast %103 : vector<2x16xf32> to vector<2x16x1xf32>
    %105 = vector.broadcast %104 : vector<2x16x1xf32> to vector<2x16x16xf32>
    %106 = arith.subf %102, %105 : vector<2x16x16xf32>
    %107 = math.exp %106 : vector<2x16x16xf32>
    %cst_33 = arith.constant dense<0.000000e+00> : vector<2x16xf32>
    %108 = vector.multi_reduction <add>, %107, %cst_33 [2] : vector<2x16x16xf32> to vector<2x16xf32>
    %109 = vector.shape_cast %108 : vector<2x16xf32> to vector<2x16x1xf32>
    %110 = tpu.reciprocal %109 {approx = true} : vector<2x16x1xf32> -> vector<2x16x1xf32>
    %111 = vector.broadcast %110 : vector<2x16x1xf32> to vector<2x16x16xf32>
    %112 = arith.mulf %107, %111 : vector<2x16x16xf32>
    %113 = arith.truncf %112 : vector<2x16x16xf32> to vector<2x16x16xbf16>
    "tpu.trace_start"() <{level = 10 : i32, message = "bnm,bmd->bnd"}> : () -> ()
    %cst_34 = arith.constant dense<0.000000e+00> : vector<2x16x8xf32>
    %114 = tpu.matmul %113, %100, %cst_34 {dimension_numbers = #tpu.dot_dimension_numbers<[2], [1], [1], [2], [0, 0, 0, 1, 1, 2], [0], [0]>} : vector<2x16x16xbf16>, vector<2x16x8xbf16>, vector<2x16x8xf32> -> vector<2x16x8xf32>
    %cst_35 = arith.constant 0.000000e+00 : f32
    "tpu.trace_stop"() : () -> ()
    %115 = vector.shape_cast %9 : vector<2x16x1xi1> to vector<2x16x1xi1>
    %116 = vector.broadcast %115 : vector<2x16x1xi1> to vector<2x16x8xi1>
    %117 = vector.broadcast %cst_35 : f32 to vector<2x16x8xf32>
    %118 = arith.select %116, %114, %117 : vector<2x16x8xi1>, vector<2x16x8xf32>
    %119 = vector.shape_cast %118 : vector<2x16x8xf32> to vector<32x8xf32>
    %120 = arith.truncf %119 : vector<32x8xf32> to vector<32x8xbf16>
    %c0_36 = arith.constant 0 : index
    %c56 = arith.constant 56 : index
    %121 = vector.load %arg8[%c0_36, %c56] : memref<32x96xbf16, #tpu.memory_space<vmem>>, vector<32x8xbf16>
    tpu.vector_store %arg8[%c0_36, %c56], %120 {strides = array<i32>} : memref<32x96xbf16, #tpu.memory_space<vmem>>, vector<32x8xbf16>,
    %c0_37 = arith.constant 0 : index
    %c0_38 = arith.constant 0 : index
    %122 = vector.load %arg8[%c0_37, %c0_38] : memref<32x96xbf16, #tpu.memory_space<vmem>>, vector<32x64xbf16>
    %c0_39 = arith.constant 0 : index
    %c0_40 = arith.constant 0 : index
    %123 = vector.load %arg4[%c0_39, %c0_40] : memref<64x96xbf16, #tpu.memory_space<vmem>>, vector<64x96xbf16>
    %cst_41 = arith.constant dense<0.000000e+00> : vector<32x96xf32>
    %124 = tpu.matmul %122, %123, %cst_41 {dimension_numbers = #tpu.dot_dimension_numbers<[1], [0], [0], [1], [0, 0, 1, 1], [], []>} : vector<32x64xbf16>, vector<64x96xbf16>, vector<32x96xf32> -> vector<32x96xf32>
    %125 = vector.shape_cast %124 : vector<32x96xf32> to vector<2x16x96xf32>
    %126 = vector.extract_strided_slice %125 {offsets = [0, 0, 0], sizes = [2, 16, 8], strides = [1, 1, 1]} : vector<2x16x96xf32> to vector<2x16x8xf32>
    %127 = arith.truncf %126 : vector<2x16x8xf32> to vector<2x16x8xbf16>
    %128 = vector.extract_strided_slice %125 {offsets = [0, 0, 32], sizes = [2, 16, 8], strides = [1, 1, 1]} : vector<2x16x96xf32> to vector<2x16x8xf32>
    %129 = arith.truncf %128 : vector<2x16x8xf32> to vector<2x16x8xbf16>
    %130 = vector.extract_strided_slice %125 {offsets = [0, 0, 64], sizes = [2, 16, 8], strides = [1, 1, 1]} : vector<2x16x96xf32> to vector<2x16x8xf32>
    %131 = arith.truncf %130 : vector<2x16x8xf32> to vector<2x16x8xbf16>
    "tpu.trace_start"() <{level = 10 : i32, message = "bnd,bmd->bnm"}> : () -> ()
    %cst_42 = arith.constant dense<0.000000e+00> : vector<2x16x16xf32>
    %132 = tpu.matmul %127, %129, %cst_42 {dimension_numbers = #tpu.dot_dimension_numbers<[2], [2], [1], [1], [0, 0, 0, 1, 1, 1], [0], [0]>} : vector<2x16x8xbf16>, vector<2x16x8xbf16>, vector<2x16x16xf32> -> vector<2x16x16xf32>
    "tpu.trace_stop"() : () -> ()
    %133 = arith.addf %132, %5 : vector<2x16x16xf32>
    %cst_43 = arith.constant dense<0xFF800000> : vector<2x16xf32>
    %134 = vector.multi_reduction <maximumf>, %133, %cst_43 [2] : vector<2x16x16xf32> to vector<2x16xf32>
    %135 = vector.shape_cast %134 : vector<2x16xf32> to vector<2x16x1xf32>
    %136 = vector.broadcast %135 : vector<2x16x1xf32> to vector<2x16x16xf32>
    %137 = arith.subf %133, %136 : vector<2x16x16xf32>
    %138 = math.exp %137 : vector<2x16x16xf32>
    %cst_44 = arith.constant dense<0.000000e+00> : vector<2x16xf32>
    %139 = vector.multi_reduction <add>, %138, %cst_44 [2] : vector<2x16x16xf32> to vector<2x16xf32>
    %140 = vector.shape_cast %139 : vector<2x16xf32> to vector<2x16x1xf32>
    %141 = tpu.reciprocal %140 {approx = true} : vector<2x16x1xf32> -> vector<2x16x1xf32>
    %142 = vector.broadcast %141 : vector<2x16x1xf32> to vector<2x16x16xf32>
    %143 = arith.mulf %138, %142 : vector<2x16x16xf32>
    %144 = arith.truncf %143 : vector<2x16x16xf32> to vector<2x16x16xbf16>
    "tpu.trace_start"() <{level = 10 : i32, message = "bnm,bmd->bnd"}> : () -> ()
    %cst_45 = arith.constant dense<0.000000e+00> : vector<2x16x8xf32>
    %145 = tpu.matmul %144, %131, %cst_45 {dimension_numbers = #tpu.dot_dimension_numbers<[2], [1], [1], [2], [0, 0, 0, 1, 1, 2], [0], [0]>} : vector<2x16x16xbf16>, vector<2x16x8xbf16>, vector<2x16x8xf32> -> vector<2x16x8xf32>
    %cst_46 = arith.constant 0.000000e+00 : f32
    "tpu.trace_stop"() : () -> ()
    %146 = vector.shape_cast %9 : vector<2x16x1xi1> to vector<2x16x1xi1>
    %147 = vector.broadcast %146 : vector<2x16x1xi1> to vector<2x16x8xi1>
    %148 = vector.broadcast %cst_46 : f32 to vector<2x16x8xf32>
    %149 = arith.select %147, %145, %148 : vector<2x16x8xi1>, vector<2x16x8xf32>
    %150 = vector.shape_cast %149 : vector<2x16x8xf32> to vector<32x8xf32>
    %151 = arith.truncf %150 : vector<32x8xf32> to vector<32x8xbf16>
    %c0_47 = arith.constant 0 : index
    %c64 = arith.constant 64 : index
    %152 = vector.load %arg8[%c0_47, %c64] : memref<32x96xbf16, #tpu.memory_space<vmem>>, vector<32x8xbf16>
    tpu.vector_store %arg8[%c0_47, %c64], %151 {strides = array<i32>} : memref<32x96xbf16, #tpu.memory_space<vmem>>, vector<32x8xbf16>,
    %153 = vector.extract_strided_slice %125 {offsets = [0, 0, 8], sizes = [2, 16, 8], strides = [1, 1, 1]} : vector<2x16x96xf32> to vector<2x16x8xf32>
    %154 = arith.truncf %153 : vector<2x16x8xf32> to vector<2x16x8xbf16>
    %155 = vector.extract_strided_slice %125 {offsets = [0, 0, 40], sizes = [2, 16, 8], strides = [1, 1, 1]} : vector<2x16x96xf32> to vector<2x16x8xf32>
    %156 = arith.truncf %155 : vector<2x16x8xf32> to vector<2x16x8xbf16>
    %157 = vector.extract_strided_slice %125 {offsets = [0, 0, 72], sizes = [2, 16, 8], strides = [1, 1, 1]} : vector<2x16x96xf32> to vector<2x16x8xf32>
    %158 = arith.truncf %157 : vector<2x16x8xf32> to vector<2x16x8xbf16>
    "tpu.trace_start"() <{level = 10 : i32, message = "bnd,bmd->bnm"}> : () -> ()
    %cst_48 = arith.constant dense<0.000000e+00> : vector<2x16x16xf32>
    %159 = tpu.matmul %154, %156, %cst_48 {dimension_numbers = #tpu.dot_dimension_numbers<[2], [2], [1], [1], [0, 0, 0, 1, 1, 1], [0], [0]>} : vector<2x16x8xbf16>, vector<2x16x8xbf16>, vector<2x16x16xf32> -> vector<2x16x16xf32>
    "tpu.trace_stop"() : () -> ()
    %160 = arith.addf %159, %5 : vector<2x16x16xf32>
    %cst_49 = arith.constant dense<0xFF800000> : vector<2x16xf32>
    %161 = vector.multi_reduction <maximumf>, %160, %cst_49 [2] : vector<2x16x16xf32> to vector<2x16xf32>
    %162 = vector.shape_cast %161 : vector<2x16xf32> to vector<2x16x1xf32>
    %163 = vector.broadcast %162 : vector<2x16x1xf32> to vector<2x16x16xf32>
    %164 = arith.subf %160, %163 : vector<2x16x16xf32>
    %165 = math.exp %164 : vector<2x16x16xf32>
    %cst_50 = arith.constant dense<0.000000e+00> : vector<2x16xf32>
    %166 = vector.multi_reduction <add>, %165, %cst_50 [2] : vector<2x16x16xf32> to vector<2x16xf32>
    %167 = vector.shape_cast %166 : vector<2x16xf32> to vector<2x16x1xf32>
    %168 = tpu.reciprocal %167 {approx = true} : vector<2x16x1xf32> -> vector<2x16x1xf32>
    %169 = vector.broadcast %168 : vector<2x16x1xf32> to vector<2x16x16xf32>
    %170 = arith.mulf %165, %169 : vector<2x16x16xf32>
    %171 = arith.truncf %170 : vector<2x16x16xf32> to vector<2x16x16xbf16>
    "tpu.trace_start"() <{level = 10 : i32, message = "bnm,bmd->bnd"}> : () -> ()
    %cst_51 = arith.constant dense<0.000000e+00> : vector<2x16x8xf32>
    %172 = tpu.matmul %171, %158, %cst_51 {dimension_numbers = #tpu.dot_dimension_numbers<[2], [1], [1], [2], [0, 0, 0, 1, 1, 2], [0], [0]>} : vector<2x16x16xbf16>, vector<2x16x8xbf16>, vector<2x16x8xf32> -> vector<2x16x8xf32>
    %cst_52 = arith.constant 0.000000e+00 : f32
    "tpu.trace_stop"() : () -> ()
    %173 = vector.shape_cast %9 : vector<2x16x1xi1> to vector<2x16x1xi1>
    %174 = vector.broadcast %173 : vector<2x16x1xi1> to vector<2x16x8xi1>
    %175 = vector.broadcast %cst_52 : f32 to vector<2x16x8xf32>
    %176 = arith.select %174, %172, %175 : vector<2x16x8xi1>, vector<2x16x8xf32>
    %177 = vector.shape_cast %176 : vector<2x16x8xf32> to vector<32x8xf32>
    %178 = arith.truncf %177 : vector<32x8xf32> to vector<32x8xbf16>
    %c0_53 = arith.constant 0 : index
    %c72 = arith.constant 72 : index
    %179 = vector.load %arg8[%c0_53, %c72] : memref<32x96xbf16, #tpu.memory_space<vmem>>, vector<32x8xbf16>
    tpu.vector_store %arg8[%c0_53, %c72], %178 {strides = array<i32>} : memref<32x96xbf16, #tpu.memory_space<vmem>>, vector<32x8xbf16>,
    %180 = vector.extract_strided_slice %125 {offsets = [0, 0, 16], sizes = [2, 16, 8], strides = [1, 1, 1]} : vector<2x16x96xf32> to vector<2x16x8xf32>
    %181 = arith.truncf %180 : vector<2x16x8xf32> to vector<2x16x8xbf16>
    %182 = vector.extract_strided_slice %125 {offsets = [0, 0, 48], sizes = [2, 16, 8], strides = [1, 1, 1]} : vector<2x16x96xf32> to vector<2x16x8xf32>
    %183 = arith.truncf %182 : vector<2x16x8xf32> to vector<2x16x8xbf16>
    %184 = vector.extract_strided_slice %125 {offsets = [0, 0, 80], sizes = [2, 16, 8], strides = [1, 1, 1]} : vector<2x16x96xf32> to vector<2x16x8xf32>
    %185 = arith.truncf %184 : vector<2x16x8xf32> to vector<2x16x8xbf16>
    "tpu.trace_start"() <{level = 10 : i32, message = "bnd,bmd->bnm"}> : () -> ()
    %cst_54 = arith.constant dense<0.000000e+00> : vector<2x16x16xf32>
    %186 = tpu.matmul %181, %183, %cst_54 {dimension_numbers = #tpu.dot_dimension_numbers<[2], [2], [1], [1], [0, 0, 0, 1, 1, 1], [0], [0]>} : vector<2x16x8xbf16>, vector<2x16x8xbf16>, vector<2x16x16xf32> -> vector<2x16x16xf32>
    "tpu.trace_stop"() : () -> ()
    %187 = arith.addf %186, %5 : vector<2x16x16xf32>
    %cst_55 = arith.constant dense<0xFF800000> : vector<2x16xf32>
    %188 = vector.multi_reduction <maximumf>, %187, %cst_55 [2] : vector<2x16x16xf32> to vector<2x16xf32>
    %189 = vector.shape_cast %188 : vector<2x16xf32> to vector<2x16x1xf32>
    %190 = vector.broadcast %189 : vector<2x16x1xf32> to vector<2x16x16xf32>
    %191 = arith.subf %187, %190 : vector<2x16x16xf32>
    %192 = math.exp %191 : vector<2x16x16xf32>
    %cst_56 = arith.constant dense<0.000000e+00> : vector<2x16xf32>
    %193 = vector.multi_reduction <add>, %192, %cst_56 [2] : vector<2x16x16xf32> to vector<2x16xf32>
    %194 = vector.shape_cast %193 : vector<2x16xf32> to vector<2x16x1xf32>
    %195 = tpu.reciprocal %194 {approx = true} : vector<2x16x1xf32> -> vector<2x16x1xf32>
    %196 = vector.broadcast %195 : vector<2x16x1xf32> to vector<2x16x16xf32>
    %197 = arith.mulf %192, %196 : vector<2x16x16xf32>
    %198 = arith.truncf %197 : vector<2x16x16xf32> to vector<2x16x16xbf16>
    "tpu.trace_start"() <{level = 10 : i32, message = "bnm,bmd->bnd"}> : () -> ()
    %cst_57 = arith.constant dense<0.000000e+00> : vector<2x16x8xf32>
    %199 = tpu.matmul %198, %185, %cst_57 {dimension_numbers = #tpu.dot_dimension_numbers<[2], [1], [1], [2], [0, 0, 0, 1, 1, 2], [0], [0]>} : vector<2x16x16xbf16>, vector<2x16x8xbf16>, vector<2x16x8xf32> -> vector<2x16x8xf32>
    %cst_58 = arith.constant 0.000000e+00 : f32
    "tpu.trace_stop"() : () -> ()
    %200 = vector.shape_cast %9 : vector<2x16x1xi1> to vector<2x16x1xi1>
    %201 = vector.broadcast %200 : vector<2x16x1xi1> to vector<2x16x8xi1>
    %202 = vector.broadcast %cst_58 : f32 to vector<2x16x8xf32>
    %203 = arith.select %201, %199, %202 : vector<2x16x8xi1>, vector<2x16x8xf32>
    %204 = vector.shape_cast %203 : vector<2x16x8xf32> to vector<32x8xf32>
    %205 = arith.truncf %204 : vector<32x8xf32> to vector<32x8xbf16>
    %c0_59 = arith.constant 0 : index
    %c80 = arith.constant 80 : index
    %206 = vector.load %arg8[%c0_59, %c80] : memref<32x96xbf16, #tpu.memory_space<vmem>>, vector<32x8xbf16>
    tpu.vector_store %arg8[%c0_59, %c80], %205 {strides = array<i32>} : memref<32x96xbf16, #tpu.memory_space<vmem>>, vector<32x8xbf16>,
    %207 = vector.extract_strided_slice %125 {offsets = [0, 0, 24], sizes = [2, 16, 8], strides = [1, 1, 1]} : vector<2x16x96xf32> to vector<2x16x8xf32>
    %208 = arith.truncf %207 : vector<2x16x8xf32> to vector<2x16x8xbf16>
    %209 = vector.extract_strided_slice %125 {offsets = [0, 0, 56], sizes = [2, 16, 8], strides = [1, 1, 1]} : vector<2x16x96xf32> to vector<2x16x8xf32>
    %210 = arith.truncf %209 : vector<2x16x8xf32> to vector<2x16x8xbf16>
    %211 = vector.extract_strided_slice %125 {offsets = [0, 0, 88], sizes = [2, 16, 8], strides = [1, 1, 1]} : vector<2x16x96xf32> to vector<2x16x8xf32>
    %212 = arith.truncf %211 : vector<2x16x8xf32> to vector<2x16x8xbf16>
    "tpu.trace_start"() <{level = 10 : i32, message = "bnd,bmd->bnm"}> : () -> ()
    %cst_60 = arith.constant dense<0.000000e+00> : vector<2x16x16xf32>
    %213 = tpu.matmul %208, %210, %cst_60 {dimension_numbers = #tpu.dot_dimension_numbers<[2], [2], [1], [1], [0, 0, 0, 1, 1, 1], [0], [0]>} : vector<2x16x8xbf16>, vector<2x16x8xbf16>, vector<2x16x16xf32> -> vector<2x16x16xf32>
    "tpu.trace_stop"() : () -> ()
    %214 = arith.addf %213, %5 : vector<2x16x16xf32>
    %cst_61 = arith.constant dense<0xFF800000> : vector<2x16xf32>
    %215 = vector.multi_reduction <maximumf>, %214, %cst_61 [2] : vector<2x16x16xf32> to vector<2x16xf32>
    %216 = vector.shape_cast %215 : vector<2x16xf32> to vector<2x16x1xf32>
    %217 = vector.broadcast %216 : vector<2x16x1xf32> to vector<2x16x16xf32>
    %218 = arith.subf %214, %217 : vector<2x16x16xf32>
    %219 = math.exp %218 : vector<2x16x16xf32>
    %cst_62 = arith.constant dense<0.000000e+00> : vector<2x16xf32>
    %220 = vector.multi_reduction <add>, %219, %cst_62 [2] : vector<2x16x16xf32> to vector<2x16xf32>
    %221 = vector.shape_cast %220 : vector<2x16xf32> to vector<2x16x1xf32>
    %222 = tpu.reciprocal %221 {approx = true} : vector<2x16x1xf32> -> vector<2x16x1xf32>
    %223 = vector.broadcast %222 : vector<2x16x1xf32> to vector<2x16x16xf32>
    %224 = arith.mulf %219, %223 : vector<2x16x16xf32>
    %225 = arith.truncf %224 : vector<2x16x16xf32> to vector<2x16x16xbf16>
    "tpu.trace_start"() <{level = 10 : i32, message = "bnm,bmd->bnd"}> : () -> ()
    %cst_63 = arith.constant dense<0.000000e+00> : vector<2x16x8xf32>
    %226 = tpu.matmul %225, %212, %cst_63 {dimension_numbers = #tpu.dot_dimension_numbers<[2], [1], [1], [2], [0, 0, 0, 1, 1, 2], [0], [0]>} : vector<2x16x16xbf16>, vector<2x16x8xbf16>, vector<2x16x8xf32> -> vector<2x16x8xf32>
    %cst_64 = arith.constant 0.000000e+00 : f32
    "tpu.trace_stop"() : () -> ()
    %227 = vector.shape_cast %9 : vector<2x16x1xi1> to vector<2x16x1xi1>
    %228 = vector.broadcast %227 : vector<2x16x1xi1> to vector<2x16x8xi1>
    %229 = vector.broadcast %cst_64 : f32 to vector<2x16x8xf32>
    %230 = arith.select %228, %226, %229 : vector<2x16x8xi1>, vector<2x16x8xf32>
    %231 = vector.shape_cast %230 : vector<2x16x8xf32> to vector<32x8xf32>
    %232 = arith.truncf %231 : vector<32x8xf32> to vector<32x8xbf16>
    %c0_65 = arith.constant 0 : index
    %c88 = arith.constant 88 : index
    %233 = vector.load %arg8[%c0_65, %c88] : memref<32x96xbf16, #tpu.memory_space<vmem>>, vector<32x8xbf16>
    tpu.vector_store %arg8[%c0_65, %c88], %232 {strides = array<i32>} : memref<32x96xbf16, #tpu.memory_space<vmem>>, vector<32x8xbf16>,
    %c0_66 = arith.constant 0 : index
    %c0_67 = arith.constant 0 : index
    %234 = vector.load %arg8[%c0_66, %c0_67] : memref<32x96xbf16, #tpu.memory_space<vmem>>, vector<32x96xbf16>
    %c0_68 = arith.constant 0 : index
    %c0_69 = arith.constant 0 : index
    %235 = vector.load %arg5[%c0_68, %c0_69] : memref<96x128xbf16, #tpu.memory_space<vmem>>, vector<96x128xbf16>
    %cst_70 = arith.constant dense<0.000000e+00> : vector<32x128xf32>
    %236 = tpu.matmul %234, %235, %cst_70 {dimension_numbers = #tpu.dot_dimension_numbers<[1], [0], [0], [1], [0, 0, 1, 1], [], []>} : vector<32x96xbf16>, vector<96x128xbf16>, vector<32x128xf32> -> vector<32x128xf32>
    %c0_71 = arith.constant 0 : index
    %c0_72 = arith.constant 0 : index
    %237 = vector.load %arg6[%c0_71, %c0_72] : memref<1x128xbf16, #tpu.memory_space<vmem>>, vector<1x128xbf16>
    %238 = arith.extf %237 : vector<1x128xbf16> to vector<1x128xf32>
    %239 = vector.broadcast %238 : vector<1x128xf32> to vector<32x128xf32>
    %240 = arith.addf %236, %239 : vector<32x128xf32>
    %cst_73 = arith.constant 0.000000e+00 : f32
    %241 = vector.broadcast %cst_73 : f32 to vector<32x128xf32>
    %242 = arith.maximumf %240, %241 : vector<32x128xf32>
    %243 = vector.shape_cast %242 : vector<32x128xf32> to vector<2x16x128xf32>
    %c0_74 = arith.constant 0 : index
    %c0_75 = arith.constant 0 : index
    %c0_76 = arith.constant 0 : index
    %244 = vector.load %arg7[%c0_74, %c0_75, %c0_76] : memref<2x16x128xf32, #tpu.memory_space<vmem>>, vector<2x16x128xf32>
    tpu.vector_store %arg7[%c0_74, %c0_75, %c0_76], %243 {strides = array<i32>} : memref<2x16x128xf32, #tpu.memory_space<vmem>>, vector<2x16x128xf32>,
    return
  }
  func.func @transform_0(%arg0: i32) -> (i32, i32, i32) {
    %c0_i32 = arith.constant 0 : i32
    %c0_i32_0 = arith.constant 0 : i32
    %c0_i32_1 = arith.constant 0 : i32
    return %arg0, %c0_i32, %c0_i32_0 : i32, i32, i32
  }
  func.func @transform_1(%arg0: i32) -> (i32, i32, i32) {
    %c0_i32 = arith.constant 0 : i32
    %c0_i32_0 = arith.constant 0 : i32
    %c0_i32_1 = arith.constant 0 : i32
    return %arg0, %c0_i32, %c0_i32_0 : i32, i32, i32
  }
  func.func @transform_2(%arg0: i32) -> (i32, i32) {
    %c0_i32 = arith.constant 0 : i32
    %c0_i32_0 = arith.constant 0 : i32
    %c0_i32_1 = arith.constant 0 : i32
    return %c0_i32, %c0_i32_0 : i32, i32
  }
  func.func @transform_3(%arg0: i32) -> (i32, i32) {
    %c0_i32 = arith.constant 0 : i32
    %c0_i32_0 = arith.constant 0 : i32
    %c0_i32_1 = arith.constant 0 : i32
    return %c0_i32, %c0_i32_0 : i32, i32
  }
  func.func @transform_4(%arg0: i32) -> (i32, i32) {
    %c0_i32 = arith.constant 0 : i32
    %c0_i32_0 = arith.constant 0 : i32
    %c0_i32_1 = arith.constant 0 : i32
    return %c0_i32, %c0_i32_0 : i32, i32
  }
  func.func @transform_5(%arg0: i32) -> (i32, i32) {
    %c0_i32 = arith.constant 0 : i32
    %c0_i32_0 = arith.constant 0 : i32
    %c0_i32_1 = arith.constant 0 : i32
    return %c0_i32, %c0_i32_0 : i32, i32
  }
  func.func @transform_6(%arg0: i32) -> (i32, i32, i32) {
    %c0_i32 = arith.constant 0 : i32
    %c0_i32_0 = arith.constant 0 : i32
    %c0_i32_1 = arith.constant 0 : i32
    return %arg0, %c0_i32, %c0_i32_0 : i32, i32, i32
  }
}

</mosaic_0001>

<bundles_post_ra>
// kernel: tpu_custom_call.1
= control target key start
LH: loop header
LB: loop body
LE: loop exit
PB: predicated region body
PF: predicated region fallthrough
CT: control target
= control target key end

     0   :  { %11 = vsyncpa [#allocation4], 0  ;;  %s4088_s0 = inlined_call_operand.hbm [shape: f32[2,16,32], index: 0, kind: input, shape index: {}]   ;;  %s4089_s1 = inlined_call_operand.hbm [shape: bf16[2,16,16], index: 1, kind: input, shape index: {}]   ;;  %s4090_s2 = inlined_call_operand.hbm [shape: bf16[32,96], index: 2, kind: input, shape index: {}]   ;;  %s4091_s3 = inlined_call_operand.hbm [shape: bf16[64,96], index: 3, kind: input, shape index: {}]   ;;  %s4092_s4 = inlined_call_operand.hbm [shape: bf16[96,128], index: 4, kind: input, shape index: {}]   ;;  %s4093_s5 = inlined_call_operand.vmem [shape: bf16[1,128], index: 5, kind: input, shape index: {}]   ;;  %s4094_s6 = inlined_call_operand.hbm [shape: f32[2,16,128], index: 6, kind: output, shape index: {}]  }
   0x1   :  { %12 = vsyncpa [#allocation7], 0 }
   0x2   :  { %13 = vsyncpa [#allocation10], 0 }
   0x3   :  { %14 = vsyncpa [#allocation5], 0  ;;  %s3435_s21 = smov [#allocation6]  }
   0x4   :  { %s32_s22 = sshll.u32 %s3435_s21, 4  ;;  %s33_s22 = int_to_ptr.vmem [resolvable:$true] %s32_s22 }
   0x5   :  { %s3315_s23 = scalar_lea.vmem %s33_s22, 256  ;;  %p3320_p1 = scmp.lt.s32.totalorder %s33_s22, %s33_s22 }
   0x6   :  { %p3316_p0 = scmp.ne.s32.totalorder %s33_s22, %s3315_s23  ;;  %p3321_p2 = scmp.lt.s32.totalorder %s3315_s23, %s3315_s23 }
   0x8   :  { %p3322_p3 = por %p3321_p2, %p3320_p1 }
   0xa   :  { %p3323_p4 = pnand %p3322_p3, %p3316_p0 }
   0xc   :  { %3326 = shalt.err (!%p3323_p4)
}
   0xd   :  { %s3436_s24 = smov 64   ;;  %s3437_s25 = smov 4  }
   0xe   :  { %38 = dma.hbm_to_vmem [thread:$0]  %s4089_s1, 256, %s33_s22, [#allocation7], %s3436_s24, %s3436_s24, %s3437_s25  }
   0xf   :  { %s3438_s28 = smov [#allocation9]   ;;  %s3439_s30 = smov [#allocation3]  }
  0x10   :  { %s56_s29 = sshll.u32 %s3438_s28, 4  ;;  %s20_s7 = sshll.u32 %s3439_s30, 4  ;;  %s57_s29 = int_to_ptr.vmem [resolvable:$true] %s56_s29  ;;  %s21_s7 = int_to_ptr.vmem [resolvable:$true] %s20_s7 }
  0x11   :  { %s3335_s8 = scalar_lea.vmem %s57_s29, 512  ;;  %p3340_p6 = scmp.lt.s32.totalorder %s57_s29, %s57_s29 }
  0x12   :  { %p3336_p5 = scmp.ne.s32.totalorder %s57_s29, %s3335_s8  ;;  %p3341_p7 = scmp.lt.s32.totalorder %s3335_s8, %s3335_s8 }
  0x14   :  { %p3342_p8 = por %p3341_p7, %p3340_p6 }
  0x16   :  { %p3343_p9 = pnand %p3342_p8, %p3336_p5 }
  0x18   :  { %3346 = shalt.err (!%p3343_p9)
}
  0x19   :  { %62 = dma.hbm_to_vmem [thread:$0]  %s4091_s3, 512, %s57_s29, [#allocation10], %s3436_s24, %s3436_s24, %s3437_s25  }
  0x1a   :  { %s3355_s1 = scalar_lea.vmem %s21_s7, 512  ;;  %p3360_p11 = scmp.lt.s32.totalorder %s21_s7, %s21_s7 }
  0x1b   :  { %p3356_p10 = scmp.ne.s32.totalorder %s21_s7, %s3355_s1  ;;  %p3361_p12 = scmp.lt.s32.totalorder %s3355_s1, %s3355_s1 }
  0x1d   :  { %p3362_p13 = por %p3361_p12, %p3360_p11 }
  0x1f   :  { %p3363_p0 = pnand %p3362_p13, %p3356_p10 }
  0x21   :  { %3366 = shalt.err (!%p3363_p0)
}
  0x22   :  { %s3440_s11 = smov 128   ;;  %s3441_s12 = smov 8  }
  0x23   :  { %26 = dma.hbm_to_vmem [thread:$0]  %s4088_s0, 512, %s21_s7, [#allocation4], %s3440_s11, %s3440_s11, %s3441_s12  }
  0x24   :  { %s3442_s15 = smov [#allocation8]   ;;  %s3443_s3 = smov [#allocation11]  }
  0x25   :  { %s44_s16 = sshll.u32 %s3442_s15, 4  ;;  %s68_s17 = sshll.u32 %s3443_s3, 4  ;;  %s45_s16 = int_to_ptr.vmem [resolvable:$true] %s44_s16  ;;  %s69_s17 = int_to_ptr.vmem [resolvable:$true] %s68_s17 }
  0x26   :  { %s3375_s18 = scalar_lea.vmem %s45_s16, 256  ;;  %p3380_p2 = scmp.lt.s32.totalorder %s45_s16, %s45_s16 }
  0x27   :  { %p3376_p1 = scmp.ne.s32.totalorder %s45_s16, %s3375_s18  ;;  %p3381_p3 = scmp.lt.s32.totalorder %s3375_s18, %s3375_s18 }
  0x29   :  { %p3382_p4 = por %p3381_p3, %p3380_p2 }
  0x2b   :  { %p3383_p5 = pnand %p3382_p4, %p3376_p1 }
  0x2d   :  { %3386 = shalt.err (!%p3383_p5)
}
  0x2e   :  { %50 = dma.hbm_to_vmem [thread:$0]  %s4090_s2, 256, %s45_s16, [#allocation7], %s3436_s24, %s3436_s24, %s3437_s25  }
  0x2f   :  { %s3395_s0 = scalar_lea.vmem %s69_s17, 768  ;;  %p3400_p7 = scmp.lt.s32.totalorder %s69_s17, %s69_s17 }
  0x30   :  { %p3396_p6 = scmp.ne.s32.totalorder %s69_s17, %s3395_s0  ;;  %p3401_p8 = scmp.lt.s32.totalorder %s3395_s0, %s3395_s0 }
  0x32   :  { %p3402_p9 = por %p3401_p8, %p3400_p7 }
  0x34   :  { %p3403_p10 = pnand %p3402_p9, %p3396_p6 }
  0x36   :  { %3406 = shalt.err (!%p3403_p10)
}
  0x37   :  { %74 = dma.hbm_to_vmem [thread:$0]  %s4092_s4, 768, %s69_s17, [#allocation10], %s3436_s24, %s3436_s24, %s3437_s25  }
  0x38   :  { %3427 = dma.done.wait [#allocation4], 512  }
  0x39   :  { %3428 = vsyncadd [#allocation4], 4294966784 }
  0x3a   :  { %3429 = dma.done.wait [#allocation7], 512  }
  0x3b   :  { %3430 = vsyncadd [#allocation7], 4294966784 }
  0x3c   :  { %3431 = dma.done.wait [#allocation10], 1280  }
  0x3d   :  { %3432 = vsyncadd [#allocation10], 4294966016  ;;  %v3161_v0 = vld [vmem:[#allocation8 + $0x8] sm:$0xff]   ;;  %v3162_v1 = vld [vmem:[#allocation8] sm:$0xff]   ;;  %vm113_vm0 = vcmask 257024   ;;  %vm173_vm1 = vcmask 261120  }
  0x3e   :  { %2910 = vmatprep.subr.bf16.mxu0 %v3161_v0  ;;  %v93_v2 = vld [vmem:[#allocation3] sm:$0xff]  ;;  %v94_v3 = vld [vmem:[#allocation3 + $0x8] sm:$0xff]  ;;  %v95_v4 = vld [vmem:[#allocation3 + $0x10] sm:$0xff]  ;;  %v3444_v12 = vmov 0.0   ;;  %vm3445_vm2 = vmmov 0   ;;  %s3446_s2 = smov 96  }
  0x3f   :  { %2911 = vmatpush3.bf16.msra.mxu0 %v3161_v0  ;;  %v2783_v5 = vpack.c.bf16 %v93_v2, %v93_v2  ;;  %v2784_v6 = vpack.c.bf16 %v94_v3, %v94_v3  ;;  %v96_v7 = vld [vmem:[#allocation3 + $0x18] sm:$0xff]  ;;  %v2785_v8 = vpack.c.bf16 %v95_v4, %v95_v4  ;;  %2930 = vmatprep.subr.bf16.mxu1 %v3444_v12  ;;  %vm234_vm3 = vcmask 64512   ;;  %v2820_v23 = vld [vmem:[#allocation6] sm:$0xff]   ;;  %v2827_v29 = vld [vmem:[#allocation6 + $0x8] sm:$0xff]   ;;  %s3447_s4 = smov 88   ;;  %s3448_s23 = smov 120  }
  0x40   :  { %2912 = vmatprep.subr.bf16.mxu0 %v3162_v1  ;;  %v2786_v9 = vpack.c.bf16 %v96_v7, %v96_v7  ;;  %2932 = vmatprep.mubr.msk.bf16.mxu1 %vm3445_vm2, %v3444_v12  ;;  %v3549_v24 = vunpack.c.l.bf16 %v2820_v23  ;;  %vm126_vm4 = vcmask 130048   ;;  %v3552_v27 = vunpack.c.h.bf16 %v2820_v23  ;;  %s3449_s25 = smov 56   ;;  %s3450_s26 = smov 80  }
  0x41   :  { %114 = vst.msk [vmem:[#allocation2] sm:$0xf] %vm113_vm0, %v2783_v5  ;;  %115 = vst.msk [vmem:[#allocation2 + $0x4] sm:$0xf] %vm113_vm0, %v2784_v6  ;;  %v3556_v33 = vunpack.c.l.bf16 %v2827_v29  ;;  %v3560_v38 = vunpack.c.h.bf16 %v2827_v29  ;;  %s3451_s27 = smov 112   ;;  %s3452_s28 = smov 48  }
  0x42   :  { %116 = vst.msk [vmem:[#allocation2 + $0x8] sm:$0xf] %vm113_vm0, %v2785_v8  ;;  %117 = vst.msk [vmem:[#allocation2 + $0xc] sm:$0xf] %vm113_vm0, %v2786_v9  ;;  %s3453_s29 = smov 72   ;;  %s3454_s30 = smov 104  }
  0x43   :  { %2913 = vmatpush3.bf16.msra.mxu0 %v3162_v1  ;;  %s3455_s7 = smov 40   ;;  %s3456_s8 = smov 32   ;;  %vm508_vm9 = vcmask 322816   ;;  %vm783_vm10 = vcmask 388416   ;;  %vm1058_vm11 = vcmask 454016   ;;  %vm1333_vm12 = vcmask 519616  }
  0x44   :  { %2918 = vmatprep.subr.bf16.mxu0 %v3444_v12  ;;  %vm1384_vm13 = vcmask 523264   ;;  %vm1710_vm14 = vcmask 585216   ;;  %vm1985_vm15 = vcmask 650816   ;;  %vm2260_vm0 = vcmask 716416   ;;  %s3457_s10 = smov [#allocation12]  }
  0x45   :  { %s2677_s1 = sshll.u32 %s3457_s10, 4  ;;  %s2678_s1 = int_to_ptr.vmem [resolvable:$true] %s2677_s1 }
  0x46   :  { %p3412_p12 = scmp.lt.s32.totalorder %s2678_s1, %s2678_s1 }
  0x48   :  { %v3163_v10 = vld [vmem:[#allocation2] sm:$0xff]  }
  0x49   :  { %v3164_v11 = vld [vmem:[#allocation2 + $0x8] sm:$0xff]   ;;  %2914 = vmatprep.mubr.msk.bf16.mxu0 %vm173_vm1, %v3163_v10 }
  0x4a   :  { %2915 = vmatmul.mubr.msk.bf16.vlgmr.msra.gmra.mxu0 %vm173_vm1, %v3164_v11  ;;  %vm2535_vm1 = vcmask 782016  }
  0x4b   :  { %2920 = vmatprep.mubr.msk.bf16.mxu0 %vm3445_vm2, %v3444_v12 }
 0x10a   :  { %v2916_v13 = vpop.f32.mrf.mxu0 }
 0x10c   :  { %v214_v14 = vpop.f32.mrf.mxu0 }
 0x10e   :  { %v2917_v15 = vpop.f32.mrf.mxu0 }
 0x10f   :  { %v3533_v18 = vpack.c.bf16 %v2917_v15, %v2916_v13 }
 0x110   :  { %v217_v16 = vpop.f32.mrf.mxu0 }
 0x111   :  { %v3529_v17 = vpack.c.bf16 %v217_v16, %v214_v14 }
 0x113   :  { %232 = vrot.lane.b32.xlu0 %v3529_v17, %s3446_s2 }
 0x117   :  { %283 = vrot.lane.b32.xlu0 %v3533_v18, %s3446_s2 }
 0x185   :  { %v233_v19 = vpop.permute.xlu0 %232 }
 0x186   :  { %v239_v20 = vsel %vm234_vm3, %v233_v19, 0 }
 0x187   :  { %2919 = vmatpush3.bf16.xpose.msra.mxu0 %v239_v20 }
 0x188   :  { %2924 = vmatprep.subr.bf16.mxu0 %v3444_v12 }
 0x189   :  { %v284_v21 = vpop.permute.xlu0 %283 }
 0x18a   :  { %v289_v22 = vsel %vm234_vm3, %v284_v21, 0 }
 0x18e   :  { %2921 = vmatmul.mubr.msk.bf16.vlgmr.msra.gmra.mxu0 %vm234_vm3, %v3529_v17 }
 0x18f   :  { %2925 = vmatpush3.bf16.xpose.msra.mxu0 %v289_v22  ;;  %2926 = vmatprep.mubr.msk.bf16.mxu0 %vm3445_vm2, %v3444_v12 }
 0x190   :  { %2936 = vmatprep.subr.bf16.mxu0 %v3444_v12 }
 0x196   :  { %2927 = vmatmul.mubr.msk.bf16.vlgmr.msra.gmra.mxu0 %vm234_vm3, %v3533_v18 }
 0x197   :  { %2938 = vmatprep.mubr.msk.bf16.mxu0 %vm3445_vm2, %v3444_v12 }
 0x24e   :  { %v275_v25 = vpop.f32.mrf.mxu0 }
 0x24f   :  { %v276_v26 = vadd.f32 %v3549_v24, %v275_v25 }
 0x250   :  { %v2922_v28 = vpop.f32.mrf.mxu0 }
 0x251   :  { %v332_v30 = vsel %vm126_vm4, %v276_v26, -inf }
 0x252   :  { %333 = vmax.xlane.f32.xlu1 %v332_v30  ;;  %v278_v31 = vpop.f32.mrf.mxu0 }
 0x253   :  { %v279_v32 = vadd.f32 %v3552_v27, %v278_v31 }
 0x254   :  { %v2923_v34 = vpop.f32.mrf.mxu0 }
 0x255   :  { %v335_v35 = vsel %vm126_vm4, %v279_v32, -inf }
 0x256   :  { %336 = vmax.xlane.f32.xlu1 %v335_v35  ;;  %v325_v36 = vpop.f32.mrf.mxu0 }
 0x257   :  { %v326_v37 = vadd.f32 %v3556_v33, %v325_v36 }
 0x258   :  { %v2928_v39 = vpop.f32.mrf.mxu0 }
 0x259   :  { %v338_v40 = vsel %vm126_vm4, %v326_v37, -inf }
 0x25a   :  { %339 = vmax.xlane.f32.xlu0 %v338_v40  ;;  %v328_v41 = vpop.f32.mrf.mxu0 }
 0x25b   :  { %v329_v42 = vadd.f32 %v3560_v38, %v328_v41 }
 0x25c   :  { %v2929_v43 = vpop.f32.mrf.mxu0 }
 0x25d   :  { %v341_v44 = vsel %vm126_vm4, %v329_v42, -inf }
 0x25e   :  { %342 = vmax.xlane.f32.xlu1 %v341_v44 }
 0x26f   :  { %378 = vrot.lane.b32.xlu1 %v3529_v17, %s3436_s24 }
 0x270   :  { %425 = vrot.lane.b32.xlu0 %v3533_v18, %s3436_s24 }
 0x273   :  { %515 = vrot.lane.b32.xlu1 %v3529_v17, %s3447_s4 }
 0x277   :  { %566 = vrot.lane.b32.xlu1 %v3533_v18, %s3447_s4 }
 0x2db   :  { %v334_v45 = vpop.xlane.xlu1 %333 }
 0x2dc   :  { %v344_v46 = vsub.f32 %v276_v26, %v334_v45 }
 0x2de   :  { %v348_v47 = vmul.f32 1.442695, %v344_v46 }
 0x2df   :  { %v337_v48 = vpop.xlane.xlu1 %336 }
 0x2e0   :  { %3179 = vpow2.f32 %v348_v47  ;;  %v345_v49 = vsub.f32 %v279_v32, %v337_v48 }
 0x2e2   :  { %v350_v50 = vmul.f32 1.442695, %v345_v49 }
 0x2e3   :  { %v340_v51 = vpop.xlane.xlu0 %339 }
 0x2e4   :  { %3181 = vpow2.f32 %v350_v50  ;;  %v346_v52 = vsub.f32 %v326_v37, %v340_v51 }
 0x2e6   :  { %v352_v53 = vmul.f32 1.442695, %v346_v52 }
 0x2e7   :  { %v426_v54 = vpop.permute.xlu0 %425  ;;  %v343_v55 = vpop.xlane.xlu1 %342 }
 0x2e8   :  { %3183 = vpow2.f32 %v352_v53  ;;  %v347_v56 = vsub.f32 %v329_v42, %v343_v55  ;;  %2937 = vmatpush3.bf16.msra.mxu0 %v426_v54 }
 0x2e9   :  { %2948 = vmatprep.subr.bf16.mxu0 %v3444_v12 }
 0x2ea   :  { %v354_v57 = vmul.f32 1.442695, %v347_v56 }
 0x2eb   :  { %v379_v58 = vpop.permute.xlu1 %378 }
 0x2ec   :  { %3185 = vpow2.f32 %v354_v57  ;;  %2931 = vmatpush3.bf16.msra.mxu1 %v379_v58 }
 0x2ed   :  { %v3180_v59 = vpop.eup %3179  ;;  %2942 = vmatprep.subr.bf16.mxu1 %v3444_v12 }
 0x2ee   :  { %v356_v60 = vsel %vm126_vm4, %v3180_v59, 0.0 }
 0x2ef   :  { %357 = vadd.xlane.f32.xlu1 %v356_v60  ;;  %v516_v3 = vpop.permute.xlu1 %515 }
 0x2f0   :  { %v521_v15 = vsel %vm234_vm3, %v516_v3, 0 }
 0x2f1   :  { %v3182_v61 = vpop.eup %3181 }
 0x2f2   :  { %v359_v62 = vsel %vm126_vm4, %v3182_v61, 0.0 }
 0x2f3   :  { %360 = vadd.xlane.f32.xlu1 %v359_v62  ;;  %v567_v4 = vpop.permute.xlu1 %566 }
 0x2f4   :  { %v572_v25 = vsel %vm234_vm3, %v567_v4, 0 }
 0x2f5   :  { %v3184_v63 = vpop.eup %3183 }
 0x2f6   :  { %v362_v0 = vsel %vm126_vm4, %v3184_v63, 0.0 }
 0x2f7   :  { %363 = vadd.xlane.f32.xlu1 %v362_v0 }
 0x2f9   :  { %v3186_v1 = vpop.eup %3185 }
 0x2fa   :  { %v365_v2 = vsel %vm126_vm4, %v3186_v1, 0.0 }
 0x2fb   :  { %366 = vadd.xlane.f32.xlu1 %v365_v2 }
 0x30c   :  { %513 = vrot.lane.b32.xlu1 %v3529_v17, %s3448_s23 }
 0x310   :  { %564 = vrot.lane.b32.xlu1 %v3533_v18, %s3448_s23 }
 0x378   :  { %v358_v5 = vpop.xlane.xlu1 %357 }
 0x379   :  { %3187 = vrcp.f32 %v358_v5 }
 0x37c   :  { %v361_v6 = vpop.xlane.xlu1 %360 }
 0x37d   :  { %3189 = vrcp.f32 %v361_v6 }
 0x380   :  { %v364_v7 = vpop.xlane.xlu1 %363 }
 0x381   :  { %3191 = vrcp.f32 %v364_v7 }
 0x384   :  { %v367_v8 = vpop.xlane.xlu1 %366 }
 0x385   :  { %3193 = vrcp.f32 %v367_v8 }
 0x386   :  { %v3188_v9 = vpop.eup %3187 }
 0x387   :  { %v372_v11 = vmul.f32 %v3188_v9, %v3180_v59 }
 0x388   :  { %v514_v23 = vpop.permute.xlu1 %513 }
 0x38a   :  { %v3190_v10 = vpop.eup %3189 }
 0x38b   :  { %v373_v13 = vmul.f32 %v3190_v10, %v3182_v61 }
 0x38c   :  { %v565_v26 = vpop.permute.xlu1 %564 }
 0x38d   :  { %v376_v14 = vpack.c.bf16 %v373_v13, %v372_v11 }
 0x38e   :  { %v3192_v16 = vpop.eup %3191 }
 0x38f   :  { %2933 = vmatmul.mubr.msk.bf16.vlgmr.msra.gmra.mxu1 %vm126_vm4, %v376_v14  ;;  %v374_v20 = vmul.f32 %v3192_v16, %v3184_v63 }
 0x390   :  { %2943 = vmatpush3.bf16.xpose.msra.mxu1 %v521_v15  ;;  %2944 = vmatprep.mubr.msk.bf16.mxu1 %vm3445_vm2, %v3444_v12 }
 0x391   :  { %2954 = vmatprep.subr.bf16.mxu1 %v3444_v12 }
 0x392   :  { %v3194_v19 = vpop.eup %3193 }
 0x393   :  { %v375_v21 = vmul.f32 %v3194_v19, %v3186_v1 }
 0x395   :  { %v377_v22 = vpack.c.bf16 %v375_v21, %v374_v20 }
 0x397   :  { %2939 = vmatmul.mubr.msk.bf16.vlgmr.msra.gmra.mxu0 %vm126_vm4, %v377_v22  ;;  %2945 = vmatmul.mubr.msk.bf16.vlgmr.msra.gmra.mxu1 %vm234_vm3, %v514_v23 }
 0x398   :  { %2949 = vmatpush3.bf16.xpose.msra.mxu0 %v572_v25  ;;  %2950 = vmatprep.mubr.msk.bf16.mxu0 %vm3445_vm2, %v3444_v12 }
 0x399   :  { %2960 = vmatprep.subr.bf16.mxu0 %v3444_v12  ;;  %2956 = vmatprep.mubr.msk.bf16.mxu1 %vm3445_vm2, %v3444_v12 }
 0x39f   :  { %2951 = vmatmul.mubr.msk.bf16.vlgmr.msra.gmra.mxu0 %vm234_vm3, %v565_v26 }
 0x3a0   :  { %2962 = vmatprep.mubr.msk.bf16.mxu0 %vm3445_vm2, %v3444_v12 }
 0x44f   :  { %v3599_v28 = vpop.f32.mrf.mxu1 }
 0x451   :  { %v2934_v29 = vpop.f32.mrf.mxu1 }
 0x453   :  { %v3601_v30 = vpop.f32.mrf.mxu1 }
 0x455   :  { %v2935_v31 = vpop.f32.mrf.mxu1 }
 0x457   :  { %v3603_v32 = vpop.f32.mrf.mxu0  ;;  %v557_v34 = vpop.f32.mrf.mxu1 }
 0x458   :  { %v558_v35 = vadd.f32 %v3549_v24, %v557_v34 }
 0x459   :  { %v2940_v36 = vpop.f32.mrf.mxu0  ;;  %v2946_v37 = vpop.f32.mrf.mxu1 }
 0x45a   :  { %v615_v39 = vsel %vm126_vm4, %v558_v35, -inf }
 0x45b   :  { %616 = vmax.xlane.f32.xlu0 %v615_v39  ;;  %v3607_v40 = vpop.f32.mrf.mxu0  ;;  %v560_v41 = vpop.f32.mrf.mxu1 }
 0x45c   :  { %v561_v42 = vadd.f32 %v3552_v27, %v560_v41 }
 0x45d   :  { %v2941_v43 = vpop.f32.mrf.mxu0  ;;  %v2947_v44 = vpop.f32.mrf.mxu1 }
 0x45e   :  { %v618_v45 = vsel %vm126_vm4, %v561_v42, -inf }
 0x45f   :  { %619 = vmax.xlane.f32.xlu1 %v618_v45  ;;  %v608_v46 = vpop.f32.mrf.mxu0 }
 0x460   :  { %v609_v47 = vadd.f32 %v3556_v33, %v608_v46 }
 0x461   :  { %v2952_v48 = vpop.f32.mrf.mxu0 }
 0x462   :  { %v621_v49 = vsel %vm126_vm4, %v609_v47, -inf }
 0x463   :  { %622 = vmax.xlane.f32.xlu0 %v621_v49  ;;  %v611_v50 = vpop.f32.mrf.mxu0 }
 0x464   :  { %v612_v51 = vadd.f32 %v3560_v38, %v611_v50 }
 0x465   :  { %v2953_v52 = vpop.f32.mrf.mxu0 }
 0x466   :  { %v624_v53 = vsel %vm126_vm4, %v612_v51, -inf }
 0x467   :  { %625 = vmax.xlane.f32.xlu0 %v624_v53 }
 0x470   :  { %661 = vrot.lane.b32.xlu1 %v3529_v17, %s3449_s25 }
 0x4e4   :  { %v617_v54 = vpop.xlane.xlu0 %616 }
 0x4e5   :  { %v627_v55 = vsub.f32 %v558_v35, %v617_v54 }
 0x4e7   :  { %v631_v56 = vmul.f32 1.442695, %v627_v55 }
 0x4e8   :  { %v620_v57 = vpop.xlane.xlu1 %619 }
 0x4e9   :  { %3195 = vpow2.f32 %v631_v56  ;;  %v628_v58 = vsub.f32 %v561_v42, %v620_v57 }
 0x4eb   :  { %v633_v59 = vmul.f32 1.442695, %v628_v58 }
 0x4ec   :  { %v662_v60 = vpop.permute.xlu1 %661  ;;  %v623_v61 = vpop.xlane.xlu0 %622 }
 0x4ed   :  { %3197 = vpow2.f32 %v633_v59  ;;  %v629_v62 = vsub.f32 %v609_v47, %v623_v61  ;;  %2955 = vmatpush3.bf16.msra.mxu1 %v662_v60 }
 0x4ee   :  { %2966 = vmatprep.subr.bf16.mxu1 %v3444_v12 }
 0x4ef   :  { %v635_v63 = vmul.f32 1.442695, %v629_v62 }
 0x4f0   :  { %v626_v0 = vpop.xlane.xlu0 %625 }
 0x4f1   :  { %3199 = vpow2.f32 %v635_v63  ;;  %v630_v1 = vsub.f32 %v612_v51, %v626_v0 }
 0x4f3   :  { %v637_v2 = vmul.f32 1.442695, %v630_v1 }
 0x4f5   :  { %3201 = vpow2.f32 %v637_v2 }
 0x4f6   :  { %v3196_v3 = vpop.eup %3195 }
 0x4f7   :  { %v639_v4 = vsel %vm126_vm4, %v3196_v3, 0.0 }
 0x4f8   :  { %640 = vadd.xlane.f32.xlu1 %v639_v4 }
 0x4fa   :  { %v3198_v5 = vpop.eup %3197 }
 0x4fb   :  { %v642_v6 = vsel %vm126_vm4, %v3198_v5, 0.0 }
 0x4fc   :  { %643 = vadd.xlane.f32.xlu0 %v642_v6 }
 0x4fe   :  { %v3200_v7 = vpop.eup %3199 }
 0x4ff   :  { %v645_v8 = vsel %vm126_vm4, %v3200_v7, 0.0 }
 0x500   :  { %646 = vadd.xlane.f32.xlu1 %v645_v8 }
 0x502   :  { %v3202_v9 = vpop.eup %3201 }
 0x503   :  { %v648_v10 = vsel %vm126_vm4, %v3202_v9, 0.0 }
 0x504   :  { %649 = vadd.xlane.f32.xlu0 %v648_v10 }
 0x511   :  { %790 = vrot.lane.b32.xlu1 %v3529_v17, %s3450_s26 }
 0x515   :  { %841 = vrot.lane.b32.xlu1 %v3533_v18, %s3450_s26 }
 0x519   :  { %839 = vrot.lane.b32.xlu1 %v3533_v18, %s3451_s27 }
 0x51a   :  { %708 = vrot.lane.b32.xlu0 %v3533_v18, %s3449_s25 }
 0x51e   :  { %788 = vrot.lane.b32.xlu0 %v3529_v17, %s3451_s27 }
 0x581   :  { %v641_v11 = vpop.xlane.xlu1 %640 }
 0x582   :  { %3203 = vrcp.f32 %v641_v11 }
 0x585   :  { %v644_v13 = vpop.xlane.xlu0 %643 }
 0x586   :  { %3205 = vrcp.f32 %v644_v13 }
 0x589   :  { %v647_v14 = vpop.xlane.xlu1 %646 }
 0x58a   :  { %3207 = vrcp.f32 %v647_v14 }
 0x58d   :  { %v650_v15 = vpop.xlane.xlu0 %649  ;;  %v791_v23 = vpop.permute.xlu1 %790 }
 0x58e   :  { %3209 = vrcp.f32 %v650_v15  ;;  %v796_v26 = vsel %vm234_vm3, %v791_v23, 0 }
 0x58f   :  { %v3204_v16 = vpop.eup %3203 }
 0x590   :  { %v655_v21 = vmul.f32 %v3204_v16, %v3196_v3 }
 0x591   :  { %v709_v19 = vpop.permute.xlu0 %708  ;;  %v842_v36 = vpop.permute.xlu1 %841 }
 0x592   :  { %2961 = vmatpush3.bf16.msra.mxu0 %v709_v19  ;;  %v847_v41 = vsel %vm234_vm3, %v842_v36, 0 }
 0x593   :  { %v3206_v20 = vpop.eup %3205  ;;  %2972 = vmatprep.subr.bf16.mxu0 %v3444_v12 }
 0x594   :  { %v656_v22 = vmul.f32 %v3206_v20, %v3198_v5 }
 0x595   :  { %v789_v39 = vpop.permute.xlu0 %788  ;;  %v840_v42 = vpop.permute.xlu1 %839 }
 0x596   :  { %v659_v25 = vpack.c.bf16 %v656_v22, %v655_v21 }
 0x597   :  { %v3208_v29 = vpop.eup %3207 }
 0x598   :  { %2957 = vmatmul.mubr.msk.bf16.vlgmr.msra.gmra.mxu1 %vm126_vm4, %v659_v25  ;;  %v657_v34 = vmul.f32 %v3208_v29, %v3200_v7 }
 0x599   :  { %2967 = vmatpush3.bf16.xpose.msra.mxu1 %v796_v26  ;;  %2968 = vmatprep.mubr.msk.bf16.mxu1 %vm3445_vm2, %v3444_v12 }
 0x59a   :  { %2978 = vmatprep.subr.bf16.mxu1 %v3444_v12 }
 0x59b   :  { %v3210_v31 = vpop.eup %3209 }
 0x59c   :  { %v658_v35 = vmul.f32 %v3210_v31, %v3202_v9 }
 0x59e   :  { %v660_v37 = vpack.c.bf16 %v658_v35, %v657_v34 }
 0x5a0   :  { %2963 = vmatmul.mubr.msk.bf16.vlgmr.msra.gmra.mxu0 %vm126_vm4, %v660_v37  ;;  %2969 = vmatmul.mubr.msk.bf16.vlgmr.msra.gmra.mxu1 %vm234_vm3, %v789_v39 }
 0x5a1   :  { %2973 = vmatpush3.bf16.xpose.msra.mxu0 %v847_v41  ;;  %2974 = vmatprep.mubr.msk.bf16.mxu0 %vm3445_vm2, %v3444_v12 }
 0x5a2   :  { %2984 = vmatprep.subr.bf16.mxu0 %v3444_v12  ;;  %2980 = vmatprep.mubr.msk.bf16.mxu1 %vm3445_vm2, %v3444_v12 }
 0x5a8   :  { %2975 = vmatmul.mubr.msk.bf16.vlgmr.msra.gmra.mxu0 %vm234_vm3, %v840_v42 }
 0x5a9   :  { %2986 = vmatprep.mubr.msk.bf16.mxu0 %vm3445_vm2, %v3444_v12 }
 0x658   :  { %v3649_v43 = vpop.f32.mrf.mxu1 }
 0x65a   :  { %v2958_v44 = vpop.f32.mrf.mxu1 }
 0x65c   :  { %v3651_v45 = vpop.f32.mrf.mxu1 }
 0x65e   :  { %v2959_v46 = vpop.f32.mrf.mxu1 }
 0x660   :  { %v3653_v47 = vpop.f32.mrf.mxu0  ;;  %v832_v48 = vpop.f32.mrf.mxu1 }
 0x661   :  { %v833_v49 = vadd.f32 %v3549_v24, %v832_v48 }
 0x662   :  { %v2964_v50 = vpop.f32.mrf.mxu0  ;;  %v2970_v51 = vpop.f32.mrf.mxu1 }
 0x663   :  { %v890_v52 = vsel %vm126_vm4, %v833_v49, -inf }
 0x664   :  { %891 = vmax.xlane.f32.xlu0 %v890_v52  ;;  %v3657_v53 = vpop.f32.mrf.mxu0  ;;  %v835_v54 = vpop.f32.mrf.mxu1 }
 0x665   :  { %v836_v55 = vadd.f32 %v3552_v27, %v835_v54 }
 0x666   :  { %v2965_v56 = vpop.f32.mrf.mxu0  ;;  %v2971_v57 = vpop.f32.mrf.mxu1 }
 0x667   :  { %v893_v58 = vsel %vm126_vm4, %v836_v55, -inf }
 0x668   :  { %894 = vmax.xlane.f32.xlu1 %v893_v58  ;;  %v883_v59 = vpop.f32.mrf.mxu0 }
 0x669   :  { %v884_v60 = vadd.f32 %v3556_v33, %v883_v59 }
 0x66a   :  { %v2976_v61 = vpop.f32.mrf.mxu0 }
 0x66b   :  { %v896_v62 = vsel %vm126_vm4, %v884_v60, -inf }
 0x66c   :  { %897 = vmax.xlane.f32.xlu0 %v896_v62  ;;  %v886_v63 = vpop.f32.mrf.mxu0 }
 0x66d   :  { %v887_v0 = vadd.f32 %v3560_v38, %v886_v63 }
 0x66e   :  { %v2977_v1 = vpop.f32.mrf.mxu0 }
 0x66f   :  { %v899_v2 = vsel %vm126_vm4, %v887_v0, -inf }
 0x670   :  { %900 = vmax.xlane.f32.xlu0 %v899_v2 }
 0x679   :  { %936 = vrot.lane.b32.xlu1 %v3529_v17, %s3452_s28 }
 0x6ed   :  { %v892_v3 = vpop.xlane.xlu0 %891 }
 0x6ee   :  { %v902_v4 = vsub.f32 %v833_v49, %v892_v3 }
 0x6f0   :  { %v906_v5 = vmul.f32 1.442695, %v902_v4 }
 0x6f1   :  { %v895_v6 = vpop.xlane.xlu1 %894 }
 0x6f2   :  { %3211 = vpow2.f32 %v906_v5  ;;  %v903_v7 = vsub.f32 %v836_v55, %v895_v6 }
 0x6f4   :  { %v908_v8 = vmul.f32 1.442695, %v903_v7 }
 0x6f5   :  { %v937_v9 = vpop.permute.xlu1 %936  ;;  %v898_v10 = vpop.xlane.xlu0 %897 }
 0x6f6   :  { %3213 = vpow2.f32 %v908_v8  ;;  %v904_v11 = vsub.f32 %v884_v60, %v898_v10  ;;  %2979 = vmatpush3.bf16.msra.mxu1 %v937_v9 }
 0x6f7   :  { %2990 = vmatprep.subr.bf16.mxu1 %v3444_v12 }
 0x6f8   :  { %v910_v13 = vmul.f32 1.442695, %v904_v11 }
 0x6f9   :  { %v901_v14 = vpop.xlane.xlu0 %900 }
 0x6fa   :  { %3215 = vpow2.f32 %v910_v13  ;;  %v905_v15 = vsub.f32 %v887_v0, %v901_v14 }
 0x6fc   :  { %v912_v16 = vmul.f32 1.442695, %v905_v15 }
 0x6fe   :  { %3217 = vpow2.f32 %v912_v16 }
 0x6ff   :  { %v3212_v19 = vpop.eup %3211 }
 0x700   :  { %v914_v20 = vsel %vm126_vm4, %v3212_v19, 0.0 }
 0x701   :  { %915 = vadd.xlane.f32.xlu1 %v914_v20 }
 0x703   :  { %v3214_v21 = vpop.eup %3213 }
 0x704   :  { %v917_v22 = vsel %vm126_vm4, %v3214_v21, 0.0 }
 0x705   :  { %918 = vadd.xlane.f32.xlu0 %v917_v22 }
 0x707   :  { %v3216_v23 = vpop.eup %3215 }
 0x708   :  { %v920_v25 = vsel %vm126_vm4, %v3216_v23, 0.0 }
 0x709   :  { %921 = vadd.xlane.f32.xlu1 %v920_v25 }
 0x70b   :  { %v3218_v26 = vpop.eup %3217 }
 0x70c   :  { %v923_v29 = vsel %vm126_vm4, %v3218_v26, 0.0 }
 0x70d   :  { %924 = vadd.xlane.f32.xlu0 %v923_v29 }
 0x71a   :  { %1065 = vrot.lane.b32.xlu1 %v3529_v17, %s3453_s29 }
 0x71e   :  { %1116 = vrot.lane.b32.xlu1 %v3533_v18, %s3453_s29 }
 0x722   :  { %1114 = vrot.lane.b32.xlu1 %v3533_v18, %s3454_s30 }
 0x723   :  { %983 = vrot.lane.b32.xlu0 %v3533_v18, %s3452_s28 }
 0x727   :  { %1063 = vrot.lane.b32.xlu0 %v3529_v17, %s3454_s30 }
 0x78a   :  { %v916_v31 = vpop.xlane.xlu1 %915 }
 0x78b   :  { %3219 = vrcp.f32 %v916_v31 }
 0x78e   :  { %v919_v34 = vpop.xlane.xlu0 %918 }
 0x78f   :  { %3221 = vrcp.f32 %v919_v34 }
 0x792   :  { %v922_v35 = vpop.xlane.xlu1 %921 }
 0x793   :  { %3223 = vrcp.f32 %v922_v35 }
 0x796   :  { %v925_v36 = vpop.xlane.xlu0 %924  ;;  %v1066_v46 = vpop.permute.xlu1 %1065 }
 0x797   :  { %3225 = vrcp.f32 %v925_v36  ;;  %v1071_v49 = vsel %vm234_vm3, %v1066_v46, 0 }
 0x798   :  { %v3220_v37 = vpop.eup %3219 }
 0x799   :  { %v930_v42 = vmul.f32 %v3220_v37, %v3212_v19 }
 0x79a   :  { %v984_v39 = vpop.permute.xlu0 %983  ;;  %v1117_v55 = vpop.permute.xlu1 %1116 }
 0x79b   :  { %2985 = vmatpush3.bf16.msra.mxu0 %v984_v39  ;;  %v1122_v58 = vsel %vm234_vm3, %v1117_v55, 0  ;;  %v127_v55 = vsel %vm126_vm4, %v3549_v24, -inf }
 0x79c   :  { %v3222_v41 = vpop.eup %3221  ;;  %2996 = vmatprep.subr.bf16.mxu0 %v3444_v12 }
 0x79d   :  { %v931_v44 = vmul.f32 %v3222_v41, %v3214_v21 }
 0x79e   :  { %v1064_v57 = vpop.permute.xlu0 %1063  ;;  %v1115_v59 = vpop.permute.xlu1 %1114 }
 0x79f   :  { %v934_v48 = vpack.c.bf16 %v931_v44, %v930_v42 }
 0x7a0   :  { %v3224_v50 = vpop.eup %3223 }
 0x7a1   :  { %2981 = vmatmul.mubr.msk.bf16.vlgmr.msra.gmra.mxu1 %vm126_vm4, %v934_v48  ;;  %v932_v52 = vmul.f32 %v3224_v50, %v3216_v23 }
 0x7a2   :  { %2991 = vmatpush3.bf16.xpose.msra.mxu1 %v1071_v49  ;;  %2992 = vmatprep.mubr.msk.bf16.mxu1 %vm3445_vm2, %v3444_v12 }
 0x7a3   :  { %3002 = vmatprep.subr.bf16.mxu1 %v3444_v12 }
 0x7a4   :  { %v3226_v51 = vpop.eup %3225 }
 0x7a5   :  { %v933_v54 = vmul.f32 %v3226_v51, %v3218_v26 }
 0x7a7   :  { %v935_v56 = vpack.c.bf16 %v933_v54, %v932_v52 }
 0x7a9   :  { %2987 = vmatmul.mubr.msk.bf16.vlgmr.msra.gmra.mxu0 %vm126_vm4, %v935_v56  ;;  %2993 = vmatmul.mubr.msk.bf16.vlgmr.msra.gmra.mxu1 %vm234_vm3, %v1064_v57  ;;  %v133_v56 = vsel %vm126_vm4, %v3556_v33, -inf  ;;  %v130_v57 = vsel %vm126_vm4, %v3552_v27, -inf }
 0x7aa   :  { %2997 = vmatpush3.bf16.xpose.msra.mxu0 %v1122_v58  ;;  %2998 = vmatprep.mubr.msk.bf16.mxu0 %vm3445_vm2, %v3444_v12  ;;  %v136_v58 = vsel %vm126_vm4, %v3560_v38, -inf }
 0x7ab   :  { %3008 = vmatprep.subr.bf16.mxu0 %v3444_v12  ;;  %3004 = vmatprep.mubr.msk.bf16.mxu1 %vm3445_vm2, %v3444_v12 }
 0x7b1   :  { %2999 = vmatmul.mubr.msk.bf16.vlgmr.msra.gmra.mxu0 %vm234_vm3, %v1115_v59 }
 0x7b2   :  { %3010 = vmatprep.mubr.msk.bf16.mxu0 %vm3445_vm2, %v3444_v12 }
 0x861   :  { %v3699_v60 = vpop.f32.mrf.mxu1 }
 0x863   :  { %v2982_v61 = vpop.f32.mrf.mxu1 }
 0x865   :  { %v3701_v62 = vpop.f32.mrf.mxu1 }
 0x867   :  { %v2983_v63 = vpop.f32.mrf.mxu1 }
 0x869   :  { %v3703_v0 = vpop.f32.mrf.mxu0  ;;  %v1107_v1 = vpop.f32.mrf.mxu1 }
 0x86a   :  { %v1108_v2 = vadd.f32 %v3549_v24, %v1107_v1 }
 0x86b   :  { %v2988_v3 = vpop.f32.mrf.mxu0  ;;  %v2994_v4 = vpop.f32.mrf.mxu1 }
 0x86c   :  { %v1165_v5 = vsel %vm126_vm4, %v1108_v2, -inf }
 0x86d   :  { %1166 = vmax.xlane.f32.xlu0 %v1165_v5  ;;  %v3707_v6 = vpop.f32.mrf.mxu0  ;;  %v1110_v7 = vpop.f32.mrf.mxu1 }
 0x86e   :  { %v1111_v8 = vadd.f32 %v3552_v27, %v1110_v7 }
 0x86f   :  { %v2989_v9 = vpop.f32.mrf.mxu0  ;;  %v2995_v10 = vpop.f32.mrf.mxu1 }
 0x870   :  { %v1168_v11 = vsel %vm126_vm4, %v1111_v8, -inf }
 0x871   :  { %1169 = vmax.xlane.f32.xlu1 %v1168_v11  ;;  %v1158_v13 = vpop.f32.mrf.mxu0 }
 0x872   :  { %v1159_v14 = vadd.f32 %v3556_v33, %v1158_v13 }
 0x873   :  { %v3000_v15 = vpop.f32.mrf.mxu0 }
 0x874   :  { %v1171_v16 = vsel %vm126_vm4, %v1159_v14, -inf }
 0x875   :  { %1172 = vmax.xlane.f32.xlu0 %v1171_v16  ;;  %v1161_v19 = vpop.f32.mrf.mxu0 }
 0x876   :  { %v1162_v20 = vadd.f32 %v3560_v38, %v1161_v19 }
 0x877   :  { %v3001_v21 = vpop.f32.mrf.mxu0 }
 0x878   :  { %v1174_v22 = vsel %vm126_vm4, %v1162_v20, -inf }
 0x879   :  { %1175 = vmax.xlane.f32.xlu0 %v1174_v22 }
 0x8f6   :  { %v1167_v23 = vpop.xlane.xlu0 %1166 }
 0x8f7   :  { %v1177_v25 = vsub.f32 %v1108_v2, %v1167_v23 }
 0x8f9   :  { %v1181_v26 = vmul.f32 1.442695, %v1177_v25 }
 0x8fa   :  { %v1170_v29 = vpop.xlane.xlu1 %1169 }
 0x8fb   :  { %3227 = vpow2.f32 %v1181_v26  ;;  %v1178_v31 = vsub.f32 %v1111_v8, %v1170_v29 }
 0x8fd   :  { %v1183_v34 = vmul.f32 1.442695, %v1178_v31 }
 0x8fe   :  { %v1173_v35 = vpop.xlane.xlu0 %1172 }
 0x8ff   :  { %3229 = vpow2.f32 %v1183_v34  ;;  %v1179_v36 = vsub.f32 %v1159_v14, %v1173_v35 }
 0x901   :  { %v1185_v37 = vmul.f32 1.442695, %v1179_v36 }
 0x902   :  { %v1176_v39 = vpop.xlane.xlu0 %1175 }
 0x903   :  { %3231 = vpow2.f32 %v1185_v37  ;;  %v1180_v41 = vsub.f32 %v1162_v20, %v1176_v39 }
 0x905   :  { %v1187_v42 = vmul.f32 1.442695, %v1180_v41 }
 0x907   :  { %3233 = vpow2.f32 %v1187_v42 }
 0x908   :  { %v3228_v44 = vpop.eup %3227 }
 0x909   :  { %v1189_v46 = vsel %vm126_vm4, %v3228_v44, 0.0 }
 0x90a   :  { %1190 = vadd.xlane.f32.xlu1 %v1189_v46 }
 0x90c   :  { %v3230_v48 = vpop.eup %3229 }
 0x90d   :  { %v1192_v49 = vsel %vm126_vm4, %v3230_v48, 0.0 }
 0x90e   :  { %1193 = vadd.xlane.f32.xlu0 %v1192_v49 }
 0x910   :  { %v3232_v50 = vpop.eup %3231 }
 0x911   :  { %v1195_v51 = vsel %vm126_vm4, %v3232_v50, 0.0 }
 0x912   :  { %1196 = vadd.xlane.f32.xlu1 %v1195_v51 }
 0x914   :  { %v3234_v52 = vpop.eup %3233 }
 0x915   :  { %v1198_v54 = vsel %vm126_vm4, %v3234_v52, 0.0 }
 0x916   :  { %1199 = vadd.xlane.f32.xlu0 %v1198_v54 }
 0x923   :  { %1211 = vrot.lane.b32.xlu1 %v3529_v17, %s3455_s7 }
 0x92c   :  { %1258 = vrot.lane.b32.xlu0 %v3533_v18, %s3455_s7 }
 0x947   :  { %128 = vmax.xlane.f32.xlu1 %v127_v55 }
 0x94b   :  { %134 = vmax.xlane.f32.xlu1 %v133_v56  ;;  %131 = vmax.xlane.f32.xlu0 %v130_v57  ;;  %v3165_v56 = vld [vmem:[#allocation9 + $0x18] sm:$0xff]   ;;  %v3166_v57 = vld [vmem:[#allocation9 + $0x10] sm:$0xff]  }
 0x94f   :  { %137 = vmax.xlane.f32.xlu0 %v136_v58 }
 0x993   :  { %v1191_v17 = vpop.xlane.xlu1 %1190 }
 0x994   :  { %3235 = vrcp.f32 %v1191_v17 }
 0x997   :  { %v1194_v59 = vpop.xlane.xlu0 %1193 }
 0x998   :  { %3237 = vrcp.f32 %v1194_v59 }
 0x99b   :  { %v1197_v18 = vpop.xlane.xlu1 %1196 }
 0x99c   :  { %3239 = vrcp.f32 %v1197_v18 }
 0x99f   :  { %v1212_v61 = vpop.permute.xlu1 %1211  ;;  %v1200_v63 = vpop.xlane.xlu0 %1199 }
 0x9a0   :  { %3241 = vrcp.f32 %v1200_v63  ;;  %3003 = vmatpush3.bf16.msra.mxu1 %v1212_v61  ;;  %v3167_v61 = vld [vmem:[#allocation9 + $0x8] sm:$0xff]  }
 0x9a1   :  { %v3236_v1 = vpop.eup %3235  ;;  %3014 = vmatprep.subr.bf16.mxu1 %v3165_v56 }
 0x9a2   :  { %v1205_v4 = vmul.f32 %v3236_v1, %v3228_v44  ;;  %v3169_v1 = vld [vmem:[#allocation9] sm:$0xff]  }
 0x9a3   :  { %v1259_v2 = vpop.permute.xlu0 %1258 }
 0x9a4   :  { %3009 = vmatpush3.bf16.msra.mxu0 %v1259_v2 }
 0x9a5   :  { %v3238_v3 = vpop.eup %3237  ;;  %3026 = vmatprep.subr.bf16.mxu0 %v3444_v12 }
 0x9a6   :  { %v1206_v5 = vmul.f32 %v3238_v3, %v3230_v48 }
 0x9a8   :  { %v1209_v7 = vpack.c.bf16 %v1206_v5, %v1205_v4 }
 0x9a9   :  { %v3240_v8 = vpop.eup %3239 }
 0x9aa   :  { %3005 = vmatmul.mubr.msk.bf16.vlgmr.msra.gmra.mxu1 %vm126_vm4, %v1209_v7  ;;  %v1207_v10 = vmul.f32 %v3240_v8, %v3232_v50 }
 0x9ab   :  { %3015 = vmatpush3.bf16.msra.mxu1 %v3165_v56 }
 0x9ac   :  { %3016 = vmatprep.subr.bf16.mxu1 %v3166_v57 }
 0x9ad   :  { %v3242_v9 = vpop.eup %3241 }
 0x9ae   :  { %v1208_v11 = vmul.f32 %v3242_v9, %v3234_v52 }
 0x9af   :  { %3017 = vmatpush3.bf16.msra.mxu1 %v3166_v57 }
 0x9b0   :  { %v1210_v13 = vpack.c.bf16 %v1208_v11, %v1207_v10  ;;  %3018 = vmatprep.subr.bf16.mxu1 %v3167_v61 }
 0x9b2   :  { %3011 = vmatmul.mubr.msk.bf16.vlgmr.msra.gmra.mxu0 %vm126_vm4, %v1210_v13 }
 0x9b3   :  { %3028 = vmatprep.mubr.msk.bf16.mxu0 %vm3445_vm2, %v3444_v12  ;;  %3019 = vmatpush3.bf16.msra.mxu1 %v3167_v61 }
 0x9b4   :  { %3020 = vmatprep.subr.bf16.mxu1 %v3169_v1 }
 0x9b7   :  { %3021 = vmatpush3.bf16.msra.mxu1 %v3169_v1 }
 0x9b8   :  { %3038 = vmatprep.subr.bf16.mxu1 %v3444_v12 }
 0x9d0   :  { %v3736_v14 = vpop.xlane.xlu1 %128 }
 0x9d1   :  { %vm139_vm5 = vcmp.gt.f32.partialorder %v3736_v14, -1.0 }
 0x9d2   :  { %v480_v15 = vsel %vm139_vm5, %v3599_v28, 0.0  ;;  %v755_v26 = vsel %vm139_vm5, %v3649_v43, 0.0  ;;  %v1030_v36 = vsel %vm139_vm5, %v3699_v60, 0.0 }
 0x9d3   :  { %v2787_v16 = vpack.c.bf16 %v480_v15, %v480_v15  ;;  %v2791_v29 = vpack.c.bf16 %v755_v26, %v755_v26 }
 0x9d4   :  { %v3742_v19 = vpop.xlane.xlu1 %134  ;;  %v3744_v20 = vpop.xlane.xlu0 %131 }
 0x9d5   :  { %vm141_vm6 = vcmp.gt.f32.partialorder %v3742_v19, -1.0  ;;  %vm140_vm7 = vcmp.gt.f32.partialorder %v3744_v20, -1.0  ;;  %496 = vrot.lane.b32.xlu1 %v2787_v16, %s3456_s8 }
 0x9d6   :  { %v482_v21 = vsel %vm141_vm6, %v3603_v32, 0.0  ;;  %v481_v22 = vsel %vm140_vm7, %v3601_v30, 0.0  ;;  %v757_v30 = vsel %vm141_vm6, %v3653_v47, 0.0  ;;  %v756_v34 = vsel %vm140_vm7, %v3651_v45, 0.0 }
 0x9d7   :  { %v2789_v28 = vpack.c.bf16 %v482_v21, %v482_v21  ;;  %v2788_v23 = vpack.c.bf16 %v481_v22, %v481_v22  ;;  %v2793_v43 = vpack.c.bf16 %v757_v30, %v757_v30  ;;  %v2792_v35 = vpack.c.bf16 %v756_v34, %v756_v34 }
 0x9d8   :  { %v3754_v25 = vpop.xlane.xlu0 %137  ;;  %v2795_v47 = vpack.c.bf16 %v1030_v36, %v1030_v36  ;;  %v1032_v45 = vsel %vm141_vm6, %v3703_v0, 0.0  ;;  %v1031_v39 = vsel %vm140_vm7, %v3701_v62, 0.0 }
 0x9d9   :  { %vm142_vm8 = vcmp.gt.f32.partialorder %v3754_v25, -1.0  ;;  %500 = vrot.lane.b32.xlu1 %v2789_v28, %s3456_s8  ;;  %498 = vrot.lane.b32.xlu0 %v2788_v23, %s3456_s8  ;;  %v2797_v60 = vpack.c.bf16 %v1032_v45, %v1032_v45  ;;  %v2558_v25 = vlaneseq }
 0x9da   :  { %v483_v32 = vsel %vm142_vm8, %v3607_v40, 0.0  ;;  %v758_v40 = vsel %vm142_vm8, %v3657_v53, 0.0  ;;  %v2796_v53 = vpack.c.bf16 %v1031_v39, %v1031_v39  ;;  %v1033_v41 = vsel %vm142_vm8, %v3707_v6, 0.0 }
 0x9db   :  { %v2790_v31 = vpack.c.bf16 %v483_v32, %v483_v32  ;;  %v2794_v37 = vpack.c.bf16 %v758_v40, %v758_v40  ;;  %v2798_v42 = vpack.c.bf16 %v1033_v41, %v1033_v41 }
 0x9dd   :  { %771 = vrot.lane.b32.xlu0 %v2791_v29, %s3455_s7  ;;  %502 = vrot.lane.b32.xlu1 %v2790_v31, %s3456_s8 }
 0x9e1   :  { %775 = vrot.lane.b32.xlu0 %v2793_v43, %s3455_s7  ;;  %773 = vrot.lane.b32.xlu1 %v2792_v35, %s3455_s7 }
 0x9e5   :  { %1046 = vrot.lane.b32.xlu0 %v2795_v47, %s3452_s28  ;;  %777 = vrot.lane.b32.xlu1 %v2794_v37, %s3455_s7 }
 0x9e9   :  { %1050 = vrot.lane.b32.xlu0 %v2797_v60, %s3452_s28  ;;  %1048 = vrot.lane.b32.xlu1 %v2796_v53, %s3452_s28 }
 0x9ed   :  { %1052 = vrot.lane.b32.xlu1 %v2798_v42, %s3452_s28 }
 0xa47   :  { %v497_v0 = vpop.permute.xlu1 %496 }
 0xa48   :  { %509 = vst.msk [vmem:[#allocation2] sm:$0xf] %vm508_vm9, %v497_v0 }
 0xa4b   :  { %v501_v62 = vpop.permute.xlu1 %500  ;;  %v499_v44 = vpop.permute.xlu0 %498 }
 0xa4c   :  { %511 = vst.msk [vmem:[#allocation2 + $0x8] sm:$0xf] %vm508_vm9, %v501_v62  ;;  %510 = vst.msk [vmem:[#allocation2 + $0x4] sm:$0xf] %vm508_vm9, %v499_v44 }
 0xa4f   :  { %v503_v46 = vpop.permute.xlu1 %502  ;;  %v772_v48 = vpop.permute.xlu0 %771 }
 0xa50   :  { %512 = vst.msk [vmem:[#allocation2 + $0xc] sm:$0xf] %vm508_vm9, %v503_v46 }
 0xa51   :  { %784 = vst.msk [vmem:[#allocation2] sm:$0xf] %vm783_vm10, %v772_v48 }
 0xa53   :  { %v774_v6 = vpop.permute.xlu1 %773  ;;  %v776_v49 = vpop.permute.xlu0 %775 }
 0xa54   :  { %785 = vst.msk [vmem:[#allocation2 + $0x4] sm:$0xf] %vm783_vm10, %v774_v6  ;;  %786 = vst.msk [vmem:[#allocation2 + $0x8] sm:$0xf] %vm783_vm10, %v776_v49 }
 0xa57   :  { %v778_v50 = vpop.permute.xlu1 %777  ;;  %v1047_v51 = vpop.permute.xlu0 %1046 }
 0xa58   :  { %787 = vst.msk [vmem:[#allocation2 + $0xc] sm:$0xf] %vm783_vm10, %v778_v50 }
 0xa59   :  { %1059 = vst.msk [vmem:[#allocation2] sm:$0xf] %vm1058_vm11, %v1047_v51 }
 0xa5b   :  { %v1049_v52 = vpop.permute.xlu1 %1048  ;;  %v1051_v54 = vpop.permute.xlu0 %1050 }
 0xa5c   :  { %1060 = vst.msk [vmem:[#allocation2 + $0x4] sm:$0xf] %vm1058_vm11, %v1049_v52  ;;  %1061 = vst.msk [vmem:[#allocation2 + $0x8] sm:$0xf] %vm1058_vm11, %v1051_v54 }
 0xa5f   :  { %v1053_v55 = vpop.permute.xlu1 %1052 }
 0xa60   :  { %1062 = vst.msk [vmem:[#allocation2 + $0xc] sm:$0xf] %vm1058_vm11, %v1053_v55 }
 0xa6a   :  { %v1251_v58 = vpop.f32.mrf.mxu1 }
 0xa6b   :  { %v1305_v17 = vsel %vm139_vm5, %v1251_v58, 0.0 }
 0xa6c   :  { %v2799_v59 = vpack.c.bf16 %v1305_v17, %v1305_v17  ;;  %v3006_v18 = vpop.f32.mrf.mxu1 }
 0xa6e   :  { %v1254_v63 = vpop.f32.mrf.mxu1  ;;  %1321 = vrot.lane.b32.xlu0 %v2799_v59, %s3449_s25 }
 0xa6f   :  { %v1306_v2 = vsel %vm140_vm7, %v1254_v63, 0.0 }
 0xa70   :  { %v2800_v3 = vpack.c.bf16 %v1306_v2, %v1306_v2  ;;  %v3007_v4 = vpop.f32.mrf.mxu1 }
 0xa72   :  { %1323 = vrot.lane.b32.xlu1 %v2800_v3, %s3449_s25  ;;  %v1298_v5 = vpop.f32.mrf.mxu0 }
 0xa73   :  { %v1307_v7 = vsel %vm141_vm6, %v1298_v5, 0.0 }
 0xa74   :  { %v2801_v8 = vpack.c.bf16 %v1307_v7, %v1307_v7  ;;  %v3012_v9 = vpop.f32.mrf.mxu0 }
 0xa76   :  { %1325 = vrot.lane.b32.xlu0 %v2801_v8, %s3449_s25  ;;  %v1301_v10 = vpop.f32.mrf.mxu0 }
 0xa77   :  { %v1308_v11 = vsel %vm142_vm8, %v1301_v10, 0.0 }
 0xa78   :  { %v2802_v13 = vpack.c.bf16 %v1308_v11, %v1308_v11  ;;  %v3013_v15 = vpop.f32.mrf.mxu0 }
 0xa7a   :  { %1327 = vrot.lane.b32.xlu1 %v2802_v13, %s3449_s25 }
 0xae0   :  { %v1322_v16 = vpop.permute.xlu0 %1321 }
 0xae1   :  { %1334 = vst.msk [vmem:[#allocation2] sm:$0xf] %vm1333_vm12, %v1322_v16 }
 0xae4   :  { %v1324_v21 = vpop.permute.xlu1 %1323 }
 0xae5   :  { %1335 = vst.msk [vmem:[#allocation2 + $0x4] sm:$0xf] %vm1333_vm12, %v1324_v21 }
 0xae8   :  { %v1326_v22 = vpop.permute.xlu0 %1325 }
 0xae9   :  { %1336 = vst.msk [vmem:[#allocation2 + $0x8] sm:$0xf] %vm1333_vm12, %v1326_v22 }
 0xaec   :  { %v1328_v28 = vpop.permute.xlu1 %1327  ;;  %v3168_v23 = vld [vmem:[#allocation2] sm:$0xff]  }
 0xaed   :  { %1337 = vst.msk [vmem:[#allocation2 + $0xc] sm:$0xf] %vm1333_vm12, %v1328_v28  ;;  %3022 = vmatprep.mubr.msk.bf16.mxu1 %vm1384_vm13, %v3168_v23 }
 0xaf4   :  { %v3170_v26 = vld [vmem:[#allocation2 + $0x8] sm:$0xff]  }
 0xaf5   :  { %3023 = vmatmul.mubr.msk.bf16.vlgmr.msra.gmra.mxu1 %vm1384_vm13, %v3170_v26 }
 0xaf6   :  { %3040 = vmatprep.mubr.msk.bf16.mxu1 %vm3445_vm2, %v3444_v12 }
 0xbb5   :  { %v3024_v32 = vpop.f32.mrf.mxu1 }
 0xbb7   :  { %v1425_v29 = vpop.f32.mrf.mxu1 }
 0xbb9   :  { %v3025_v31 = vpop.f32.mrf.mxu1 }
 0xbba   :  { %v3807_v30 = vpack.c.bf16 %v3025_v31, %v3024_v32 }
 0xbbb   :  { %v1428_v34 = vpop.f32.mrf.mxu1 }
 0xbbc   :  { %v3809_v43 = vpack.c.bf16 %v1428_v34, %v1425_v29  ;;  %1493 = vrot.lane.b32.xlu1 %v3807_v30, %s3446_s2 }
 0xbbe   :  { %1443 = vrot.lane.b32.xlu0 %v3809_v43, %s3446_s2 }
 0xc2e   :  { %v1494_v40 = vpop.permute.xlu1 %1493 }
 0xc2f   :  { %v1499_v47 = vsel %vm234_vm3, %v1494_v40, 0 }
 0xc30   :  { %v1444_v35 = vpop.permute.xlu0 %1443 }
 0xc31   :  { %v1449_v36 = vsel %vm234_vm3, %v1444_v35, 0 }
 0xc32   :  { %3027 = vmatpush3.bf16.xpose.msra.mxu0 %v1449_v36 }
 0xc33   :  { %3032 = vmatprep.subr.bf16.mxu0 %v3444_v12 }
 0xc39   :  { %3029 = vmatmul.mubr.msk.bf16.vlgmr.msra.gmra.mxu0 %vm234_vm3, %v3809_v43 }
 0xc3a   :  { %3033 = vmatpush3.bf16.xpose.msra.mxu0 %v1499_v47  ;;  %3034 = vmatprep.mubr.msk.bf16.mxu0 %vm3445_vm2, %v3444_v12 }
 0xc3b   :  { %3044 = vmatprep.subr.bf16.mxu0 %v3444_v12 }
 0xc41   :  { %3035 = vmatmul.mubr.msk.bf16.vlgmr.msra.gmra.mxu0 %vm234_vm3, %v3807_v30 }
 0xc42   :  { %3046 = vmatprep.mubr.msk.bf16.mxu0 %vm3445_vm2, %v3444_v12 }
 0xcf9   :  { %v1485_v37 = vpop.f32.mrf.mxu0 }
 0xcfa   :  { %v1486_v45 = vadd.f32 %v3549_v24, %v1485_v37 }
 0xcfb   :  { %v3030_v39 = vpop.f32.mrf.mxu0 }
 0xcfc   :  { %v1542_v60 = vsel %vm126_vm4, %v1486_v45, -inf }
 0xcfd   :  { %1543 = vmax.xlane.f32.xlu0 %v1542_v60  ;;  %v1488_v53 = vpop.f32.mrf.mxu0 }
 0xcfe   :  { %v1489_v41 = vadd.f32 %v3552_v27, %v1488_v53 }
 0xcff   :  { %v3031_v42 = vpop.f32.mrf.mxu0 }
 0xd00   :  { %v1545_v0 = vsel %vm126_vm4, %v1489_v41, -inf }
 0xd01   :  { %1546 = vmax.xlane.f32.xlu1 %v1545_v0  ;;  %v1535_v62 = vpop.f32.mrf.mxu0 }
 0xd02   :  { %v1536_v44 = vadd.f32 %v3556_v33, %v1535_v62 }
 0xd03   :  { %v3036_v46 = vpop.f32.mrf.mxu0 }
 0xd04   :  { %v1548_v48 = vsel %vm126_vm4, %v1536_v44, -inf }
 0xd05   :  { %1549 = vmax.xlane.f32.xlu0 %v1548_v48  ;;  %v1538_v6 = vpop.f32.mrf.mxu0 }
 0xd06   :  { %v1539_v49 = vadd.f32 %v3560_v38, %v1538_v6 }
 0xd07   :  { %v3037_v50 = vpop.f32.mrf.mxu0 }
 0xd08   :  { %v1551_v51 = vsel %vm126_vm4, %v1539_v49, -inf }
 0xd09   :  { %1552 = vmax.xlane.f32.xlu0 %v1551_v51 }
 0xd12   :  { %1588 = vrot.lane.b32.xlu1 %v3809_v43, %s3436_s24 }
 0xd86   :  { %v1544_v52 = vpop.xlane.xlu0 %1543 }
 0xd87   :  { %v1554_v54 = vsub.f32 %v1486_v45, %v1544_v52 }
 0xd89   :  { %v1558_v55 = vmul.f32 1.442695, %v1554_v54 }
 0xd8a   :  { %v1547_v56 = vpop.xlane.xlu1 %1546 }
 0xd8b   :  { %3243 = vpow2.f32 %v1558_v55  ;;  %v1555_v57 = vsub.f32 %v1489_v41, %v1547_v56 }
 0xd8d   :  { %v1560_v58 = vmul.f32 1.442695, %v1555_v57 }
 0xd8e   :  { %v1589_v17 = vpop.permute.xlu1 %1588  ;;  %v1550_v59 = vpop.xlane.xlu0 %1549 }
 0xd8f   :  { %3245 = vpow2.f32 %v1560_v58  ;;  %v1556_v18 = vsub.f32 %v1536_v44, %v1550_v59  ;;  %3039 = vmatpush3.bf16.msra.mxu1 %v1589_v17 }
 0xd90   :  { %3050 = vmatprep.subr.bf16.mxu1 %v3444_v12 }
 0xd91   :  { %v1562_v61 = vmul.f32 1.442695, %v1556_v18 }
 0xd92   :  { %v1553_v63 = vpop.xlane.xlu0 %1552 }
 0xd93   :  { %3247 = vpow2.f32 %v1562_v61  ;;  %v1557_v1 = vsub.f32 %v1539_v49, %v1553_v63 }
 0xd95   :  { %v1564_v2 = vmul.f32 1.442695, %v1557_v1 }
 0xd97   :  { %3249 = vpow2.f32 %v1564_v2 }
 0xd98   :  { %v3244_v3 = vpop.eup %3243 }
 0xd99   :  { %v1566_v4 = vsel %vm126_vm4, %v3244_v3, 0.0 }
 0xd9a   :  { %1567 = vadd.xlane.f32.xlu1 %v1566_v4 }
 0xd9c   :  { %v3246_v5 = vpop.eup %3245 }
 0xd9d   :  { %v1569_v7 = vsel %vm126_vm4, %v3246_v5, 0.0 }
 0xd9e   :  { %1570 = vadd.xlane.f32.xlu0 %v1569_v7 }
 0xda0   :  { %v3248_v8 = vpop.eup %3247 }
 0xda1   :  { %v1572_v9 = vsel %vm126_vm4, %v3248_v8, 0.0 }
 0xda2   :  { %1573 = vadd.xlane.f32.xlu1 %v1572_v9 }
 0xda4   :  { %v3250_v10 = vpop.eup %3249 }
 0xda5   :  { %v1575_v11 = vsel %vm126_vm4, %v3250_v10, 0.0 }
 0xda6   :  { %1576 = vadd.xlane.f32.xlu0 %v1575_v11 }
 0xdb3   :  { %1717 = vrot.lane.b32.xlu1 %v3809_v43, %s3447_s4 }
 0xdb7   :  { %1768 = vrot.lane.b32.xlu1 %v3807_v30, %s3447_s4 }
 0xdbb   :  { %1766 = vrot.lane.b32.xlu1 %v3807_v30, %s3448_s23 }
 0xdbc   :  { %1635 = vrot.lane.b32.xlu0 %v3807_v30, %s3436_s24 }
 0xdc0   :  { %1715 = vrot.lane.b32.xlu0 %v3809_v43, %s3448_s23 }
 0xe23   :  { %v1568_v13 = vpop.xlane.xlu1 %1567 }
 0xe24   :  { %3251 = vrcp.f32 %v1568_v13 }
 0xe27   :  { %v1571_v15 = vpop.xlane.xlu0 %1570 }
 0xe28   :  { %3253 = vrcp.f32 %v1571_v15 }
 0xe2b   :  { %v1574_v16 = vpop.xlane.xlu1 %1573 }
 0xe2c   :  { %3255 = vrcp.f32 %v1574_v16 }
 0xe2f   :  { %v1577_v21 = vpop.xlane.xlu0 %1576  ;;  %v1718_v29 = vpop.permute.xlu1 %1717 }
 0xe30   :  { %3257 = vrcp.f32 %v1577_v21  ;;  %v1723_v34 = vsel %vm234_vm3, %v1718_v29, 0 }
 0xe31   :  { %v3252_v22 = vpop.eup %3251 }
 0xe32   :  { %v1582_v26 = vmul.f32 %v3252_v22, %v3244_v3 }
 0xe33   :  { %v1636_v28 = vpop.permute.xlu0 %1635  ;;  %v1769_v37 = vpop.permute.xlu1 %1768 }
 0xe34   :  { %3045 = vmatpush3.bf16.msra.mxu0 %v1636_v28  ;;  %v1774_v60 = vsel %vm234_vm3, %v1769_v37, 0 }
 0xe35   :  { %v3254_v23 = vpop.eup %3253  ;;  %3056 = vmatprep.subr.bf16.mxu0 %v3444_v12 }
 0xe36   :  { %v1583_v32 = vmul.f32 %v3254_v23, %v3246_v5 }
 0xe37   :  { %v1716_v39 = vpop.permute.xlu0 %1715  ;;  %v1767_v53 = vpop.permute.xlu1 %1766 }
 0xe38   :  { %v1586_v31 = vpack.c.bf16 %v1583_v32, %v1582_v26 }
 0xe39   :  { %v3256_v35 = vpop.eup %3255 }
 0xe3a   :  { %3041 = vmatmul.mubr.msk.bf16.vlgmr.msra.gmra.mxu1 %vm126_vm4, %v1586_v31  ;;  %v1584_v40 = vmul.f32 %v3256_v35, %v3248_v8 }
 0xe3b   :  { %3051 = vmatpush3.bf16.xpose.msra.mxu1 %v1723_v34  ;;  %3052 = vmatprep.mubr.msk.bf16.mxu1 %vm3445_vm2, %v3444_v12 }
 0xe3c   :  { %3062 = vmatprep.subr.bf16.mxu1 %v3444_v12 }
 0xe3d   :  { %v3258_v36 = vpop.eup %3257 }
 0xe3e   :  { %v1585_v47 = vmul.f32 %v3258_v36, %v3250_v10 }
 0xe40   :  { %v1587_v45 = vpack.c.bf16 %v1585_v47, %v1584_v40 }
 0xe42   :  { %3047 = vmatmul.mubr.msk.bf16.vlgmr.msra.gmra.mxu0 %vm126_vm4, %v1587_v45  ;;  %3053 = vmatmul.mubr.msk.bf16.vlgmr.msra.gmra.mxu1 %vm234_vm3, %v1716_v39 }
 0xe43   :  { %3057 = vmatpush3.bf16.xpose.msra.mxu0 %v1774_v60  ;;  %3058 = vmatprep.mubr.msk.bf16.mxu0 %vm3445_vm2, %v3444_v12 }
 0xe44   :  { %3068 = vmatprep.subr.bf16.mxu0 %v3444_v12  ;;  %3064 = vmatprep.mubr.msk.bf16.mxu1 %vm3445_vm2, %v3444_v12 }
 0xe4a   :  { %3059 = vmatmul.mubr.msk.bf16.vlgmr.msra.gmra.mxu0 %vm234_vm3, %v1767_v53 }
 0xe4b   :  { %3070 = vmatprep.mubr.msk.bf16.mxu0 %vm3445_vm2, %v3444_v12 }
 0xefa   :  { %v3869_v41 = vpop.f32.mrf.mxu1 }
 0xefc   :  { %v3042_v42 = vpop.f32.mrf.mxu1 }
 0xefe   :  { %v3871_v0 = vpop.f32.mrf.mxu1 }
 0xf00   :  { %v3043_v62 = vpop.f32.mrf.mxu1 }
 0xf02   :  { %v3873_v44 = vpop.f32.mrf.mxu0  ;;  %v1759_v46 = vpop.f32.mrf.mxu1 }
 0xf03   :  { %v1760_v48 = vadd.f32 %v3549_v24, %v1759_v46 }
 0xf04   :  { %v3048_v6 = vpop.f32.mrf.mxu0  ;;  %v3054_v49 = vpop.f32.mrf.mxu1 }
 0xf05   :  { %v1817_v50 = vsel %vm126_vm4, %v1760_v48, -inf }
 0xf06   :  { %1818 = vmax.xlane.f32.xlu0 %v1817_v50  ;;  %v3877_v51 = vpop.f32.mrf.mxu0  ;;  %v1762_v52 = vpop.f32.mrf.mxu1 }
 0xf07   :  { %v1763_v54 = vadd.f32 %v3552_v27, %v1762_v52 }
 0xf08   :  { %v3049_v55 = vpop.f32.mrf.mxu0  ;;  %v3055_v56 = vpop.f32.mrf.mxu1 }
 0xf09   :  { %v1820_v57 = vsel %vm126_vm4, %v1763_v54, -inf }
 0xf0a   :  { %1821 = vmax.xlane.f32.xlu1 %v1820_v57  ;;  %v1810_v58 = vpop.f32.mrf.mxu0 }
 0xf0b   :  { %v1811_v17 = vadd.f32 %v3556_v33, %v1810_v58 }
 0xf0c   :  { %v3060_v59 = vpop.f32.mrf.mxu0 }
 0xf0d   :  { %v1823_v18 = vsel %vm126_vm4, %v1811_v17, -inf }
 0xf0e   :  { %1824 = vmax.xlane.f32.xlu0 %v1823_v18  ;;  %v1813_v61 = vpop.f32.mrf.mxu0 }
 0xf0f   :  { %v1814_v63 = vadd.f32 %v3560_v38, %v1813_v61 }
 0xf10   :  { %v3061_v1 = vpop.f32.mrf.mxu0 }
 0xf11   :  { %v1826_v2 = vsel %vm126_vm4, %v1814_v63, -inf }
 0xf12   :  { %1827 = vmax.xlane.f32.xlu0 %v1826_v2 }
 0xf1b   :  { %1863 = vrot.lane.b32.xlu1 %v3809_v43, %s3449_s25 }
 0xf8f   :  { %v1819_v3 = vpop.xlane.xlu0 %1818 }
 0xf90   :  { %v1829_v4 = vsub.f32 %v1760_v48, %v1819_v3 }
 0xf92   :  { %v1833_v5 = vmul.f32 1.442695, %v1829_v4 }
 0xf93   :  { %v1822_v7 = vpop.xlane.xlu1 %1821 }
 0xf94   :  { %3259 = vpow2.f32 %v1833_v5  ;;  %v1830_v8 = vsub.f32 %v1763_v54, %v1822_v7 }
 0xf96   :  { %v1835_v9 = vmul.f32 1.442695, %v1830_v8 }
 0xf97   :  { %v1864_v10 = vpop.permute.xlu1 %1863  ;;  %v1825_v11 = vpop.xlane.xlu0 %1824 }
 0xf98   :  { %3261 = vpow2.f32 %v1835_v9  ;;  %v1831_v13 = vsub.f32 %v1811_v17, %v1825_v11  ;;  %3063 = vmatpush3.bf16.msra.mxu1 %v1864_v10 }
 0xf99   :  { %3074 = vmatprep.subr.bf16.mxu1 %v3444_v12 }
 0xf9a   :  { %v1837_v15 = vmul.f32 1.442695, %v1831_v13 }
 0xf9b   :  { %v1828_v16 = vpop.xlane.xlu0 %1827 }
 0xf9c   :  { %3263 = vpow2.f32 %v1837_v15  ;;  %v1832_v21 = vsub.f32 %v1814_v63, %v1828_v16 }
 0xf9e   :  { %v1839_v22 = vmul.f32 1.442695, %v1832_v21 }
 0xfa0   :  { %3265 = vpow2.f32 %v1839_v22 }
 0xfa1   :  { %v3260_v28 = vpop.eup %3259 }
 0xfa2   :  { %v1841_v23 = vsel %vm126_vm4, %v3260_v28, 0.0 }
 0xfa3   :  { %1842 = vadd.xlane.f32.xlu1 %v1841_v23 }
 0xfa5   :  { %v3262_v26 = vpop.eup %3261 }
 0xfa6   :  { %v1844_v32 = vsel %vm126_vm4, %v3262_v26, 0.0 }
 0xfa7   :  { %1845 = vadd.xlane.f32.xlu0 %v1844_v32 }
 0xfa9   :  { %v3264_v29 = vpop.eup %3263 }
 0xfaa   :  { %v1847_v31 = vsel %vm126_vm4, %v3264_v29, 0.0 }
 0xfab   :  { %1848 = vadd.xlane.f32.xlu1 %v1847_v31 }
 0xfad   :  { %v3266_v34 = vpop.eup %3265 }
 0xfae   :  { %v1850_v35 = vsel %vm126_vm4, %v3266_v34, 0.0 }
 0xfaf   :  { %1851 = vadd.xlane.f32.xlu0 %v1850_v35 }
 0xfbc   :  { %1992 = vrot.lane.b32.xlu1 %v3809_v43, %s3450_s26 }
 0xfc0   :  { %2043 = vrot.lane.b32.xlu1 %v3807_v30, %s3450_s26 }
 0xfc4   :  { %2041 = vrot.lane.b32.xlu1 %v3807_v30, %s3451_s27 }
 0xfc5   :  { %1910 = vrot.lane.b32.xlu0 %v3807_v30, %s3449_s25 }
 0xfc9   :  { %1990 = vrot.lane.b32.xlu0 %v3809_v43, %s3451_s27 }
0x102c   :  { %v1843_v36 = vpop.xlane.xlu1 %1842 }
0x102d   :  { %3267 = vrcp.f32 %v1843_v36 }
0x1030   :  { %v1846_v40 = vpop.xlane.xlu0 %1845 }
0x1031   :  { %3269 = vrcp.f32 %v1846_v40 }
0x1034   :  { %v1849_v47 = vpop.xlane.xlu1 %1848 }
0x1035   :  { %3271 = vrcp.f32 %v1849_v47 }
0x1038   :  { %v1852_v37 = vpop.xlane.xlu0 %1851  ;;  %v1993_v62 = vpop.permute.xlu1 %1992 }
0x1039   :  { %3273 = vrcp.f32 %v1852_v37  ;;  %v1998_v48 = vsel %vm234_vm3, %v1993_v62, 0 }
0x103a   :  { %v3268_v45 = vpop.eup %3267 }
0x103b   :  { %v1857_v53 = vmul.f32 %v3268_v45, %v3260_v28 }
0x103c   :  { %v1911_v39 = vpop.permute.xlu0 %1910  ;;  %v2044_v54 = vpop.permute.xlu1 %2043 }
0x103d   :  { %3069 = vmatpush3.bf16.msra.mxu0 %v1911_v39  ;;  %v2049_v57 = vsel %vm234_vm3, %v2044_v54, 0 }
0x103e   :  { %v3270_v60 = vpop.eup %3269  ;;  %3080 = vmatprep.subr.bf16.mxu0 %v3444_v12 }
0x103f   :  { %v1858_v42 = vmul.f32 %v3270_v60, %v3262_v26 }
0x1040   :  { %v1991_v56 = vpop.permute.xlu0 %1990  ;;  %v2042_v58 = vpop.permute.xlu1 %2041 }
0x1041   :  { %v1861_v46 = vpack.c.bf16 %v1858_v42, %v1857_v53 }
0x1042   :  { %v3272_v6 = vpop.eup %3271 }
0x1043   :  { %3065 = vmatmul.mubr.msk.bf16.vlgmr.msra.gmra.mxu1 %vm126_vm4, %v1861_v46  ;;  %v1859_v50 = vmul.f32 %v3272_v6, %v3264_v29 }
0x1044   :  { %3075 = vmatpush3.bf16.xpose.msra.mxu1 %v1998_v48  ;;  %3076 = vmatprep.mubr.msk.bf16.mxu1 %vm3445_vm2, %v3444_v12 }
0x1045   :  { %3086 = vmatprep.subr.bf16.mxu1 %v3444_v12 }
0x1046   :  { %v3274_v49 = vpop.eup %3273 }
0x1047   :  { %v1860_v52 = vmul.f32 %v3274_v49, %v3266_v34 }
0x1049   :  { %v1862_v55 = vpack.c.bf16 %v1860_v52, %v1859_v50 }
0x104b   :  { %3071 = vmatmul.mubr.msk.bf16.vlgmr.msra.gmra.mxu0 %vm126_vm4, %v1862_v55  ;;  %3077 = vmatmul.mubr.msk.bf16.vlgmr.msra.gmra.mxu1 %vm234_vm3, %v1991_v56 }
0x104c   :  { %3081 = vmatpush3.bf16.xpose.msra.mxu0 %v2049_v57  ;;  %3082 = vmatprep.mubr.msk.bf16.mxu0 %vm3445_vm2, %v3444_v12 }
0x104d   :  { %3092 = vmatprep.subr.bf16.mxu0 %v3444_v12  ;;  %3088 = vmatprep.mubr.msk.bf16.mxu1 %vm3445_vm2, %v3444_v12 }
0x1053   :  { %3083 = vmatmul.mubr.msk.bf16.vlgmr.msra.gmra.mxu0 %vm234_vm3, %v2042_v58 }
0x1054   :  { %3094 = vmatprep.mubr.msk.bf16.mxu0 %vm3445_vm2, %v3444_v12 }
0x1103   :  { %v3919_v17 = vpop.f32.mrf.mxu1 }
0x1105   :  { %v3066_v59 = vpop.f32.mrf.mxu1 }
0x1107   :  { %v3921_v18 = vpop.f32.mrf.mxu1 }
0x1109   :  { %v3067_v61 = vpop.f32.mrf.mxu1 }
0x110b   :  { %v3923_v63 = vpop.f32.mrf.mxu0  ;;  %v2034_v1 = vpop.f32.mrf.mxu1 }
0x110c   :  { %v2035_v2 = vadd.f32 %v3549_v24, %v2034_v1 }
0x110d   :  { %v3072_v3 = vpop.f32.mrf.mxu0  ;;  %v3078_v4 = vpop.f32.mrf.mxu1 }
0x110e   :  { %v2092_v5 = vsel %vm126_vm4, %v2035_v2, -inf }
0x110f   :  { %2093 = vmax.xlane.f32.xlu0 %v2092_v5  ;;  %v3927_v7 = vpop.f32.mrf.mxu0  ;;  %v2037_v8 = vpop.f32.mrf.mxu1 }
0x1110   :  { %v2038_v9 = vadd.f32 %v3552_v27, %v2037_v8 }
0x1111   :  { %v3073_v10 = vpop.f32.mrf.mxu0  ;;  %v3079_v11 = vpop.f32.mrf.mxu1 }
0x1112   :  { %v2095_v13 = vsel %vm126_vm4, %v2038_v9, -inf }
0x1113   :  { %2096 = vmax.xlane.f32.xlu1 %v2095_v13  ;;  %v2085_v15 = vpop.f32.mrf.mxu0 }
0x1114   :  { %v2086_v16 = vadd.f32 %v3556_v33, %v2085_v15 }
0x1115   :  { %v3084_v21 = vpop.f32.mrf.mxu0 }
0x1116   :  { %v2098_v22 = vsel %vm126_vm4, %v2086_v16, -inf }
0x1117   :  { %2099 = vmax.xlane.f32.xlu0 %v2098_v22  ;;  %v2088_v28 = vpop.f32.mrf.mxu0 }
0x1118   :  { %v2089_v23 = vadd.f32 %v3560_v38, %v2088_v28 }
0x1119   :  { %v3085_v26 = vpop.f32.mrf.mxu0 }
0x111a   :  { %v2101_v32 = vsel %vm126_vm4, %v2089_v23, -inf }
0x111b   :  { %2102 = vmax.xlane.f32.xlu0 %v2101_v32 }
0x1124   :  { %2138 = vrot.lane.b32.xlu1 %v3809_v43, %s3452_s28 }
0x1198   :  { %v2094_v29 = vpop.xlane.xlu0 %2093 }
0x1199   :  { %v2104_v31 = vsub.f32 %v2035_v2, %v2094_v29 }
0x119b   :  { %v2108_v34 = vmul.f32 1.442695, %v2104_v31 }
0x119c   :  { %v2097_v35 = vpop.xlane.xlu1 %2096 }
0x119d   :  { %3275 = vpow2.f32 %v2108_v34  ;;  %v2105_v36 = vsub.f32 %v2038_v9, %v2097_v35 }
0x119f   :  { %v2110_v40 = vmul.f32 1.442695, %v2105_v36 }
0x11a0   :  { %v2139_v47 = vpop.permute.xlu1 %2138  ;;  %v2100_v37 = vpop.xlane.xlu0 %2099 }
0x11a1   :  { %3277 = vpow2.f32 %v2110_v40  ;;  %v2106_v45 = vsub.f32 %v2086_v16, %v2100_v37  ;;  %3087 = vmatpush3.bf16.msra.mxu1 %v2139_v47 }
0x11a2   :  { %3098 = vmatprep.subr.bf16.mxu1 %v3444_v12 }
0x11a3   :  { %v2112_v39 = vmul.f32 1.442695, %v2106_v45 }
0x11a4   :  { %v2103_v60 = vpop.xlane.xlu0 %2102 }
0x11a5   :  { %3279 = vpow2.f32 %v2112_v39  ;;  %v2107_v53 = vsub.f32 %v2089_v23, %v2103_v60 }
0x11a7   :  { %v2114_v42 = vmul.f32 1.442695, %v2107_v53 }
0x11a9   :  { %3281 = vpow2.f32 %v2114_v42 }
0x11aa   :  { %v3276_v62 = vpop.eup %3275 }
0x11ab   :  { %v2116_v46 = vsel %vm126_vm4, %v3276_v62, 0.0 }
0x11ac   :  { %2117 = vadd.xlane.f32.xlu1 %v2116_v46 }
0x11ae   :  { %v3278_v48 = vpop.eup %3277 }
0x11af   :  { %v2119_v6 = vsel %vm126_vm4, %v3278_v48, 0.0 }
0x11b0   :  { %2120 = vadd.xlane.f32.xlu0 %v2119_v6 }
0x11b2   :  { %v3280_v49 = vpop.eup %3279 }
0x11b3   :  { %v2122_v50 = vsel %vm126_vm4, %v3280_v49, 0.0 }
0x11b4   :  { %2123 = vadd.xlane.f32.xlu1 %v2122_v50 }
0x11b6   :  { %v3282_v52 = vpop.eup %3281 }
0x11b7   :  { %v2125_v54 = vsel %vm126_vm4, %v3282_v52, 0.0 }
0x11b8   :  { %2126 = vadd.xlane.f32.xlu0 %v2125_v54 }
0x11c5   :  { %2267 = vrot.lane.b32.xlu1 %v3809_v43, %s3453_s29 }
0x11c9   :  { %2318 = vrot.lane.b32.xlu1 %v3807_v30, %s3453_s29 }
0x11cd   :  { %2316 = vrot.lane.b32.xlu1 %v3807_v30, %s3454_s30 }
0x11ce   :  { %2185 = vrot.lane.b32.xlu0 %v3807_v30, %s3452_s28 }
0x11d2   :  { %2265 = vrot.lane.b32.xlu0 %v3809_v43, %s3454_s30 }
0x1235   :  { %v2118_v55 = vpop.xlane.xlu1 %2117 }
0x1236   :  { %3283 = vrcp.f32 %v2118_v55 }
0x1239   :  { %v2121_v56 = vpop.xlane.xlu0 %2120 }
0x123a   :  { %3285 = vrcp.f32 %v2121_v56 }
0x123d   :  { %v2124_v57 = vpop.xlane.xlu1 %2123 }
0x123e   :  { %3287 = vrcp.f32 %v2124_v57 }
0x1241   :  { %v2127_v58 = vpop.xlane.xlu0 %2126  ;;  %v2268_v4 = vpop.permute.xlu1 %2267 }
0x1242   :  { %3289 = vrcp.f32 %v2127_v58  ;;  %v2273_v8 = vsel %vm234_vm3, %v2268_v4, 0 }
0x1243   :  { %v3284_v59 = vpop.eup %3283 }
0x1244   :  { %v2132_v2 = vmul.f32 %v3284_v59, %v3276_v62 }
0x1245   :  { %v2186_v61 = vpop.permute.xlu0 %2185  ;;  %v2319_v15 = vpop.permute.xlu1 %2318 }
0x1246   :  { %3093 = vmatpush3.bf16.msra.mxu0 %v2186_v61  ;;  %v2324_v22 = vsel %vm234_vm3, %v2319_v15, 0 }
0x1247   :  { %v3286_v1 = vpop.eup %3285  ;;  %3104 = vmatprep.subr.bf16.mxu0 %v3444_v12 }
0x1248   :  { %v2133_v3 = vmul.f32 %v3286_v1, %v3278_v48 }
0x1249   :  { %v2266_v21 = vpop.permute.xlu0 %2265  ;;  %v2317_v28 = vpop.permute.xlu1 %2316 }
0x124a   :  { %v2136_v5 = vpack.c.bf16 %v2133_v3, %v2132_v2 }
0x124b   :  { %v3288_v9 = vpop.eup %3287 }
0x124c   :  { %3089 = vmatmul.mubr.msk.bf16.vlgmr.msra.gmra.mxu1 %vm126_vm4, %v2136_v5  ;;  %v2134_v11 = vmul.f32 %v3288_v9, %v3280_v49 }
0x124d   :  { %3099 = vmatpush3.bf16.xpose.msra.mxu1 %v2273_v8  ;;  %3100 = vmatprep.mubr.msk.bf16.mxu1 %vm3445_vm2, %v3444_v12 }
0x124e   :  { %3110 = vmatprep.subr.bf16.mxu1 %v3444_v12 }
0x124f   :  { %v3290_v10 = vpop.eup %3289 }
0x1250   :  { %v2135_v13 = vmul.f32 %v3290_v10, %v3282_v52 }
0x1252   :  { %v2137_v16 = vpack.c.bf16 %v2135_v13, %v2134_v11  ;;  %v1682_v13 = vsel %vm139_vm5, %v3869_v41, 0.0 }
0x1253   :  { %v2803_v15 = vpack.c.bf16 %v1682_v13, %v1682_v13  ;;  %v3175_v13 = vld [vmem:[#allocation11 + $0x8] sm:$0xff]  }
0x1254   :  { %3095 = vmatmul.mubr.msk.bf16.vlgmr.msra.gmra.mxu0 %vm126_vm4, %v2137_v16  ;;  %3101 = vmatmul.mubr.msk.bf16.vlgmr.msra.gmra.mxu1 %vm234_vm3, %v2266_v21  ;;  %v1683_v16 = vsel %vm140_vm7, %v3871_v0, 0.0  ;;  %v1958_v0 = vsel %vm140_vm7, %v3921_v18, 0.0 }
0x1255   :  { %3105 = vmatpush3.bf16.xpose.msra.mxu0 %v2324_v22  ;;  %3106 = vmatprep.mubr.msk.bf16.mxu0 %vm3445_vm2, %v3444_v12  ;;  %v2804_v21 = vpack.c.bf16 %v1683_v16, %v1683_v16  ;;  %v1685_v22 = vsel %vm142_vm8, %v3877_v51, 0.0  ;;  %v3177_v16 = vld [vmem:[#allocation11] sm:$0xff]  }
0x1256   :  { %3116 = vmatprep.subr.bf16.mxu0 %v3444_v12  ;;  %3112 = vmatprep.mubr.msk.bf16.mxu1 %vm3445_vm2, %v3444_v12 }
0x125c   :  { %3107 = vmatmul.mubr.msk.bf16.vlgmr.msra.gmra.mxu0 %vm234_vm3, %v2317_v28  ;;  %v1684_v28 = vsel %vm141_vm6, %v3873_v44, 0.0  ;;  %v2808_v44 = vpack.c.bf16 %v1958_v0, %v1958_v0 }
0x125d   :  { %3118 = vmatprep.mubr.msk.bf16.mxu0 %vm3445_vm2, %v3444_v12  ;;  %v2805_v41 = vpack.c.bf16 %v1684_v28, %v1684_v28  ;;  %vm2608_vm2 = vcmask 785408  }
0x130c   :  { %v3969_v23 = vpop.f32.mrf.mxu1 }
0x130e   :  { %v3090_v26 = vpop.f32.mrf.mxu1 }
0x130f   :  { %v1957_v26 = vsel %vm139_vm5, %v3919_v17, 0.0 }
0x1310   :  { %v3971_v32 = vpop.f32.mrf.mxu1  ;;  %v2807_v51 = vpack.c.bf16 %v1957_v26, %v1957_v26 }
0x1312   :  { %v3091_v29 = vpop.f32.mrf.mxu1 }
0x1313   :  { %v1959_v29 = vsel %vm141_vm6, %v3923_v63, 0.0 }
0x1314   :  { %v3973_v31 = vpop.f32.mrf.mxu0  ;;  %v2309_v34 = vpop.f32.mrf.mxu1  ;;  %v2809_v17 = vpack.c.bf16 %v1959_v29, %v1959_v29 }
0x1315   :  { %v2310_v35 = vadd.f32 %v3549_v24, %v2309_v34  ;;  %v2233_v34 = vsel %vm140_vm7, %v3971_v32, 0.0 }
0x1316   :  { %v3096_v36 = vpop.f32.mrf.mxu0  ;;  %v3102_v40 = vpop.f32.mrf.mxu1 }
0x1317   :  { %v2367_v47 = vsel %vm126_vm4, %v2310_v35, -inf  ;;  %v2234_v40 = vsel %vm141_vm6, %v3973_v31, 0.0 }
0x1318   :  { %2368 = vmax.xlane.f32.xlu0 %v2367_v47  ;;  %v3977_v37 = vpop.f32.mrf.mxu0  ;;  %v2312_v45 = vpop.f32.mrf.mxu1 }
0x1319   :  { %v2313_v12 = vadd.f32 %v3552_v27, %v2312_v45  ;;  %v2235_v36 = vsel %vm142_vm8, %v3977_v37, 0.0 }
0x131a   :  { %v3097_v39 = vpop.f32.mrf.mxu0  ;;  %v3103_v60 = vpop.f32.mrf.mxu1  ;;  %v2814_v32 = vpack.c.bf16 %v2235_v36, %v2235_v36 }
0x131b   :  { %v2370_v53 = vsel %vm126_vm4, %v2313_v12, -inf }
0x131c   :  { %2371 = vmax.xlane.f32.xlu1 %v2370_v53  ;;  %v2360_v42 = vpop.f32.mrf.mxu0 }
0x131d   :  { %v2361_v62 = vadd.f32 %v3556_v33, %v2360_v42 }
0x131e   :  { %v3108_v46 = vpop.f32.mrf.mxu0 }
0x131f   :  { %v2373_v24 = vsel %vm126_vm4, %v2361_v62, -inf }
0x1320   :  { %2374 = vmax.xlane.f32.xlu0 %v2373_v24  ;;  %v2363_v48 = vpop.f32.mrf.mxu0 }
0x1321   :  { %v2364_v6 = vadd.f32 %v3560_v38, %v2363_v48 }
0x1322   :  { %v3109_v49 = vpop.f32.mrf.mxu0 }
0x1323   :  { %v2376_v50 = vsel %vm126_vm4, %v2364_v6, -inf }
0x1324   :  { %2377 = vmax.xlane.f32.xlu0 %v2376_v50 }
0x13a1   :  { %v2369_v27 = vpop.xlane.xlu0 %2368 }
0x13a2   :  { %v2379_v52 = vsub.f32 %v2310_v35, %v2369_v27  ;;  %v2232_v35 = vsel %vm139_vm5, %v3969_v23, 0.0  ;;  %v2813_v23 = vpack.c.bf16 %v2234_v40, %v2234_v40 }
0x13a3   :  { %v2811_v63 = vpack.c.bf16 %v2232_v35, %v2232_v35  ;;  %v2559_v35 = vshrl.u32 %v2558_v25, 7 }
0x13a4   :  { %v2383_v54 = vmul.f32 1.442695, %v2379_v52 }
0x13a5   :  { %v2372_v55 = vpop.xlane.xlu1 %2371  ;;  %v2560_v36 = vsub.s32 0, %v2559_v35 }
0x13a6   :  { %3291 = vpow2.f32 %v2383_v54  ;;  %v2380_v56 = vsub.f32 %v2313_v12, %v2372_v55 }
0x13a8   :  { %v2385_v57 = vmul.f32 1.442695, %v2380_v56 }
0x13a9   :  { %v2375_v58 = vpop.xlane.xlu0 %2374 }
0x13aa   :  { %3293 = vpow2.f32 %v2385_v57  ;;  %v2381_v33 = vsub.f32 %v2361_v62, %v2375_v58 }
0x13ac   :  { %v2387_v59 = vmul.f32 1.442695, %v2381_v33 }
0x13ad   :  { %v2378_v61 = vpop.xlane.xlu0 %2377 }
0x13ae   :  { %3295 = vpow2.f32 %v2387_v59  ;;  %v2382_v1 = vsub.f32 %v2364_v6, %v2378_v61 }
0x13b0   :  { %v2389_v2 = vmul.f32 1.442695, %v2382_v1 }
0x13b2   :  { %3297 = vpow2.f32 %v2389_v2 }
0x13b3   :  { %v3985_v38 = vpop.eup %3291 }
0x13b4   :  { %v2391_v3 = vsel %vm126_vm4, %v3985_v38, 0.0 }
0x13b5   :  { %2392 = vadd.xlane.f32.xlu1 %v2391_v3  ;;  %v3172_v3 = vld [vmem:[#allocation11 + $0x20] sm:$0xff]  }
0x13b7   :  { %v3989_v4 = vpop.eup %3293 }
0x13b8   :  { %v2394_v5 = vsel %vm126_vm4, %v3989_v4, 0.0 }
0x13b9   :  { %2395 = vadd.xlane.f32.xlu0 %v2394_v5  ;;  %v3174_v5 = vld [vmem:[#allocation11 + $0x10] sm:$0xff]  }
0x13bb   :  { %v3993_v8 = vpop.eup %3295 }
0x13bc   :  { %v2397_v9 = vsel %vm126_vm4, %v3993_v8, 0.0 }
0x13bd   :  { %2398 = vadd.xlane.f32.xlu1 %v2397_v9 }
0x13bf   :  { %v3997_v10 = vpop.eup %3297 }
0x13c0   :  { %v2400_v11 = vsel %vm126_vm4, %v3997_v10, 0.0 }
0x13c1   :  { %2401 = vadd.xlane.f32.xlu0 %v2400_v11 }
0x13ce   :  { %2413 = vrot.lane.b32.xlu1 %v3809_v43, %s3455_s7  ;;  %v2806_v43 = vpack.c.bf16 %v1685_v22, %v1685_v22 }
0x13d2   :  { %1698 = vrot.lane.b32.xlu1 %v2803_v15, %s3436_s24 }
0x13d6   :  { %1700 = vrot.lane.b32.xlu1 %v2804_v21, %s3436_s24 }
0x13d7   :  { %2460 = vrot.lane.b32.xlu0 %v3807_v30, %s3455_s7  ;;  %v1960_v30 = vsel %vm142_vm8, %v3927_v7, 0.0  ;;  %v2812_v7 = vpack.c.bf16 %v2233_v34, %v2233_v34 }
0x13d8   :  { %v2810_v18 = vpack.c.bf16 %v1960_v30, %v1960_v30 }
0x13da   :  { %1704 = vrot.lane.b32.xlu1 %v2806_v43, %s3436_s24 }
0x13db   :  { %1702 = vrot.lane.b32.xlu0 %v2805_v41, %s3436_s24 }
0x13de   :  { %1975 = vrot.lane.b32.xlu1 %v2808_v44, %s3453_s29 }
0x13df   :  { %1973 = vrot.lane.b32.xlu0 %v2807_v51, %s3453_s29 }
0x13e2   :  { %1979 = vrot.lane.b32.xlu1 %v2810_v18, %s3453_s29 }
0x13e3   :  { %1977 = vrot.lane.b32.xlu0 %v2809_v17, %s3453_s29 }
0x13e6   :  { %2250 = vrot.lane.b32.xlu1 %v2812_v7, %s3450_s26  ;;  %v2556_v7 = vld [vmem:[%s4093_s5] sm:$0x1]  ;;  %s3407_s5 = scalar_lea.vmem %s2678_s1, 512 }
0x13e7   :  { %2248 = vrot.lane.b32.xlu0 %v2811_v63, %s3450_s26  ;;  %v2557_v63 = vunpack.c.l.bf16 %v2556_v7  ;;  %p3408_p11 = scmp.ne.s32.totalorder %s2678_s1, %s3407_s5  ;;  %p3413_p13 = scmp.lt.s32.totalorder %s3407_s5, %s3407_s5 }
0x13e9   :  { %v2561_v40 = vrot.slane %v2557_v63, %v2560_v36  ;;  %p3414_p0 = por %p3413_p13, %p3412_p12 }
0x13ea   :  { %2254 = vrot.lane.b32.xlu1 %v2814_v32, %s3450_s26 }
0x13eb   :  { %2252 = vrot.lane.b32.xlu0 %v2813_v23, %s3450_s26  ;;  %p3415_p1 = pnand %p3414_p0, %p3408_p11 }
0x143e   :  { %v2393_v47 = vpop.xlane.xlu1 %2392 }
0x143f   :  { %3299 = vrcp.f32 %v2393_v47 }
0x1442   :  { %v2396_v45 = vpop.xlane.xlu0 %2395 }
0x1443   :  { %3301 = vrcp.f32 %v2396_v45 }
0x1446   :  { %v2399_v12 = vpop.xlane.xlu1 %2398 }
0x1447   :  { %3303 = vrcp.f32 %v2399_v12 }
0x144a   :  { %v2414_v37 = vpop.permute.xlu1 %2413  ;;  %v2402_v39 = vpop.xlane.xlu0 %2401 }
0x144b   :  { %3305 = vrcp.f32 %v2402_v39  ;;  %3111 = vmatpush3.bf16.msra.mxu1 %v2414_v37 }
0x144c   :  { %v3300_v31 = vpop.eup %3299 }
0x144d   :  { %v2407_v62 = vmul.f32 %v3300_v31, %v3985_v38  ;;  %v3171_v38 = vld [vmem:[#allocation11 + $0x28] sm:$0xff]  }
0x144e   :  { %v1699_v60 = vpop.permute.xlu1 %1698  ;;  %v2461_v53 = vpop.permute.xlu0 %2460  ;;  %3122 = vmatprep.subr.bf16.mxu1 %v3171_v38 }
0x144f   :  { %1711 = vst.msk [vmem:[#allocation2] sm:$0xf] %vm1710_vm14, %v1699_v60  ;;  %3117 = vmatpush3.bf16.msra.mxu0 %v2461_v53 }
0x1450   :  { %v3302_v42 = vpop.eup %3301 }
0x1451   :  { %v2408_v46 = vmul.f32 %v3302_v42, %v3989_v4  ;;  %v3173_v4 = vld [vmem:[#allocation11 + $0x18] sm:$0xff]  }
0x1452   :  { %v1701_v24 = vpop.permute.xlu1 %1700  ;;  %v1703_v48 = vpop.permute.xlu0 %1702 }
0x1453   :  { %1712 = vst.msk [vmem:[#allocation2 + $0x4] sm:$0xf] %vm1710_vm14, %v1701_v24  ;;  %1713 = vst.msk [vmem:[#allocation2 + $0x8] sm:$0xf] %vm1710_vm14, %v1703_v48  ;;  %v2411_v6 = vpack.c.bf16 %v2408_v46, %v2407_v62 }
0x1454   :  { %v3304_v49 = vpop.eup %3303 }
0x1455   :  { %3113 = vmatmul.mubr.msk.bf16.vlgmr.msra.gmra.mxu1 %vm126_vm4, %v2411_v6  ;;  %v2409_v54 = vmul.f32 %v3304_v49, %v3993_v8 }
0x1456   :  { %v1705_v50 = vpop.permute.xlu1 %1704  ;;  %v1974_v27 = vpop.permute.xlu0 %1973  ;;  %3123 = vmatpush3.bf16.msra.mxu1 %v3171_v38 }
0x1457   :  { %1714 = vst.msk [vmem:[#allocation2 + $0xc] sm:$0xf] %vm1710_vm14, %v1705_v50  ;;  %3124 = vmatprep.subr.bf16.mxu1 %v3172_v3 }
0x1458   :  { %1986 = vst.msk [vmem:[#allocation2] sm:$0xf] %vm1985_vm15, %v1974_v27  ;;  %v3306_v52 = vpop.eup %3305 }
0x1459   :  { %v2410_v55 = vmul.f32 %v3306_v52, %v3997_v10 }
0x145a   :  { %v1976_v56 = vpop.permute.xlu1 %1975  ;;  %v1978_v57 = vpop.permute.xlu0 %1977  ;;  %3125 = vmatpush3.bf16.msra.mxu1 %v3172_v3 }
0x145b   :  { %1987 = vst.msk [vmem:[#allocation2 + $0x4] sm:$0xf] %vm1985_vm15, %v1976_v56  ;;  %1988 = vst.msk [vmem:[#allocation2 + $0x8] sm:$0xf] %vm1985_vm15, %v1978_v57  ;;  %v2412_v58 = vpack.c.bf16 %v2410_v55, %v2409_v54  ;;  %3126 = vmatprep.subr.bf16.mxu1 %v3173_v4 }
0x145d   :  { %3119 = vmatmul.mubr.msk.bf16.vlgmr.msra.gmra.mxu0 %vm126_vm4, %v2412_v58 }
0x145e   :  { %v1980_v33 = vpop.permute.xlu1 %1979  ;;  %v2249_v59 = vpop.permute.xlu0 %2248  ;;  %3127 = vmatpush3.bf16.msra.mxu1 %v3173_v4 }
0x145f   :  { %1989 = vst.msk [vmem:[#allocation2 + $0xc] sm:$0xf] %vm1985_vm15, %v1980_v33  ;;  %3128 = vmatprep.subr.bf16.mxu1 %v3174_v5 }
0x1460   :  { %2261 = vst.msk [vmem:[#allocation2] sm:$0xf] %vm2260_vm0, %v2249_v59 }
0x1462   :  { %v2251_v61 = vpop.permute.xlu1 %2250  ;;  %v2253_v1 = vpop.permute.xlu0 %2252  ;;  %3129 = vmatpush3.bf16.msra.mxu1 %v3174_v5 }
0x1463   :  { %2262 = vst.msk [vmem:[#allocation2 + $0x4] sm:$0xf] %vm2260_vm0, %v2251_v61  ;;  %2263 = vst.msk [vmem:[#allocation2 + $0x8] sm:$0xf] %vm2260_vm0, %v2253_v1  ;;  %3130 = vmatprep.subr.bf16.mxu1 %v3175_v13 }
0x1466   :  { %v2255_v2 = vpop.permute.xlu1 %2254  ;;  %3131 = vmatpush3.bf16.msra.mxu1 %v3175_v13 }
0x1467   :  { %2264 = vst.msk [vmem:[#allocation2 + $0xc] sm:$0xf] %vm2260_vm0, %v2255_v2  ;;  %3132 = vmatprep.subr.bf16.mxu1 %v3177_v16 }
0x146a   :  { %3133 = vmatpush3.bf16.msra.mxu1 %v3177_v16 }
0x1515   :  { %v2453_v8 = vpop.f32.mrf.mxu1 }
0x1516   :  { %v2507_v9 = vsel %vm139_vm5, %v2453_v8, 0.0 }
0x1517   :  { %v2815_v10 = vpack.c.bf16 %v2507_v9, %v2507_v9  ;;  %v3114_v11 = vpop.f32.mrf.mxu1 }
0x1519   :  { %2523 = vrot.lane.b32.xlu0 %v2815_v10, %s3447_s4  ;;  %v2456_v15 = vpop.f32.mrf.mxu1 }
0x151a   :  { %v2508_v21 = vsel %vm140_vm7, %v2456_v15, 0.0 }
0x151b   :  { %v2816_v22 = vpack.c.bf16 %v2508_v21, %v2508_v21  ;;  %v3115_v28 = vpop.f32.mrf.mxu1 }
0x151d   :  { %2525 = vrot.lane.b32.xlu1 %v2816_v22, %s3447_s4  ;;  %v2500_v14 = vpop.f32.mrf.mxu0 }
0x151e   :  { %v2509_v43 = vsel %vm141_vm6, %v2500_v14, 0.0 }
0x151f   :  { %v2817_v41 = vpack.c.bf16 %v2509_v43, %v2509_v43  ;;  %v3120_v0 = vpop.f32.mrf.mxu0 }
0x1521   :  { %2527 = vrot.lane.b32.xlu0 %v2817_v41, %s3447_s4  ;;  %v2503_v26 = vpop.f32.mrf.mxu0 }
0x1522   :  { %v2510_v20 = vsel %vm142_vm8, %v2503_v26, 0.0 }
0x1523   :  { %v2818_v44 = vpack.c.bf16 %v2510_v20, %v2510_v20  ;;  %v3121_v51 = vpop.f32.mrf.mxu0 }
0x1525   :  { %2529 = vrot.lane.b32.xlu1 %v2818_v44, %s3447_s4 }
0x158b   :  { %v2524_v30 = vpop.permute.xlu0 %2523 }
0x158c   :  { %2536 = vst.msk [vmem:[#allocation2] sm:$0xf] %vm2535_vm1, %v2524_v30 }
0x158f   :  { %v2526_v29 = vpop.permute.xlu1 %2525 }
0x1590   :  { %2537 = vst.msk [vmem:[#allocation2 + $0x4] sm:$0xf] %vm2535_vm1, %v2526_v29 }
0x1593   :  { %v2528_v19 = vpop.permute.xlu0 %2527 }
0x1594   :  { %2538 = vst.msk [vmem:[#allocation2 + $0x8] sm:$0xf] %vm2535_vm1, %v2528_v19 }
0x1597   :  { %v2530_v18 = vpop.permute.xlu1 %2529  ;;  %v3176_v17 = vld [vmem:[#allocation2] sm:$0xff]  }
0x1598   :  { %2539 = vst.msk [vmem:[#allocation2 + $0xc] sm:$0xf] %vm2535_vm1, %v2530_v18  ;;  %3134 = vmatprep.mubr.msk.bf16.mxu1 %vm2608_vm2, %v3176_v17 }
0x159f   :  { %v3178_v34 = vld [vmem:[#allocation2 + $0x8] sm:$0xff]  }
0x15a0   :  { %3135 = vmatmul.mubr.msk.bf16.vlgmr.msra.gmra.mxu1 %vm2608_vm2, %v3178_v34 }
0x1660   :  { %v3136_v32 = vpop.f32.mrf.mxu1 }
0x1661   :  { %v2658_v23 = vadd.f32 %v3136_v32, %v2561_v40 }
0x1662   :  { %v2649_v47 = vpop.f32.mrf.mxu1 }
0x1663   :  { %v2666_v45 = vmax.f32 %v2658_v23, 0.0  ;;  %v2650_v12 = vadd.f32 %v2649_v47, %v2561_v40 }
0x1664   :  { %v3137_v37 = vpop.f32.mrf.mxu1 }
0x1665   :  { %2670 = vst [vmem:[#allocation12 + $0x10] sm:$0xff] %v2666_v45  ;;  %v2664_v39 = vmax.f32 %v2650_v12, 0.0  ;;  %v2661_v31 = vadd.f32 %v3137_v37, %v2561_v40 }
0x1666   :  { %v2652_v60 = vpop.f32.mrf.mxu1 }
0x1667   :  { %2668 = vst [vmem:[#allocation12] sm:$0xff] %v2664_v39  ;;  %v2667_v53 = vmax.f32 %v2661_v31, 0.0  ;;  %v2653_v42 = vadd.f32 %v2652_v60, %v2561_v40 }
0x1669   :  { %2671 = vst [vmem:[#allocation12 + $0x18] sm:$0xff] %v2667_v53  ;;  %v2665_v62 = vmax.f32 %v2653_v42, 0.0 }
0x166b   :  { %2669 = vst [vmem:[#allocation12 + $0x8] sm:$0xff] %v2665_v62 }
0x166c   :  { %3418 = shalt.err (!%p3415_p1)
}
0x166d   :  { %2683 = dma.vmem_to_hbm [thread:$0]  %s2678_s1, 512, %s4094_s6, [#allocation5], %s3440_s11, %s3440_s11, %s3441_s12  }
0x166e   :  { %3433 = dma.done.wait [#allocation5], 512  }
0x166f   :  { %3434 = vsyncadd [#allocation5], 4294966784 }
0x1670   :  { %2687 = vsyncpa [#allocation4], 1 }
0x1671   :  { %2688 = vsyncpa [#allocation7], 1 }
0x1672   :  { %2689 = vsyncpa [#allocation10], 1 }
0x1673   :  { %2690 = vsyncpa [#allocation5], 1 }

// kernel: tpu_custom_call.1
= control target key start
LH: loop header
LB: loop body
LE: loop exit
PB: predicated region body
PF: predicated region fallthrough
CT: control target
= control target key end

     0   :  { %11 = vsyncpa [#allocation4], 0  ;;  %s4088_s0 = inlined_call_operand.hbm [shape: f32[2,16,32], index: 0, kind: input, shape index: {}]   ;;  %s4089_s1 = inlined_call_operand.hbm [shape: bf16[2,16,16], index: 1, kind: input, shape index: {}]   ;;  %s4090_s2 = inlined_call_operand.hbm [shape: bf16[32,96], index: 2, kind: input, shape index: {}]   ;;  %s4091_s3 = inlined_call_operand.hbm [shape: bf16[64,96], index: 3, kind: input, shape index: {}]   ;;  %s4092_s4 = inlined_call_operand.hbm [shape: bf16[96,128], index: 4, kind: input, shape index: {}]   ;;  %s4093_s5 = inlined_call_operand.vmem [shape: bf16[1,128], index: 5, kind: input, shape index: {}]   ;;  %s4094_s6 = inlined_call_operand.hbm [shape: f32[2,16,128], index: 6, kind: output, shape index: {}]  }
   0x1   :  { %12 = vsyncpa [#allocation7], 0 }
   0x2   :  { %13 = vsyncpa [#allocation10], 0 }
   0x3   :  { %14 = vsyncpa [#allocation5], 0  ;;  %s3435_s21 = smov [#allocation6]  }
   0x4   :  { %s32_s22 = sshll.u32 %s3435_s21, 4  ;;  %s33_s22 = int_to_ptr.vmem [resolvable:$true] %s32_s22 }
   0x5   :  { %s3315_s23 = scalar_lea.vmem %s33_s22, 256  ;;  %p3320_p1 = scmp.lt.s32.totalorder %s33_s22, %s33_s22 }
   0x6   :  { %p3316_p0 = scmp.ne.s32.totalorder %s33_s22, %s3315_s23  ;;  %p3321_p2 = scmp.lt.s32.totalorder %s3315_s23, %s3315_s23 }
   0x8   :  { %p3322_p3 = por %p3321_p2, %p3320_p1 }
   0xa   :  { %p3323_p4 = pnand %p3322_p3, %p3316_p0 }
   0xc   :  { %3326 = shalt.err (!%p3323_p4)
}
   0xd   :  { %s3436_s24 = smov 64   ;;  %s3437_s25 = smov 4  }
   0xe   :  { %38 = dma.hbm_to_vmem [thread:$0]  %s4089_s1, 256, %s33_s22, [#allocation7], %s3436_s24, %s3436_s24, %s3437_s25  }
   0xf   :  { %s3438_s28 = smov [#allocation9]   ;;  %s3439_s30 = smov [#allocation3]  }
  0x10   :  { %s56_s29 = sshll.u32 %s3438_s28, 4  ;;  %s20_s7 = sshll.u32 %s3439_s30, 4  ;;  %s57_s29 = int_to_ptr.vmem [resolvable:$true] %s56_s29  ;;  %s21_s7 = int_to_ptr.vmem [resolvable:$true] %s20_s7 }
  0x11   :  { %s3335_s8 = scalar_lea.vmem %s57_s29, 512  ;;  %p3340_p6 = scmp.lt.s32.totalorder %s57_s29, %s57_s29 }
  0x12   :  { %p3336_p5 = scmp.ne.s32.totalorder %s57_s29, %s3335_s8  ;;  %p3341_p7 = scmp.lt.s32.totalorder %s3335_s8, %s3335_s8 }
  0x14   :  { %p3342_p8 = por %p3341_p7, %p3340_p6 }
  0x16   :  { %p3343_p9 = pnand %p3342_p8, %p3336_p5 }
  0x18   :  { %3346 = shalt.err (!%p3343_p9)
}
  0x19   :  { %62 = dma.hbm_to_vmem [thread:$0]  %s4091_s3, 512, %s57_s29, [#allocation10], %s3436_s24, %s3436_s24, %s3437_s25  }
  0x1a   :  { %s3355_s1 = scalar_lea.vmem %s21_s7, 512  ;;  %p3360_p11 = scmp.lt.s32.totalorder %s21_s7, %s21_s7 }
  0x1b   :  { %p3356_p10 = scmp.ne.s32.totalorder %s21_s7, %s3355_s1  ;;  %p3361_p12 = scmp.lt.s32.totalorder %s3355_s1, %s3355_s1 }
  0x1d   :  { %p3362_p13 = por %p3361_p12, %p3360_p11 }
  0x1f   :  { %p3363_p0 = pnand %p3362_p13, %p3356_p10 }
  0x21   :  { %3366 = shalt.err (!%p3363_p0)
}
  0x22   :  { %s3440_s11 = smov 128   ;;  %s3441_s12 = smov 8  }
  0x23   :  { %26 = dma.hbm_to_vmem [thread:$0]  %s4088_s0, 512, %s21_s7, [#allocation4], %s3440_s11, %s3440_s11, %s3441_s12  }
  0x24   :  { %s3442_s15 = smov [#allocation8]   ;;  %s3443_s3 = smov [#allocation11]  }
  0x25   :  { %s44_s16 = sshll.u32 %s3442_s15, 4  ;;  %s68_s17 = sshll.u32 %s3443_s3, 4  ;;  %s45_s16 = int_to_ptr.vmem [resolvable:$true] %s44_s16  ;;  %s69_s17 = int_to_ptr.vmem [resolvable:$true] %s68_s17 }
  0x26   :  { %s3375_s18 = scalar_lea.vmem %s45_s16, 256  ;;  %p3380_p2 = scmp.lt.s32.totalorder %s45_s16, %s45_s16 }
  0x27   :  { %p3376_p1 = scmp.ne.s32.totalorder %s45_s16, %s3375_s18  ;;  %p3381_p3 = scmp.lt.s32.totalorder %s3375_s18, %s3375_s18 }
  0x29   :  { %p3382_p4 = por %p3381_p3, %p3380_p2 }
  0x2b   :  { %p3383_p5 = pnand %p3382_p4, %p3376_p1 }
  0x2d   :  { %3386 = shalt.err (!%p3383_p5)
}
  0x2e   :  { %50 = dma.hbm_to_vmem [thread:$0]  %s4090_s2, 256, %s45_s16, [#allocation7], %s3436_s24, %s3436_s24, %s3437_s25  }
  0x2f   :  { %s3395_s0 = scalar_lea.vmem %s69_s17, 768  ;;  %p3400_p7 = scmp.lt.s32.totalorder %s69_s17, %s69_s17 }
  0x30   :  { %p3396_p6 = scmp.ne.s32.totalorder %s69_s17, %s3395_s0  ;;  %p3401_p8 = scmp.lt.s32.totalorder %s3395_s0, %s3395_s0 }
  0x32   :  { %p3402_p9 = por %p3401_p8, %p3400_p7 }
  0x34   :  { %p3403_p10 = pnand %p3402_p9, %p3396_p6 }
  0x36   :  { %3406 = shalt.err (!%p3403_p10)
}
  0x37   :  { %74 = dma.hbm_to_vmem [thread:$0]  %s4092_s4, 768, %s69_s17, [#allocation10], %s3436_s24, %s3436_s24, %s3437_s25  }
  0x38   :  { %3427 = dma.done.wait [#allocation4], 512  }
  0x39   :  { %3428 = vsyncadd [#allocation4], 4294966784 }
  0x3a   :  { %3429 = dma.done.wait [#allocation7], 512  }
  0x3b   :  { %3430 = vsyncadd [#allocation7], 4294966784 }
  0x3c   :  { %3431 = dma.done.wait [#allocation10], 1280  }
  0x3d   :  { %3432 = vsyncadd [#allocation10], 4294966016  ;;  %v3161_v0 = vld [vmem:[#allocation8 + $0x8] sm:$0xff]   ;;  %v3162_v1 = vld [vmem:[#allocation8] sm:$0xff]   ;;  %vm113_vm0 = vcmask 257024   ;;  %vm173_vm1 = vcmask 261120  }
  0x3e   :  { %2910 = vmatprep.subr.bf16.mxu0 %v3161_v0  ;;  %v93_v2 = vld [vmem:[#allocation3] sm:$0xff]  ;;  %v94_v3 = vld [vmem:[#allocation3 + $0x8] sm:$0xff]  ;;  %v95_v4 = vld [vmem:[#allocation3 + $0x10] sm:$0xff]  ;;  %v3444_v12 = vmov 0.0   ;;  %vm3445_vm2 = vmmov 0   ;;  %s3446_s2 = smov 96  }
  0x3f   :  { %2911 = vmatpush3.bf16.msra.mxu0 %v3161_v0  ;;  %v2783_v5 = vpack.c.bf16 %v93_v2, %v93_v2  ;;  %v2784_v6 = vpack.c.bf16 %v94_v3, %v94_v3  ;;  %v96_v7 = vld [vmem:[#allocation3 + $0x18] sm:$0xff]  ;;  %v2785_v8 = vpack.c.bf16 %v95_v4, %v95_v4  ;;  %2930 = vmatprep.subr.bf16.mxu1 %v3444_v12  ;;  %vm234_vm3 = vcmask 64512   ;;  %v2820_v23 = vld [vmem:[#allocation6] sm:$0xff]   ;;  %v2827_v29 = vld [vmem:[#allocation6 + $0x8] sm:$0xff]   ;;  %s3447_s4 = smov 88   ;;  %s3448_s23 = smov 120  }
  0x40   :  { %2912 = vmatprep.subr.bf16.mxu0 %v3162_v1  ;;  %v2786_v9 = vpack.c.bf16 %v96_v7, %v96_v7  ;;  %2932 = vmatprep.mubr.msk.bf16.mxu1 %vm3445_vm2, %v3444_v12  ;;  %v3549_v24 = vunpack.c.l.bf16 %v2820_v23  ;;  %vm126_vm4 = vcmask 130048   ;;  %v3552_v27 = vunpack.c.h.bf16 %v2820_v23  ;;  %s3449_s25 = smov 56   ;;  %s3450_s26 = smov 80  }
  0x41   :  { %114 = vst.msk [vmem:[#allocation2] sm:$0xf] %vm113_vm0, %v2783_v5  ;;  %115 = vst.msk [vmem:[#allocation2 + $0x4] sm:$0xf] %vm113_vm0, %v2784_v6  ;;  %v3556_v33 = vunpack.c.l.bf16 %v2827_v29  ;;  %v3560_v38 = vunpack.c.h.bf16 %v2827_v29  ;;  %s3451_s27 = smov 112   ;;  %s3452_s28 = smov 48  }
  0x42   :  { %116 = vst.msk [vmem:[#allocation2 + $0x8] sm:$0xf] %vm113_vm0, %v2785_v8  ;;  %117 = vst.msk [vmem:[#allocation2 + $0xc] sm:$0xf] %vm113_vm0, %v2786_v9  ;;  %s3453_s29 = smov 72   ;;  %s3454_s30 = smov 104  }
  0x43   :  { %2913 = vmatpush3.bf16.msra.mxu0 %v3162_v1  ;;  %s3455_s7 = smov 40   ;;  %s3456_s8 = smov 32   ;;  %vm508_vm9 = vcmask 322816   ;;  %vm783_vm10 = vcmask 388416   ;;  %vm1058_vm11 = vcmask 454016   ;;  %vm1333_vm12 = vcmask 519616  }
  0x44   :  { %2918 = vmatprep.subr.bf16.mxu0 %v3444_v12  ;;  %vm1384_vm13 = vcmask 523264   ;;  %vm1710_vm14 = vcmask 585216   ;;  %vm1985_vm15 = vcmask 650816   ;;  %vm2260_vm0 = vcmask 716416   ;;  %s3457_s10 = smov [#allocation12]  }
  0x45   :  { %s2677_s1 = sshll.u32 %s3457_s10, 4  ;;  %s2678_s1 = int_to_ptr.vmem [resolvable:$true] %s2677_s1 }
  0x46   :  { %p3412_p12 = scmp.lt.s32.totalorder %s2678_s1, %s2678_s1 }
  0x48   :  { %v3163_v10 = vld [vmem:[#allocation2] sm:$0xff]  }
  0x49   :  { %v3164_v11 = vld [vmem:[#allocation2 + $0x8] sm:$0xff]   ;;  %2914 = vmatprep.mubr.msk.bf16.mxu0 %vm173_vm1, %v3163_v10 }
  0x4a   :  { %2915 = vmatmul.mubr.msk.bf16.vlgmr.msra.gmra.mxu0 %vm173_vm1, %v3164_v11  ;;  %vm2535_vm1 = vcmask 782016  }
  0x4b   :  { %2920 = vmatprep.mubr.msk.bf16.mxu0 %vm3445_vm2, %v3444_v12 }
 0x10a   :  { %v2916_v13 = vpop.f32.mrf.mxu0 }
 0x10c   :  { %v214_v14 = vpop.f32.mrf.mxu0 }
 0x10e   :  { %v2917_v15 = vpop.f32.mrf.mxu0 }
 0x10f   :  { %v3533_v18 = vpack.c.bf16 %v2917_v15, %v2916_v13 }
 0x110   :  { %v217_v16 = vpop.f32.mrf.mxu0 }
 0x111   :  { %v3529_v17 = vpack.c.bf16 %v217_v16, %v214_v14 }
 0x113   :  { %232 = vrot.lane.b32.xlu0 %v3529_v17, %s3446_s2 }
 0x117   :  { %283 = vrot.lane.b32.xlu0 %v3533_v18, %s3446_s2 }
 0x185   :  { %v233_v19 = vpop.permute.xlu0 %232 }
 0x186   :  { %v239_v20 = vsel %vm234_vm3, %v233_v19, 0 }
 0x187   :  { %2919 = vmatpush3.bf16.xpose.msra.mxu0 %v239_v20 }
 0x188   :  { %2924 = vmatprep.subr.bf16.mxu0 %v3444_v12 }
 0x189   :  { %v284_v21 = vpop.permute.xlu0 %283 }
 0x18a   :  { %v289_v22 = vsel %vm234_vm3, %v284_v21, 0 }
 0x18e   :  { %2921 = vmatmul.mubr.msk.bf16.vlgmr.msra.gmra.mxu0 %vm234_vm3, %v3529_v17 }
 0x18f   :  { %2925 = vmatpush3.bf16.xpose.msra.mxu0 %v289_v22  ;;  %2926 = vmatprep.mubr.msk.bf16.mxu0 %vm3445_vm2, %v3444_v12 }
 0x190   :  { %2936 = vmatprep.subr.bf16.mxu0 %v3444_v12 }
 0x196   :  { %2927 = vmatmul.mubr.msk.bf16.vlgmr.msra.gmra.mxu0 %vm234_vm3, %v3533_v18 }
 0x197   :  { %2938 = vmatprep.mubr.msk.bf16.mxu0 %vm3445_vm2, %v3444_v12 }
 0x24e   :  { %v275_v25 = vpop.f32.mrf.mxu0 }
 0x24f   :  { %v276_v26 = vadd.f32 %v3549_v24, %v275_v25 }
 0x250   :  { %v2922_v28 = vpop.f32.mrf.mxu0 }
 0x251   :  { %v332_v30 = vsel %vm126_vm4, %v276_v26, -inf }
 0x252   :  { %333 = vmax.xlane.f32.xlu1 %v332_v30  ;;  %v278_v31 = vpop.f32.mrf.mxu0 }
 0x253   :  { %v279_v32 = vadd.f32 %v3552_v27, %v278_v31 }
 0x254   :  { %v2923_v34 = vpop.f32.mrf.mxu0 }
 0x255   :  { %v335_v35 = vsel %vm126_vm4, %v279_v32, -inf }
 0x256   :  { %336 = vmax.xlane.f32.xlu1 %v335_v35  ;;  %v325_v36 = vpop.f32.mrf.mxu0 }
 0x257   :  { %v326_v37 = vadd.f32 %v3556_v33, %v325_v36 }
 0x258   :  { %v2928_v39 = vpop.f32.mrf.mxu0 }
 0x259   :  { %v338_v40 = vsel %vm126_vm4, %v326_v37, -inf }
 0x25a   :  { %339 = vmax.xlane.f32.xlu0 %v338_v40  ;;  %v328_v41 = vpop.f32.mrf.mxu0 }
 0x25b   :  { %v329_v42 = vadd.f32 %v3560_v38, %v328_v41 }
 0x25c   :  { %v2929_v43 = vpop.f32.mrf.mxu0 }
 0x25d   :  { %v341_v44 = vsel %vm126_vm4, %v329_v42, -inf }
 0x25e   :  { %342 = vmax.xlane.f32.xlu1 %v341_v44 }
 0x26f   :  { %378 = vrot.lane.b32.xlu1 %v3529_v17, %s3436_s24 }
 0x270   :  { %425 = vrot.lane.b32.xlu0 %v3533_v18, %s3436_s24 }
 0x273   :  { %515 = vrot.lane.b32.xlu1 %v3529_v17, %s3447_s4 }
 0x277   :  { %566 = vrot.lane.b32.xlu1 %v3533_v18, %s3447_s4 }
 0x2db   :  { %v334_v45 = vpop.xlane.xlu1 %333 }
 0x2dc   :  { %v344_v46 = vsub.f32 %v276_v26, %v334_v45 }
 0x2de   :  { %v348_v47 = vmul.f32 1.442695, %v344_v46 }
 0x2df   :  { %v337_v48 = vpop.xlane.xlu1 %336 }
 0x2e0   :  { %3179 = vpow2.f32 %v348_v47  ;;  %v345_v49 = vsub.f32 %v279_v32, %v337_v48 }
 0x2e2   :  { %v350_v50 = vmul.f32 1.442695, %v345_v49 }
 0x2e3   :  { %v340_v51 = vpop.xlane.xlu0 %339 }
 0x2e4   :  { %3181 = vpow2.f32 %v350_v50  ;;  %v346_v52 = vsub.f32 %v326_v37, %v340_v51 }
 0x2e6   :  { %v352_v53 = vmul.f32 1.442695, %v346_v52 }
 0x2e7   :  { %v426_v54 = vpop.permute.xlu0 %425  ;;  %v343_v55 = vpop.xlane.xlu1 %342 }
 0x2e8   :  { %3183 = vpow2.f32 %v352_v53  ;;  %v347_v56 = vsub.f32 %v329_v42, %v343_v55  ;;  %2937 = vmatpush3.bf16.msra.mxu0 %v426_v54 }
 0x2e9   :  { %2948 = vmatprep.subr.bf16.mxu0 %v3444_v12 }
 0x2ea   :  { %v354_v57 = vmul.f32 1.442695, %v347_v56 }
 0x2eb   :  { %v379_v58 = vpop.permute.xlu1 %378 }
 0x2ec   :  { %3185 = vpow2.f32 %v354_v57  ;;  %2931 = vmatpush3.bf16.msra.mxu1 %v379_v58 }
 0x2ed   :  { %v3180_v59 = vpop.eup %3179  ;;  %2942 = vmatprep.subr.bf16.mxu1 %v3444_v12 }
 0x2ee   :  { %v356_v60 = vsel %vm126_vm4, %v3180_v59, 0.0 }
 0x2ef   :  { %357 = vadd.xlane.f32.xlu1 %v356_v60  ;;  %v516_v3 = vpop.permute.xlu1 %515 }
 0x2f0   :  { %v521_v15 = vsel %vm234_vm3, %v516_v3, 0 }
 0x2f1   :  { %v3182_v61 = vpop.eup %3181 }
 0x2f2   :  { %v359_v62 = vsel %vm126_vm4, %v3182_v61, 0.0 }
 0x2f3   :  { %360 = vadd.xlane.f32.xlu1 %v359_v62  ;;  %v567_v4 = vpop.permute.xlu1 %566 }
 0x2f4   :  { %v572_v25 = vsel %vm234_vm3, %v567_v4, 0 }
 0x2f5   :  { %v3184_v63 = vpop.eup %3183 }
 0x2f6   :  { %v362_v0 = vsel %vm126_vm4, %v3184_v63, 0.0 }
 0x2f7   :  { %363 = vadd.xlane.f32.xlu1 %v362_v0 }
 0x2f9   :  { %v3186_v1 = vpop.eup %3185 }
 0x2fa   :  { %v365_v2 = vsel %vm126_vm4, %v3186_v1, 0.0 }
 0x2fb   :  { %366 = vadd.xlane.f32.xlu1 %v365_v2 }
 0x30c   :  { %513 = vrot.lane.b32.xlu1 %v3529_v17, %s3448_s23 }
 0x310   :  { %564 = vrot.lane.b32.xlu1 %v3533_v18, %s3448_s23 }
 0x378   :  { %v358_v5 = vpop.xlane.xlu1 %357 }
 0x379   :  { %3187 = vrcp.f32 %v358_v5 }
 0x37c   :  { %v361_v6 = vpop.xlane.xlu1 %360 }
 0x37d   :  { %3189 = vrcp.f32 %v361_v6 }
 0x380   :  { %v364_v7 = vpop.xlane.xlu1 %363 }
 0x381   :  { %3191 = vrcp.f32 %v364_v7 }
 0x384   :  { %v367_v8 = vpop.xlane.xlu1 %366 }
 0x385   :  { %3193 = vrcp.f32 %v367_v8 }
 0x386   :  { %v3188_v9 = vpop.eup %3187 }
 0x387   :  { %v372_v11 = vmul.f32 %v3188_v9, %v3180_v59 }
 0x388   :  { %v514_v23 = vpop.permute.xlu1 %513 }
 0x38a   :  { %v3190_v10 = vpop.eup %3189 }
 0x38b   :  { %v373_v13 = vmul.f32 %v3190_v10, %v3182_v61 }
 0x38c   :  { %v565_v26 = vpop.permute.xlu1 %564 }
 0x38d   :  { %v376_v14 = vpack.c.bf16 %v373_v13, %v372_v11 }
 0x38e   :  { %v3192_v16 = vpop.eup %3191 }
 0x38f   :  { %2933 = vmatmul.mubr.msk.bf16.vlgmr.msra.gmra.mxu1 %vm126_vm4, %v376_v14  ;;  %v374_v20 = vmul.f32 %v3192_v16, %v3184_v63 }
 0x390   :  { %2943 = vmatpush3.bf16.xpose.msra.mxu1 %v521_v15  ;;  %2944 = vmatprep.mubr.msk.bf16.mxu1 %vm3445_vm2, %v3444_v12 }
 0x391   :  { %2954 = vmatprep.subr.bf16.mxu1 %v3444_v12 }
 0x392   :  { %v3194_v19 = vpop.eup %3193 }
 0x393   :  { %v375_v21 = vmul.f32 %v3194_v19, %v3186_v1 }
 0x395   :  { %v377_v22 = vpack.c.bf16 %v375_v21, %v374_v20 }
 0x397   :  { %2939 = vmatmul.mubr.msk.bf16.vlgmr.msra.gmra.mxu0 %vm126_vm4, %v377_v22  ;;  %2945 = vmatmul.mubr.msk.bf16.vlgmr.msra.gmra.mxu1 %vm234_vm3, %v514_v23 }
 0x398   :  { %2949 = vmatpush3.bf16.xpose.msra.mxu0 %v572_v25  ;;  %2950 = vmatprep.mubr.msk.bf16.mxu0 %vm3445_vm2, %v3444_v12 }
 0x399   :  { %2960 = vmatprep.subr.bf16.mxu0 %v3444_v12  ;;  %2956 = vmatprep.mubr.msk.bf16.mxu1 %vm3445_vm2, %v3444_v12 }
 0x39f   :  { %2951 = vmatmul.mubr.msk.bf16.vlgmr.msra.gmra.mxu0 %vm234_vm3, %v565_v26 }
 0x3a0   :  { %2962 = vmatprep.mubr.msk.bf16.mxu0 %vm3445_vm2, %v3444_v12 }
 0x44f   :  { %v3599_v28 = vpop.f32.mrf.mxu1 }
 0x451   :  { %v2934_v29 = vpop.f32.mrf.mxu1 }
 0x453   :  { %v3601_v30 = vpop.f32.mrf.mxu1 }
 0x455   :  { %v2935_v31 = vpop.f32.mrf.mxu1 }
 0x457   :  { %v3603_v32 = vpop.f32.mrf.mxu0  ;;  %v557_v34 = vpop.f32.mrf.mxu1 }
 0x458   :  { %v558_v35 = vadd.f32 %v3549_v24, %v557_v34 }
 0x459   :  { %v2940_v36 = vpop.f32.mrf.mxu0  ;;  %v2946_v37 = vpop.f32.mrf.mxu1 }
 0x45a   :  { %v615_v39 = vsel %vm126_vm4, %v558_v35, -inf }
 0x45b   :  { %616 = vmax.xlane.f32.xlu0 %v615_v39  ;;  %v3607_v40 = vpop.f32.mrf.mxu0  ;;  %v560_v41 = vpop.f32.mrf.mxu1 }
 0x45c   :  { %v561_v42 = vadd.f32 %v3552_v27, %v560_v41 }
 0x45d   :  { %v2941_v43 = vpop.f32.mrf.mxu0  ;;  %v2947_v44 = vpop.f32.mrf.mxu1 }
 0x45e   :  { %v618_v45 = vsel %vm126_vm4, %v561_v42, -inf }
 0x45f   :  { %619 = vmax.xlane.f32.xlu1 %v618_v45  ;;  %v608_v46 = vpop.f32.mrf.mxu0 }
 0x460   :  { %v609_v47 = vadd.f32 %v3556_v33, %v608_v46 }
 0x461   :  { %v2952_v48 = vpop.f32.mrf.mxu0 }
 0x462   :  { %v621_v49 = vsel %vm126_vm4, %v609_v47, -inf }
 0x463   :  { %622 = vmax.xlane.f32.xlu0 %v621_v49  ;;  %v611_v50 = vpop.f32.mrf.mxu0 }
 0x464   :  { %v612_v51 = vadd.f32 %v3560_v38, %v611_v50 }
 0x465   :  { %v2953_v52 = vpop.f32.mrf.mxu0 }
 0x466   :  { %v624_v53 = vsel %vm126_vm4, %v612_v51, -inf }
 0x467   :  { %625 = vmax.xlane.f32.xlu0 %v624_v53 }
 0x470   :  { %661 = vrot.lane.b32.xlu1 %v3529_v17, %s3449_s25 }
 0x4e4   :  { %v617_v54 = vpop.xlane.xlu0 %616 }
 0x4e5   :  { %v627_v55 = vsub.f32 %v558_v35, %v617_v54 }
 0x4e7   :  { %v631_v56 = vmul.f32 1.442695, %v627_v55 }
 0x4e8   :  { %v620_v57 = vpop.xlane.xlu1 %619 }
 0x4e9   :  { %3195 = vpow2.f32 %v631_v56  ;;  %v628_v58 = vsub.f32 %v561_v42, %v620_v57 }
 0x4eb   :  { %v633_v59 = vmul.f32 1.442695, %v628_v58 }
 0x4ec   :  { %v662_v60 = vpop.permute.xlu1 %661  ;;  %v623_v61 = vpop.xlane.xlu0 %622 }
 0x4ed   :  { %3197 = vpow2.f32 %v633_v59  ;;  %v629_v62 = vsub.f32 %v609_v47, %v623_v61  ;;  %2955 = vmatpush3.bf16.msra.mxu1 %v662_v60 }
 0x4ee   :  { %2966 = vmatprep.subr.bf16.mxu1 %v3444_v12 }
 0x4ef   :  { %v635_v63 = vmul.f32 1.442695, %v629_v62 }
 0x4f0   :  { %v626_v0 = vpop.xlane.xlu0 %625 }
 0x4f1   :  { %3199 = vpow2.f32 %v635_v63  ;;  %v630_v1 = vsub.f32 %v612_v51, %v626_v0 }
 0x4f3   :  { %v637_v2 = vmul.f32 1.442695, %v630_v1 }
 0x4f5   :  { %3201 = vpow2.f32 %v637_v2 }
 0x4f6   :  { %v3196_v3 = vpop.eup %3195 }
 0x4f7   :  { %v639_v4 = vsel %vm126_vm4, %v3196_v3, 0.0 }
 0x4f8   :  { %640 = vadd.xlane.f32.xlu1 %v639_v4 }
 0x4fa   :  { %v3198_v5 = vpop.eup %3197 }
 0x4fb   :  { %v642_v6 = vsel %vm126_vm4, %v3198_v5, 0.0 }
 0x4fc   :  { %643 = vadd.xlane.f32.xlu0 %v642_v6 }
 0x4fe   :  { %v3200_v7 = vpop.eup %3199 }
 0x4ff   :  { %v645_v8 = vsel %vm126_vm4, %v3200_v7, 0.0 }
 0x500   :  { %646 = vadd.xlane.f32.xlu1 %v645_v8 }
 0x502   :  { %v3202_v9 = vpop.eup %3201 }
 0x503   :  { %v648_v10 = vsel %vm126_vm4, %v3202_v9, 0.0 }
 0x504   :  { %649 = vadd.xlane.f32.xlu0 %v648_v10 }
 0x511   :  { %790 = vrot.lane.b32.xlu1 %v3529_v17, %s3450_s26 }
 0x515   :  { %841 = vrot.lane.b32.xlu1 %v3533_v18, %s3450_s26 }
 0x519   :  { %839 = vrot.lane.b32.xlu1 %v3533_v18, %s3451_s27 }
 0x51a   :  { %708 = vrot.lane.b32.xlu0 %v3533_v18, %s3449_s25 }
 0x51e   :  { %788 = vrot.lane.b32.xlu0 %v3529_v17, %s3451_s27 }
 0x581   :  { %v641_v11 = vpop.xlane.xlu1 %640 }
 0x582   :  { %3203 = vrcp.f32 %v641_v11 }
 0x585   :  { %v644_v13 = vpop.xlane.xlu0 %643 }
 0x586   :  { %3205 = vrcp.f32 %v644_v13 }
 0x589   :  { %v647_v14 = vpop.xlane.xlu1 %646 }
 0x58a   :  { %3207 = vrcp.f32 %v647_v14 }
 0x58d   :  { %v650_v15 = vpop.xlane.xlu0 %649  ;;  %v791_v23 = vpop.permute.xlu1 %790 }
 0x58e   :  { %3209 = vrcp.f32 %v650_v15  ;;  %v796_v26 = vsel %vm234_vm3, %v791_v23, 0 }
 0x58f   :  { %v3204_v16 = vpop.eup %3203 }
 0x590   :  { %v655_v21 = vmul.f32 %v3204_v16, %v3196_v3 }
 0x591   :  { %v709_v19 = vpop.permute.xlu0 %708  ;;  %v842_v36 = vpop.permute.xlu1 %841 }
 0x592   :  { %2961 = vmatpush3.bf16.msra.mxu0 %v709_v19  ;;  %v847_v41 = vsel %vm234_vm3, %v842_v36, 0 }
 0x593   :  { %v3206_v20 = vpop.eup %3205  ;;  %2972 = vmatprep.subr.bf16.mxu0 %v3444_v12 }
 0x594   :  { %v656_v22 = vmul.f32 %v3206_v20, %v3198_v5 }
 0x595   :  { %v789_v39 = vpop.permute.xlu0 %788  ;;  %v840_v42 = vpop.permute.xlu1 %839 }
 0x596   :  { %v659_v25 = vpack.c.bf16 %v656_v22, %v655_v21 }
 0x597   :  { %v3208_v29 = vpop.eup %3207 }
 0x598   :  { %2957 = vmatmul.mubr.msk.bf16.vlgmr.msra.gmra.mxu1 %vm126_vm4, %v659_v25  ;;  %v657_v34 = vmul.f32 %v3208_v29, %v3200_v7 }
 0x599   :  { %2967 = vmatpush3.bf16.xpose.msra.mxu1 %v796_v26  ;;  %2968 = vmatprep.mubr.msk.bf16.mxu1 %vm3445_vm2, %v3444_v12 }
 0x59a   :  { %2978 = vmatprep.subr.bf16.mxu1 %v3444_v12 }
 0x59b   :  { %v3210_v31 = vpop.eup %3209 }
 0x59c   :  { %v658_v35 = vmul.f32 %v3210_v31, %v3202_v9 }
 0x59e   :  { %v660_v37 = vpack.c.bf16 %v658_v35, %v657_v34 }
 0x5a0   :  { %2963 = vmatmul.mubr.msk.bf16.vlgmr.msra.gmra.mxu0 %vm126_vm4, %v660_v37  ;;  %2969 = vmatmul.mubr.msk.bf16.vlgmr.msra.gmra.mxu1 %vm234_vm3, %v789_v39 }
 0x5a1   :  { %2973 = vmatpush3.bf16.xpose.msra.mxu0 %v847_v41  ;;  %2974 = vmatprep.mubr.msk.bf16.mxu0 %vm3445_vm2, %v3444_v12 }
 0x5a2   :  { %2984 = vmatprep.subr.bf16.mxu0 %v3444_v12  ;;  %2980 = vmatprep.mubr.msk.bf16.mxu1 %vm3445_vm2, %v3444_v12 }
 0x5a8   :  { %2975 = vmatmul.mubr.msk.bf16.vlgmr.msra.gmra.mxu0 %vm234_vm3, %v840_v42 }
 0x5a9   :  { %2986 = vmatprep.mubr.msk.bf16.mxu0 %vm3445_vm2, %v3444_v12 }
 0x658   :  { %v3649_v43 = vpop.f32.mrf.mxu1 }
 0x65a   :  { %v2958_v44 = vpop.f32.mrf.mxu1 }
 0x65c   :  { %v3651_v45 = vpop.f32.mrf.mxu1 }
 0x65e   :  { %v2959_v46 = vpop.f32.mrf.mxu1 }
 0x660   :  { %v3653_v47 = vpop.f32.mrf.mxu0  ;;  %v832_v48 = vpop.f32.mrf.mxu1 }
 0x661   :  { %v833_v49 = vadd.f32 %v3549_v24, %v832_v48 }
 0x662   :  { %v2964_v50 = vpop.f32.mrf.mxu0  ;;  %v2970_v51 = vpop.f32.mrf.mxu1 }
 0x663   :  { %v890_v52 = vsel %vm126_vm4, %v833_v49, -inf }
 0x664   :  { %891 = vmax.xlane.f32.xlu0 %v890_v52  ;;  %v3657_v53 = vpop.f32.mrf.mxu0  ;;  %v835_v54 = vpop.f32.mrf.mxu1 }
 0x665   :  { %v836_v55 = vadd.f32 %v3552_v27, %v835_v54 }
 0x666   :  { %v2965_v56 = vpop.f32.mrf.mxu0  ;;  %v2971_v57 = vpop.f32.mrf.mxu1 }
 0x667   :  { %v893_v58 = vsel %vm126_vm4, %v836_v55, -inf }
 0x668   :  { %894 = vmax.xlane.f32.xlu1 %v893_v58  ;;  %v883_v59 = vpop.f32.mrf.mxu0 }
 0x669   :  { %v884_v60 = vadd.f32 %v3556_v33, %v883_v59 }
 0x66a   :  { %v2976_v61 = vpop.f32.mrf.mxu0 }
 0x66b   :  { %v896_v62 = vsel %vm126_vm4, %v884_v60, -inf }
 0x66c   :  { %897 = vmax.xlane.f32.xlu0 %v896_v62  ;;  %v886_v63 = vpop.f32.mrf.mxu0 }
 0x66d   :  { %v887_v0 = vadd.f32 %v3560_v38, %v886_v63 }
 0x66e   :  { %v2977_v1 = vpop.f32.mrf.mxu0 }
 0x66f   :  { %v899_v2 = vsel %vm126_vm4, %v887_v0, -inf }
 0x670   :  { %900 = vmax.xlane.f32.xlu0 %v899_v2 }
 0x679   :  { %936 = vrot.lane.b32.xlu1 %v3529_v17, %s3452_s28 }
 0x6ed   :  { %v892_v3 = vpop.xlane.xlu0 %891 }
 0x6ee   :  { %v902_v4 = vsub.f32 %v833_v49, %v892_v3 }
 0x6f0   :  { %v906_v5 = vmul.f32 1.442695, %v902_v4 }
 0x6f1   :  { %v895_v6 = vpop.xlane.xlu1 %894 }
 0x6f2   :  { %3211 = vpow2.f32 %v906_v5  ;;  %v903_v7 = vsub.f32 %v836_v55, %v895_v6 }
 0x6f4   :  { %v908_v8 = vmul.f32 1.442695, %v903_v7 }
 0x6f5   :  { %v937_v9 = vpop.permute.xlu1 %936  ;;  %v898_v10 = vpop.xlane.xlu0 %897 }
 0x6f6   :  { %3213 = vpow2.f32 %v908_v8  ;;  %v904_v11 = vsub.f32 %v884_v60, %v898_v10  ;;  %2979 = vmatpush3.bf16.msra.mxu1 %v937_v9 }
 0x6f7   :  { %2990 = vmatprep.subr.bf16.mxu1 %v3444_v12 }
 0x6f8   :  { %v910_v13 = vmul.f32 1.442695, %v904_v11 }
 0x6f9   :  { %v901_v14 = vpop.xlane.xlu0 %900 }
 0x6fa   :  { %3215 = vpow2.f32 %v910_v13  ;;  %v905_v15 = vsub.f32 %v887_v0, %v901_v14 }
 0x6fc   :  { %v912_v16 = vmul.f32 1.442695, %v905_v15 }
 0x6fe   :  { %3217 = vpow2.f32 %v912_v16 }
 0x6ff   :  { %v3212_v19 = vpop.eup %3211 }
 0x700   :  { %v914_v20 = vsel %vm126_vm4, %v3212_v19, 0.0 }
 0x701   :  { %915 = vadd.xlane.f32.xlu1 %v914_v20 }
 0x703   :  { %v3214_v21 = vpop.eup %3213 }
 0x704   :  { %v917_v22 = vsel %vm126_vm4, %v3214_v21, 0.0 }
 0x705   :  { %918 = vadd.xlane.f32.xlu0 %v917_v22 }
 0x707   :  { %v3216_v23 = vpop.eup %3215 }
 0x708   :  { %v920_v25 = vsel %vm126_vm4, %v3216_v23, 0.0 }
 0x709   :  { %921 = vadd.xlane.f32.xlu1 %v920_v25 }
 0x70b   :  { %v3218_v26 = vpop.eup %3217 }
 0x70c   :  { %v923_v29 = vsel %vm126_vm4, %v3218_v26, 0.0 }
 0x70d   :  { %924 = vadd.xlane.f32.xlu0 %v923_v29 }
 0x71a   :  { %1065 = vrot.lane.b32.xlu1 %v3529_v17, %s3453_s29 }
 0x71e   :  { %1116 = vrot.lane.b32.xlu1 %v3533_v18, %s3453_s29 }
 0x722   :  { %1114 = vrot.lane.b32.xlu1 %v3533_v18, %s3454_s30 }
 0x723   :  { %983 = vrot.lane.b32.xlu0 %v3533_v18, %s3452_s28 }
 0x727   :  { %1063 = vrot.lane.b32.xlu0 %v3529_v17, %s3454_s30 }
 0x78a   :  { %v916_v31 = vpop.xlane.xlu1 %915 }
 0x78b   :  { %3219 = vrcp.f32 %v916_v31 }
 0x78e   :  { %v919_v34 = vpop.xlane.xlu0 %918 }
 0x78f   :  { %3221 = vrcp.f32 %v919_v34 }
 0x792   :  { %v922_v35 = vpop.xlane.xlu1 %921 }
 0x793   :  { %3223 = vrcp.f32 %v922_v35 }
 0x796   :  { %v925_v36 = vpop.xlane.xlu0 %924  ;;  %v1066_v46 = vpop.permute.xlu1 %1065 }
 0x797   :  { %3225 = vrcp.f32 %v925_v36  ;;  %v1071_v49 = vsel %vm234_vm3, %v1066_v46, 0 }
 0x798   :  { %v3220_v37 = vpop.eup %3219 }
 0x799   :  { %v930_v42 = vmul.f32 %v3220_v37, %v3212_v19 }
 0x79a   :  { %v984_v39 = vpop.permute.xlu0 %983  ;;  %v1117_v55 = vpop.permute.xlu1 %1116 }
 0x79b   :  { %2985 = vmatpush3.bf16.msra.mxu0 %v984_v39  ;;  %v1122_v58 = vsel %vm234_vm3, %v1117_v55, 0  ;;  %v127_v55 = vsel %vm126_vm4, %v3549_v24, -inf }
 0x79c   :  { %v3222_v41 = vpop.eup %3221  ;;  %2996 = vmatprep.subr.bf16.mxu0 %v3444_v12 }
 0x79d   :  { %v931_v44 = vmul.f32 %v3222_v41, %v3214_v21 }
 0x79e   :  { %v1064_v57 = vpop.permute.xlu0 %1063  ;;  %v1115_v59 = vpop.permute.xlu1 %1114 }
 0x79f   :  { %v934_v48 = vpack.c.bf16 %v931_v44, %v930_v42 }
 0x7a0   :  { %v3224_v50 = vpop.eup %3223 }
 0x7a1   :  { %2981 = vmatmul.mubr.msk.bf16.vlgmr.msra.gmra.mxu1 %vm126_vm4, %v934_v48  ;;  %v932_v52 = vmul.f32 %v3224_v50, %v3216_v23 }
 0x7a2   :  { %2991 = vmatpush3.bf16.xpose.msra.mxu1 %v1071_v49  ;;  %2992 = vmatprep.mubr.msk.bf16.mxu1 %vm3445_vm2, %v3444_v12 }
 0x7a3   :  { %3002 = vmatprep.subr.bf16.mxu1 %v3444_v12 }
 0x7a4   :  { %v3226_v51 = vpop.eup %3225 }
 0x7a5   :  { %v933_v54 = vmul.f32 %v3226_v51, %v3218_v26 }
 0x7a7   :  { %v935_v56 = vpack.c.bf16 %v933_v54, %v932_v52 }
 0x7a9   :  { %2987 = vmatmul.mubr.msk.bf16.vlgmr.msra.gmra.mxu0 %vm126_vm4, %v935_v56  ;;  %2993 = vmatmul.mubr.msk.bf16.vlgmr.msra.gmra.mxu1 %vm234_vm3, %v1064_v57  ;;  %v133_v56 = vsel %vm126_vm4, %v3556_v33, -inf  ;;  %v130_v57 = vsel %vm126_vm4, %v3552_v27, -inf }
 0x7aa   :  { %2997 = vmatpush3.bf16.xpose.msra.mxu0 %v1122_v58  ;;  %2998 = vmatprep.mubr.msk.bf16.mxu0 %vm3445_vm2, %v3444_v12  ;;  %v136_v58 = vsel %vm126_vm4, %v3560_v38, -inf }
 0x7ab   :  { %3008 = vmatprep.subr.bf16.mxu0 %v3444_v12  ;;  %3004 = vmatprep.mubr.msk.bf16.mxu1 %vm3445_vm2, %v3444_v12 }
 0x7b1   :  { %2999 = vmatmul.mubr.msk.bf16.vlgmr.msra.gmra.mxu0 %vm234_vm3, %v1115_v59 }
 0x7b2   :  { %3010 = vmatprep.mubr.msk.bf16.mxu0 %vm3445_vm2, %v3444_v12 }
 0x861   :  { %v3699_v60 = vpop.f32.mrf.mxu1 }
 0x863   :  { %v2982_v61 = vpop.f32.mrf.mxu1 }
 0x865   :  { %v3701_v62 = vpop.f32.mrf.mxu1 }
 0x867   :  { %v2983_v63 = vpop.f32.mrf.mxu1 }
 0x869   :  { %v3703_v0 = vpop.f32.mrf.mxu0  ;;  %v1107_v1 = vpop.f32.mrf.mxu1 }
 0x86a   :  { %v1108_v2 = vadd.f32 %v3549_v24, %v1107_v1 }
 0x86b   :  { %v2988_v3 = vpop.f32.mrf.mxu0  ;;  %v2994_v4 = vpop.f32.mrf.mxu1 }
 0x86c   :  { %v1165_v5 = vsel %vm126_vm4, %v1108_v2, -inf }
 0x86d   :  { %1166 = vmax.xlane.f32.xlu0 %v1165_v5  ;;  %v3707_v6 = vpop.f32.mrf.mxu0  ;;  %v1110_v7 = vpop.f32.mrf.mxu1 }
 0x86e   :  { %v1111_v8 = vadd.f32 %v3552_v27, %v1110_v7 }
 0x86f   :  { %v2989_v9 = vpop.f32.mrf.mxu0  ;;  %v2995_v10 = vpop.f32.mrf.mxu1 }
 0x870   :  { %v1168_v11 = vsel %vm126_vm4, %v1111_v8, -inf }
 0x871   :  { %1169 = vmax.xlane.f32.xlu1 %v1168_v11  ;;  %v1158_v13 = vpop.f32.mrf.mxu0 }
 0x872   :  { %v1159_v14 = vadd.f32 %v3556_v33, %v1158_v13 }
 0x873   :  { %v3000_v15 = vpop.f32.mrf.mxu0 }
 0x874   :  { %v1171_v16 = vsel %vm126_vm4, %v1159_v14, -inf }
 0x875   :  { %1172 = vmax.xlane.f32.xlu0 %v1171_v16  ;;  %v1161_v19 = vpop.f32.mrf.mxu0 }
 0x876   :  { %v1162_v20 = vadd.f32 %v3560_v38, %v1161_v19 }
 0x877   :  { %v3001_v21 = vpop.f32.mrf.mxu0 }
 0x878   :  { %v1174_v22 = vsel %vm126_vm4, %v1162_v20, -inf }
 0x879   :  { %1175 = vmax.xlane.f32.xlu0 %v1174_v22 }
 0x8f6   :  { %v1167_v23 = vpop.xlane.xlu0 %1166 }
 0x8f7   :  { %v1177_v25 = vsub.f32 %v1108_v2, %v1167_v23 }
 0x8f9   :  { %v1181_v26 = vmul.f32 1.442695, %v1177_v25 }
 0x8fa   :  { %v1170_v29 = vpop.xlane.xlu1 %1169 }
 0x8fb   :  { %3227 = vpow2.f32 %v1181_v26  ;;  %v1178_v31 = vsub.f32 %v1111_v8, %v1170_v29 }
 0x8fd   :  { %v1183_v34 = vmul.f32 1.442695, %v1178_v31 }
 0x8fe   :  { %v1173_v35 = vpop.xlane.xlu0 %1172 }
 0x8ff   :  { %3229 = vpow2.f32 %v1183_v34  ;;  %v1179_v36 = vsub.f32 %v1159_v14, %v1173_v35 }
 0x901   :  { %v1185_v37 = vmul.f32 1.442695, %v1179_v36 }
 0x902   :  { %v1176_v39 = vpop.xlane.xlu0 %1175 }
 0x903   :  { %3231 = vpow2.f32 %v1185_v37  ;;  %v1180_v41 = vsub.f32 %v1162_v20, %v1176_v39 }
 0x905   :  { %v1187_v42 = vmul.f32 1.442695, %v1180_v41 }
 0x907   :  { %3233 = vpow2.f32 %v1187_v42 }
 0x908   :  { %v3228_v44 = vpop.eup %3227 }
 0x909   :  { %v1189_v46 = vsel %vm126_vm4, %v3228_v44, 0.0 }
 0x90a   :  { %1190 = vadd.xlane.f32.xlu1 %v1189_v46 }
 0x90c   :  { %v3230_v48 = vpop.eup %3229 }
 0x90d   :  { %v1192_v49 = vsel %vm126_vm4, %v3230_v48, 0.0 }
 0x90e   :  { %1193 = vadd.xlane.f32.xlu0 %v1192_v49 }
 0x910   :  { %v3232_v50 = vpop.eup %3231 }
 0x911   :  { %v1195_v51 = vsel %vm126_vm4, %v3232_v50, 0.0 }
 0x912   :  { %1196 = vadd.xlane.f32.xlu1 %v1195_v51 }
 0x914   :  { %v3234_v52 = vpop.eup %3233 }
 0x915   :  { %v1198_v54 = vsel %vm126_vm4, %v3234_v52, 0.0 }
 0x916   :  { %1199 = vadd.xlane.f32.xlu0 %v1198_v54 }
 0x923   :  { %1211 = vrot.lane.b32.xlu1 %v3529_v17, %s3455_s7 }
 0x92c   :  { %1258 = vrot.lane.b32.xlu0 %v3533_v18, %s3455_s7 }
 0x947   :  { %128 = vmax.xlane.f32.xlu1 %v127_v55 }
 0x94b   :  { %134 = vmax.xlane.f32.xlu1 %v133_v56  ;;  %131 = vmax.xlane.f32.xlu0 %v130_v57  ;;  %v3165_v56 = vld [vmem:[#allocation9 + $0x18] sm:$0xff]   ;;  %v3166_v57 = vld [vmem:[#allocation9 + $0x10] sm:$0xff]  }
 0x94f   :  { %137 = vmax.xlane.f32.xlu0 %v136_v58 }
 0x993   :  { %v1191_v17 = vpop.xlane.xlu1 %1190 }
 0x994   :  { %3235 = vrcp.f32 %v1191_v17 }
 0x997   :  { %v1194_v59 = vpop.xlane.xlu0 %1193 }
 0x998   :  { %3237 = vrcp.f32 %v1194_v59 }
 0x99b   :  { %v1197_v18 = vpop.xlane.xlu1 %1196 }
 0x99c   :  { %3239 = vrcp.f32 %v1197_v18 }
 0x99f   :  { %v1212_v61 = vpop.permute.xlu1 %1211  ;;  %v1200_v63 = vpop.xlane.xlu0 %1199 }
 0x9a0   :  { %3241 = vrcp.f32 %v1200_v63  ;;  %3003 = vmatpush3.bf16.msra.mxu1 %v1212_v61  ;;  %v3167_v61 = vld [vmem:[#allocation9 + $0x8] sm:$0xff]  }
 0x9a1   :  { %v3236_v1 = vpop.eup %3235  ;;  %3014 = vmatprep.subr.bf16.mxu1 %v3165_v56 }
 0x9a2   :  { %v1205_v4 = vmul.f32 %v3236_v1, %v3228_v44  ;;  %v3169_v1 = vld [vmem:[#allocation9] sm:$0xff]  }
 0x9a3   :  { %v1259_v2 = vpop.permute.xlu0 %1258 }
 0x9a4   :  { %3009 = vmatpush3.bf16.msra.mxu0 %v1259_v2 }
 0x9a5   :  { %v3238_v3 = vpop.eup %3237  ;;  %3026 = vmatprep.subr.bf16.mxu0 %v3444_v12 }
 0x9a6   :  { %v1206_v5 = vmul.f32 %v3238_v3, %v3230_v48 }
 0x9a8   :  { %v1209_v7 = vpack.c.bf16 %v1206_v5, %v1205_v4 }
 0x9a9   :  { %v3240_v8 = vpop.eup %3239 }
 0x9aa   :  { %3005 = vmatmul.mubr.msk.bf16.vlgmr.msra.gmra.mxu1 %vm126_vm4, %v1209_v7  ;;  %v1207_v10 = vmul.f32 %v3240_v8, %v3232_v50 }
 0x9ab   :  { %3015 = vmatpush3.bf16.msra.mxu1 %v3165_v56 }
 0x9ac   :  { %3016 = vmatprep.subr.bf16.mxu1 %v3166_v57 }
 0x9ad   :  { %v3242_v9 = vpop.eup %3241 }
 0x9ae   :  { %v1208_v11 = vmul.f32 %v3242_v9, %v3234_v52 }
 0x9af   :  { %3017 = vmatpush3.bf16.msra.mxu1 %v3166_v57 }
 0x9b0   :  { %v1210_v13 = vpack.c.bf16 %v1208_v11, %v1207_v10  ;;  %3018 = vmatprep.subr.bf16.mxu1 %v3167_v61 }
 0x9b2   :  { %3011 = vmatmul.mubr.msk.bf16.vlgmr.msra.gmra.mxu0 %vm126_vm4, %v1210_v13 }
 0x9b3   :  { %3028 = vmatprep.mubr.msk.bf16.mxu0 %vm3445_vm2, %v3444_v12  ;;  %3019 = vmatpush3.bf16.msra.mxu1 %v3167_v61 }
 0x9b4   :  { %3020 = vmatprep.subr.bf16.mxu1 %v3169_v1 }
 0x9b7   :  { %3021 = vmatpush3.bf16.msra.mxu1 %v3169_v1 }
 0x9b8   :  { %3038 = vmatprep.subr.bf16.mxu1 %v3444_v12 }
 0x9d0   :  { %v3736_v14 = vpop.xlane.xlu1 %128 }
 0x9d1   :  { %vm139_vm5 = vcmp.gt.f32.partialorder %v3736_v14, -1.0 }
 0x9d2   :  { %v480_v15 = vsel %vm139_vm5, %v3599_v28, 0.0  ;;  %v755_v26 = vsel %vm139_vm5, %v3649_v43, 0.0  ;;  %v1030_v36 = vsel %vm139_vm5, %v3699_v60, 0.0 }
 0x9d3   :  { %v2787_v16 = vpack.c.bf16 %v480_v15, %v480_v15  ;;  %v2791_v29 = vpack.c.bf16 %v755_v26, %v755_v26 }
 0x9d4   :  { %v3742_v19 = vpop.xlane.xlu1 %134  ;;  %v3744_v20 = vpop.xlane.xlu0 %131 }
 0x9d5   :  { %vm141_vm6 = vcmp.gt.f32.partialorder %v3742_v19, -1.0  ;;  %vm140_vm7 = vcmp.gt.f32.partialorder %v3744_v20, -1.0  ;;  %496 = vrot.lane.b32.xlu1 %v2787_v16, %s3456_s8 }
 0x9d6   :  { %v482_v21 = vsel %vm141_vm6, %v3603_v32, 0.0  ;;  %v481_v22 = vsel %vm140_vm7, %v3601_v30, 0.0  ;;  %v757_v30 = vsel %vm141_vm6, %v3653_v47, 0.0  ;;  %v756_v34 = vsel %vm140_vm7, %v3651_v45, 0.0 }
 0x9d7   :  { %v2789_v28 = vpack.c.bf16 %v482_v21, %v482_v21  ;;  %v2788_v23 = vpack.c.bf16 %v481_v22, %v481_v22  ;;  %v2793_v43 = vpack.c.bf16 %v757_v30, %v757_v30  ;;  %v2792_v35 = vpack.c.bf16 %v756_v34, %v756_v34 }
 0x9d8   :  { %v3754_v25 = vpop.xlane.xlu0 %137  ;;  %v2795_v47 = vpack.c.bf16 %v1030_v36, %v1030_v36  ;;  %v1032_v45 = vsel %vm141_vm6, %v3703_v0, 0.0  ;;  %v1031_v39 = vsel %vm140_vm7, %v3701_v62, 0.0 }
 0x9d9   :  { %vm142_vm8 = vcmp.gt.f32.partialorder %v3754_v25, -1.0  ;;  %500 = vrot.lane.b32.xlu1 %v2789_v28, %s3456_s8  ;;  %498 = vrot.lane.b32.xlu0 %v2788_v23, %s3456_s8  ;;  %v2797_v60 = vpack.c.bf16 %v1032_v45, %v1032_v45  ;;  %v2558_v25 = vlaneseq }
 0x9da   :  { %v483_v32 = vsel %vm142_vm8, %v3607_v40, 0.0  ;;  %v758_v40 = vsel %vm142_vm8, %v3657_v53, 0.0  ;;  %v2796_v53 = vpack.c.bf16 %v1031_v39, %v1031_v39  ;;  %v1033_v41 = vsel %vm142_vm8, %v3707_v6, 0.0 }
 0x9db   :  { %v2790_v31 = vpack.c.bf16 %v483_v32, %v483_v32  ;;  %v2794_v37 = vpack.c.bf16 %v758_v40, %v758_v40  ;;  %v2798_v42 = vpack.c.bf16 %v1033_v41, %v1033_v41 }
 0x9dd   :  { %771 = vrot.lane.b32.xlu0 %v2791_v29, %s3455_s7  ;;  %502 = vrot.lane.b32.xlu1 %v2790_v31, %s3456_s8 }
 0x9e1   :  { %775 = vrot.lane.b32.xlu0 %v2793_v43, %s3455_s7  ;;  %773 = vrot.lane.b32.xlu1 %v2792_v35, %s3455_s7 }
 0x9e5   :  { %1046 = vrot.lane.b32.xlu0 %v2795_v47, %s3452_s28  ;;  %777 = vrot.lane.b32.xlu1 %v2794_v37, %s3455_s7 }
 0x9e9   :  { %1050 = vrot.lane.b32.xlu0 %v2797_v60, %s3452_s28  ;;  %1048 = vrot.lane.b32.xlu1 %v2796_v53, %s3452_s28 }
 0x9ed   :  { %1052 = vrot.lane.b32.xlu1 %v2798_v42, %s3452_s28 }
 0xa47   :  { %v497_v0 = vpop.permute.xlu1 %496 }
 0xa48   :  { %509 = vst.msk [vmem:[#allocation2] sm:$0xf] %vm508_vm9, %v497_v0 }
 0xa4b   :  { %v501_v62 = vpop.permute.xlu1 %500  ;;  %v499_v44 = vpop.permute.xlu0 %498 }
 0xa4c   :  { %511 = vst.msk [vmem:[#allocation2 + $0x8] sm:$0xf] %vm508_vm9, %v501_v62  ;;  %510 = vst.msk [vmem:[#allocation2 + $0x4] sm:$0xf] %vm508_vm9, %v499_v44 }
 0xa4f   :  { %v503_v46 = vpop.permute.xlu1 %502  ;;  %v772_v48 = vpop.permute.xlu0 %771 }
 0xa50   :  { %512 = vst.msk [vmem:[#allocation2 + $0xc] sm:$0xf] %vm508_vm9, %v503_v46 }
 0xa51   :  { %784 = vst.msk [vmem:[#allocation2] sm:$0xf] %vm783_vm10, %v772_v48 }
 0xa53   :  { %v774_v6 = vpop.permute.xlu1 %773  ;;  %v776_v49 = vpop.permute.xlu0 %775 }
 0xa54   :  { %785 = vst.msk [vmem:[#allocation2 + $0x4] sm:$0xf] %vm783_vm10, %v774_v6  ;;  %786 = vst.msk [vmem:[#allocation2 + $0x8] sm:$0xf] %vm783_vm10, %v776_v49 }
 0xa57   :  { %v778_v50 = vpop.permute.xlu1 %777  ;;  %v1047_v51 = vpop.permute.xlu0 %1046 }
 0xa58   :  { %787 = vst.msk [vmem:[#allocation2 + $0xc] sm:$0xf] %vm783_vm10, %v778_v50 }
 0xa59   :  { %1059 = vst.msk [vmem:[#allocation2] sm:$0xf] %vm1058_vm11, %v1047_v51 }
 0xa5b   :  { %v1049_v52 = vpop.permute.xlu1 %1048  ;;  %v1051_v54 = vpop.permute.xlu0 %1050 }
 0xa5c   :  { %1060 = vst.msk [vmem:[#allocation2 + $0x4] sm:$0xf] %vm1058_vm11, %v1049_v52  ;;  %1061 = vst.msk [vmem:[#allocation2 + $0x8] sm:$0xf] %vm1058_vm11, %v1051_v54 }
 0xa5f   :  { %v1053_v55 = vpop.permute.xlu1 %1052 }
 0xa60   :  { %1062 = vst.msk [vmem:[#allocation2 + $0xc] sm:$0xf] %vm1058_vm11, %v1053_v55 }
 0xa6a   :  { %v1251_v58 = vpop.f32.mrf.mxu1 }
 0xa6b   :  { %v1305_v17 = vsel %vm139_vm5, %v1251_v58, 0.0 }
 0xa6c   :  { %v2799_v59 = vpack.c.bf16 %v1305_v17, %v1305_v17  ;;  %v3006_v18 = vpop.f32.mrf.mxu1 }
 0xa6e   :  { %v1254_v63 = vpop.f32.mrf.mxu1  ;;  %1321 = vrot.lane.b32.xlu0 %v2799_v59, %s3449_s25 }
 0xa6f   :  { %v1306_v2 = vsel %vm140_vm7, %v1254_v63, 0.0 }
 0xa70   :  { %v2800_v3 = vpack.c.bf16 %v1306_v2, %v1306_v2  ;;  %v3007_v4 = vpop.f32.mrf.mxu1 }
 0xa72   :  { %1323 = vrot.lane.b32.xlu1 %v2800_v3, %s3449_s25  ;;  %v1298_v5 = vpop.f32.mrf.mxu0 }
 0xa73   :  { %v1307_v7 = vsel %vm141_vm6, %v1298_v5, 0.0 }
 0xa74   :  { %v2801_v8 = vpack.c.bf16 %v1307_v7, %v1307_v7  ;;  %v3012_v9 = vpop.f32.mrf.mxu0 }
 0xa76   :  { %1325 = vrot.lane.b32.xlu0 %v2801_v8, %s3449_s25  ;;  %v1301_v10 = vpop.f32.mrf.mxu0 }
 0xa77   :  { %v1308_v11 = vsel %vm142_vm8, %v1301_v10, 0.0 }
 0xa78   :  { %v2802_v13 = vpack.c.bf16 %v1308_v11, %v1308_v11  ;;  %v3013_v15 = vpop.f32.mrf.mxu0 }
 0xa7a   :  { %1327 = vrot.lane.b32.xlu1 %v2802_v13, %s3449_s25 }
 0xae0   :  { %v1322_v16 = vpop.permute.xlu0 %1321 }
 0xae1   :  { %1334 = vst.msk [vmem:[#allocation2] sm:$0xf] %vm1333_vm12, %v1322_v16 }
 0xae4   :  { %v1324_v21 = vpop.permute.xlu1 %1323 }
 0xae5   :  { %1335 = vst.msk [vmem:[#allocation2 + $0x4] sm:$0xf] %vm1333_vm12, %v1324_v21 }
 0xae8   :  { %v1326_v22 = vpop.permute.xlu0 %1325 }
 0xae9   :  { %1336 = vst.msk [vmem:[#allocation2 + $0x8] sm:$0xf] %vm1333_vm12, %v1326_v22 }
 0xaec   :  { %v1328_v28 = vpop.permute.xlu1 %1327  ;;  %v3168_v23 = vld [vmem:[#allocation2] sm:$0xff]  }
 0xaed   :  { %1337 = vst.msk [vmem:[#allocation2 + $0xc] sm:$0xf] %vm1333_vm12, %v1328_v28  ;;  %3022 = vmatprep.mubr.msk.bf16.mxu1 %vm1384_vm13, %v3168_v23 }
 0xaf4   :  { %v3170_v26 = vld [vmem:[#allocation2 + $0x8] sm:$0xff]  }
 0xaf5   :  { %3023 = vmatmul.mubr.msk.bf16.vlgmr.msra.gmra.mxu1 %vm1384_vm13, %v3170_v26 }
 0xaf6   :  { %3040 = vmatprep.mubr.msk.bf16.mxu1 %vm3445_vm2, %v3444_v12 }
 0xbb5   :  { %v3024_v32 = vpop.f32.mrf.mxu1 }
 0xbb7   :  { %v1425_v29 = vpop.f32.mrf.mxu1 }
 0xbb9   :  { %v3025_v31 = vpop.f32.mrf.mxu1 }
 0xbba   :  { %v3807_v30 = vpack.c.bf16 %v3025_v31, %v3024_v32 }
 0xbbb   :  { %v1428_v34 = vpop.f32.mrf.mxu1 }
 0xbbc   :  { %v3809_v43 = vpack.c.bf16 %v1428_v34, %v1425_v29  ;;  %1493 = vrot.lane.b32.xlu1 %v3807_v30, %s3446_s2 }
 0xbbe   :  { %1443 = vrot.lane.b32.xlu0 %v3809_v43, %s3446_s2 }
 0xc2e   :  { %v1494_v40 = vpop.permute.xlu1 %1493 }
 0xc2f   :  { %v1499_v47 = vsel %vm234_vm3, %v1494_v40, 0 }
 0xc30   :  { %v1444_v35 = vpop.permute.xlu0 %1443 }
 0xc31   :  { %v1449_v36 = vsel %vm234_vm3, %v1444_v35, 0 }
 0xc32   :  { %3027 = vmatpush3.bf16.xpose.msra.mxu0 %v1449_v36 }
 0xc33   :  { %3032 = vmatprep.subr.bf16.mxu0 %v3444_v12 }
 0xc39   :  { %3029 = vmatmul.mubr.msk.bf16.vlgmr.msra.gmra.mxu0 %vm234_vm3, %v3809_v43 }
 0xc3a   :  { %3033 = vmatpush3.bf16.xpose.msra.mxu0 %v1499_v47  ;;  %3034 = vmatprep.mubr.msk.bf16.mxu0 %vm3445_vm2, %v3444_v12 }
 0xc3b   :  { %3044 = vmatprep.subr.bf16.mxu0 %v3444_v12 }
 0xc41   :  { %3035 = vmatmul.mubr.msk.bf16.vlgmr.msra.gmra.mxu0 %vm234_vm3, %v3807_v30 }
 0xc42   :  { %3046 = vmatprep.mubr.msk.bf16.mxu0 %vm3445_vm2, %v3444_v12 }
 0xcf9   :  { %v1485_v37 = vpop.f32.mrf.mxu0 }
 0xcfa   :  { %v1486_v45 = vadd.f32 %v3549_v24, %v1485_v37 }
 0xcfb   :  { %v3030_v39 = vpop.f32.mrf.mxu0 }
 0xcfc   :  { %v1542_v60 = vsel %vm126_vm4, %v1486_v45, -inf }
 0xcfd   :  { %1543 = vmax.xlane.f32.xlu0 %v1542_v60  ;;  %v1488_v53 = vpop.f32.mrf.mxu0 }
 0xcfe   :  { %v1489_v41 = vadd.f32 %v3552_v27, %v1488_v53 }
 0xcff   :  { %v3031_v42 = vpop.f32.mrf.mxu0 }
 0xd00   :  { %v1545_v0 = vsel %vm126_vm4, %v1489_v41, -inf }
 0xd01   :  { %1546 = vmax.xlane.f32.xlu1 %v1545_v0  ;;  %v1535_v62 = vpop.f32.mrf.mxu0 }
 0xd02   :  { %v1536_v44 = vadd.f32 %v3556_v33, %v1535_v62 }
 0xd03   :  { %v3036_v46 = vpop.f32.mrf.mxu0 }
 0xd04   :  { %v1548_v48 = vsel %vm126_vm4, %v1536_v44, -inf }
 0xd05   :  { %1549 = vmax.xlane.f32.xlu0 %v1548_v48  ;;  %v1538_v6 = vpop.f32.mrf.mxu0 }
 0xd06   :  { %v1539_v49 = vadd.f32 %v3560_v38, %v1538_v6 }
 0xd07   :  { %v3037_v50 = vpop.f32.mrf.mxu0 }
 0xd08   :  { %v1551_v51 = vsel %vm126_vm4, %v1539_v49, -inf }
 0xd09   :  { %1552 = vmax.xlane.f32.xlu0 %v1551_v51 }
 0xd12   :  { %1588 = vrot.lane.b32.xlu1 %v3809_v43, %s3436_s24 }
 0xd86   :  { %v1544_v52 = vpop.xlane.xlu0 %1543 }
 0xd87   :  { %v1554_v54 = vsub.f32 %v1486_v45, %v1544_v52 }
 0xd89   :  { %v1558_v55 = vmul.f32 1.442695, %v1554_v54 }
 0xd8a   :  { %v1547_v56 = vpop.xlane.xlu1 %1546 }
 0xd8b   :  { %3243 = vpow2.f32 %v1558_v55  ;;  %v1555_v57 = vsub.f32 %v1489_v41, %v1547_v56 }
 0xd8d   :  { %v1560_v58 = vmul.f32 1.442695, %v1555_v57 }
 0xd8e   :  { %v1589_v17 = vpop.permute.xlu1 %1588  ;;  %v1550_v59 = vpop.xlane.xlu0 %1549 }
 0xd8f   :  { %3245 = vpow2.f32 %v1560_v58  ;;  %v1556_v18 = vsub.f32 %v1536_v44, %v1550_v59  ;;  %3039 = vmatpush3.bf16.msra.mxu1 %v1589_v17 }
 0xd90   :  { %3050 = vmatprep.subr.bf16.mxu1 %v3444_v12 }
 0xd91   :  { %v1562_v61 = vmul.f32 1.442695, %v1556_v18 }
 0xd92   :  { %v1553_v63 = vpop.xlane.xlu0 %1552 }
 0xd93   :  { %3247 = vpow2.f32 %v1562_v61  ;;  %v1557_v1 = vsub.f32 %v1539_v49, %v1553_v63 }
 0xd95   :  { %v1564_v2 = vmul.f32 1.442695, %v1557_v1 }
 0xd97   :  { %3249 = vpow2.f32 %v1564_v2 }
 0xd98   :  { %v3244_v3 = vpop.eup %3243 }
 0xd99   :  { %v1566_v4 = vsel %vm126_vm4, %v3244_v3, 0.0 }
 0xd9a   :  { %1567 = vadd.xlane.f32.xlu1 %v1566_v4 }
 0xd9c   :  { %v3246_v5 = vpop.eup %3245 }
 0xd9d   :  { %v1569_v7 = vsel %vm126_vm4, %v3246_v5, 0.0 }
 0xd9e   :  { %1570 = vadd.xlane.f32.xlu0 %v1569_v7 }
 0xda0   :  { %v3248_v8 = vpop.eup %3247 }
 0xda1   :  { %v1572_v9 = vsel %vm126_vm4, %v3248_v8, 0.0 }
 0xda2   :  { %1573 = vadd.xlane.f32.xlu1 %v1572_v9 }
 0xda4   :  { %v3250_v10 = vpop.eup %3249 }
 0xda5   :  { %v1575_v11 = vsel %vm126_vm4, %v3250_v10, 0.0 }
 0xda6   :  { %1576 = vadd.xlane.f32.xlu0 %v1575_v11 }
 0xdb3   :  { %1717 = vrot.lane.b32.xlu1 %v3809_v43, %s3447_s4 }
 0xdb7   :  { %1768 = vrot.lane.b32.xlu1 %v3807_v30, %s3447_s4 }
 0xdbb   :  { %1766 = vrot.lane.b32.xlu1 %v3807_v30, %s3448_s23 }
 0xdbc   :  { %1635 = vrot.lane.b32.xlu0 %v3807_v30, %s3436_s24 }
 0xdc0   :  { %1715 = vrot.lane.b32.xlu0 %v3809_v43, %s3448_s23 }
 0xe23   :  { %v1568_v13 = vpop.xlane.xlu1 %1567 }
 0xe24   :  { %3251 = vrcp.f32 %v1568_v13 }
 0xe27   :  { %v1571_v15 = vpop.xlane.xlu0 %1570 }
 0xe28   :  { %3253 = vrcp.f32 %v1571_v15 }
 0xe2b   :  { %v1574_v16 = vpop.xlane.xlu1 %1573 }
 0xe2c   :  { %3255 = vrcp.f32 %v1574_v16 }
 0xe2f   :  { %v1577_v21 = vpop.xlane.xlu0 %1576  ;;  %v1718_v29 = vpop.permute.xlu1 %1717 }
 0xe30   :  { %3257 = vrcp.f32 %v1577_v21  ;;  %v1723_v34 = vsel %vm234_vm3, %v1718_v29, 0 }
 0xe31   :  { %v3252_v22 = vpop.eup %3251 }
 0xe32   :  { %v1582_v26 = vmul.f32 %v3252_v22, %v3244_v3 }
 0xe33   :  { %v1636_v28 = vpop.permute.xlu0 %1635  ;;  %v1769_v37 = vpop.permute.xlu1 %1768 }
 0xe34   :  { %3045 = vmatpush3.bf16.msra.mxu0 %v1636_v28  ;;  %v1774_v60 = vsel %vm234_vm3, %v1769_v37, 0 }
 0xe35   :  { %v3254_v23 = vpop.eup %3253  ;;  %3056 = vmatprep.subr.bf16.mxu0 %v3444_v12 }
 0xe36   :  { %v1583_v32 = vmul.f32 %v3254_v23, %v3246_v5 }
 0xe37   :  { %v1716_v39 = vpop.permute.xlu0 %1715  ;;  %v1767_v53 = vpop.permute.xlu1 %1766 }
 0xe38   :  { %v1586_v31 = vpack.c.bf16 %v1583_v32, %v1582_v26 }
 0xe39   :  { %v3256_v35 = vpop.eup %3255 }
 0xe3a   :  { %3041 = vmatmul.mubr.msk.bf16.vlgmr.msra.gmra.mxu1 %vm126_vm4, %v1586_v31  ;;  %v1584_v40 = vmul.f32 %v3256_v35, %v3248_v8 }
 0xe3b   :  { %3051 = vmatpush3.bf16.xpose.msra.mxu1 %v1723_v34  ;;  %3052 = vmatprep.mubr.msk.bf16.mxu1 %vm3445_vm2, %v3444_v12 }
 0xe3c   :  { %3062 = vmatprep.subr.bf16.mxu1 %v3444_v12 }
 0xe3d   :  { %v3258_v36 = vpop.eup %3257 }
 0xe3e   :  { %v1585_v47 = vmul.f32 %v3258_v36, %v3250_v10 }
 0xe40   :  { %v1587_v45 = vpack.c.bf16 %v1585_v47, %v1584_v40 }
 0xe42   :  { %3047 = vmatmul.mubr.msk.bf16.vlgmr.msra.gmra.mxu0 %vm126_vm4, %v1587_v45  ;;  %3053 = vmatmul.mubr.msk.bf16.vlgmr.msra.gmra.mxu1 %vm234_vm3, %v1716_v39 }
 0xe43   :  { %3057 = vmatpush3.bf16.xpose.msra.mxu0 %v1774_v60  ;;  %3058 = vmatprep.mubr.msk.bf16.mxu0 %vm3445_vm2, %v3444_v12 }
 0xe44   :  { %3068 = vmatprep.subr.bf16.mxu0 %v3444_v12  ;;  %3064 = vmatprep.mubr.msk.bf16.mxu1 %vm3445_vm2, %v3444_v12 }
 0xe4a   :  { %3059 = vmatmul.mubr.msk.bf16.vlgmr.msra.gmra.mxu0 %vm234_vm3, %v1767_v53 }
 0xe4b   :  { %3070 = vmatprep.mubr.msk.bf16.mxu0 %vm3445_vm2, %v3444_v12 }
 0xefa   :  { %v3869_v41 = vpop.f32.mrf.mxu1 }
 0xefc   :  { %v3042_v42 = vpop.f32.mrf.mxu1 }
 0xefe   :  { %v3871_v0 = vpop.f32.mrf.mxu1 }
 0xf00   :  { %v3043_v62 = vpop.f32.mrf.mxu1 }
 0xf02   :  { %v3873_v44 = vpop.f32.mrf.mxu0  ;;  %v1759_v46 = vpop.f32.mrf.mxu1 }
 0xf03   :  { %v1760_v48 = vadd.f32 %v3549_v24, %v1759_v46 }
 0xf04   :  { %v3048_v6 = vpop.f32.mrf.mxu0  ;;  %v3054_v49 = vpop.f32.mrf.mxu1 }
 0xf05   :  { %v1817_v50 = vsel %vm126_vm4, %v1760_v48, -inf }
 0xf06   :  { %1818 = vmax.xlane.f32.xlu0 %v1817_v50  ;;  %v3877_v51 = vpop.f32.mrf.mxu0  ;;  %v1762_v52 = vpop.f32.mrf.mxu1 }
 0xf07   :  { %v1763_v54 = vadd.f32 %v3552_v27, %v1762_v52 }
 0xf08   :  { %v3049_v55 = vpop.f32.mrf.mxu0  ;;  %v3055_v56 = vpop.f32.mrf.mxu1 }
 0xf09   :  { %v1820_v57 = vsel %vm126_vm4, %v1763_v54, -inf }
 0xf0a   :  { %1821 = vmax.xlane.f32.xlu1 %v1820_v57  ;;  %v1810_v58 = vpop.f32.mrf.mxu0 }
 0xf0b   :  { %v1811_v17 = vadd.f32 %v3556_v33, %v1810_v58 }
 0xf0c   :  { %v3060_v59 = vpop.f32.mrf.mxu0 }
 0xf0d   :  { %v1823_v18 = vsel %vm126_vm4, %v1811_v17, -inf }
 0xf0e   :  { %1824 = vmax.xlane.f32.xlu0 %v1823_v18  ;;  %v1813_v61 = vpop.f32.mrf.mxu0 }
 0xf0f   :  { %v1814_v63 = vadd.f32 %v3560_v38, %v1813_v61 }
 0xf10   :  { %v3061_v1 = vpop.f32.mrf.mxu0 }
 0xf11   :  { %v1826_v2 = vsel %vm126_vm4, %v1814_v63, -inf }
 0xf12   :  { %1827 = vmax.xlane.f32.xlu0 %v1826_v2 }
 0xf1b   :  { %1863 = vrot.lane.b32.xlu1 %v3809_v43, %s3449_s25 }
 0xf8f   :  { %v1819_v3 = vpop.xlane.xlu0 %1818 }
 0xf90   :  { %v1829_v4 = vsub.f32 %v1760_v48, %v1819_v3 }
 0xf92   :  { %v1833_v5 = vmul.f32 1.442695, %v1829_v4 }
 0xf93   :  { %v1822_v7 = vpop.xlane.xlu1 %1821 }
 0xf94   :  { %3259 = vpow2.f32 %v1833_v5  ;;  %v1830_v8 = vsub.f32 %v1763_v54, %v1822_v7 }
 0xf96   :  { %v1835_v9 = vmul.f32 1.442695, %v1830_v8 }
 0xf97   :  { %v1864_v10 = vpop.permute.xlu1 %1863  ;;  %v1825_v11 = vpop.xlane.xlu0 %1824 }
 0xf98   :  { %3261 = vpow2.f32 %v1835_v9  ;;  %v1831_v13 = vsub.f32 %v1811_v17, %v1825_v11  ;;  %3063 = vmatpush3.bf16.msra.mxu1 %v1864_v10 }
 0xf99   :  { %3074 = vmatprep.subr.bf16.mxu1 %v3444_v12 }
 0xf9a   :  { %v1837_v15 = vmul.f32 1.442695, %v1831_v13 }
 0xf9b   :  { %v1828_v16 = vpop.xlane.xlu0 %1827 }
 0xf9c   :  { %3263 = vpow2.f32 %v1837_v15  ;;  %v1832_v21 = vsub.f32 %v1814_v63, %v1828_v16 }
 0xf9e   :  { %v1839_v22 = vmul.f32 1.442695, %v1832_v21 }
 0xfa0   :  { %3265 = vpow2.f32 %v1839_v22 }
 0xfa1   :  { %v3260_v28 = vpop.eup %3259 }
 0xfa2   :  { %v1841_v23 = vsel %vm126_vm4, %v3260_v28, 0.0 }
 0xfa3   :  { %1842 = vadd.xlane.f32.xlu1 %v1841_v23 }
 0xfa5   :  { %v3262_v26 = vpop.eup %3261 }
 0xfa6   :  { %v1844_v32 = vsel %vm126_vm4, %v3262_v26, 0.0 }
 0xfa7   :  { %1845 = vadd.xlane.f32.xlu0 %v1844_v32 }
 0xfa9   :  { %v3264_v29 = vpop.eup %3263 }
 0xfaa   :  { %v1847_v31 = vsel %vm126_vm4, %v3264_v29, 0.0 }
 0xfab   :  { %1848 = vadd.xlane.f32.xlu1 %v1847_v31 }
 0xfad   :  { %v3266_v34 = vpop.eup %3265 }
 0xfae   :  { %v1850_v35 = vsel %vm126_vm4, %v3266_v34, 0.0 }
 0xfaf   :  { %1851 = vadd.xlane.f32.xlu0 %v1850_v35 }
 0xfbc   :  { %1992 = vrot.lane.b32.xlu1 %v3809_v43, %s3450_s26 }
 0xfc0   :  { %2043 = vrot.lane.b32.xlu1 %v3807_v30, %s3450_s26 }
 0xfc4   :  { %2041 = vrot.lane.b32.xlu1 %v3807_v30, %s3451_s27 }
 0xfc5   :  { %1910 = vrot.lane.b32.xlu0 %v3807_v30, %s3449_s25 }
 0xfc9   :  { %1990 = vrot.lane.b32.xlu0 %v3809_v43, %s3451_s27 }
0x102c   :  { %v1843_v36 = vpop.xlane.xlu1 %1842 }
0x102d   :  { %3267 = vrcp.f32 %v1843_v36 }
0x1030   :  { %v1846_v40 = vpop.xlane.xlu0 %1845 }
0x1031   :  { %3269 = vrcp.f32 %v1846_v40 }
0x1034   :  { %v1849_v47 = vpop.xlane.xlu1 %1848 }
0x1035   :  { %3271 = vrcp.f32 %v1849_v47 }
0x1038   :  { %v1852_v37 = vpop.xlane.xlu0 %1851  ;;  %v1993_v62 = vpop.permute.xlu1 %1992 }
0x1039   :  { %3273 = vrcp.f32 %v1852_v37  ;;  %v1998_v48 = vsel %vm234_vm3, %v1993_v62, 0 }
0x103a   :  { %v3268_v45 = vpop.eup %3267 }
0x103b   :  { %v1857_v53 = vmul.f32 %v3268_v45, %v3260_v28 }
0x103c   :  { %v1911_v39 = vpop.permute.xlu0 %1910  ;;  %v2044_v54 = vpop.permute.xlu1 %2043 }
0x103d   :  { %3069 = vmatpush3.bf16.msra.mxu0 %v1911_v39  ;;  %v2049_v57 = vsel %vm234_vm3, %v2044_v54, 0 }
0x103e   :  { %v3270_v60 = vpop.eup %3269  ;;  %3080 = vmatprep.subr.bf16.mxu0 %v3444_v12 }
0x103f   :  { %v1858_v42 = vmul.f32 %v3270_v60, %v3262_v26 }
0x1040   :  { %v1991_v56 = vpop.permute.xlu0 %1990  ;;  %v2042_v58 = vpop.permute.xlu1 %2041 }
0x1041   :  { %v1861_v46 = vpack.c.bf16 %v1858_v42, %v1857_v53 }
0x1042   :  { %v3272_v6 = vpop.eup %3271 }
0x1043   :  { %3065 = vmatmul.mubr.msk.bf16.vlgmr.msra.gmra.mxu1 %vm126_vm4, %v1861_v46  ;;  %v1859_v50 = vmul.f32 %v3272_v6, %v3264_v29 }
0x1044   :  { %3075 = vmatpush3.bf16.xpose.msra.mxu1 %v1998_v48  ;;  %3076 = vmatprep.mubr.msk.bf16.mxu1 %vm3445_vm2, %v3444_v12 }
0x1045   :  { %3086 = vmatprep.subr.bf16.mxu1 %v3444_v12 }
0x1046   :  { %v3274_v49 = vpop.eup %3273 }
0x1047   :  { %v1860_v52 = vmul.f32 %v3274_v49, %v3266_v34 }
0x1049   :  { %v1862_v55 = vpack.c.bf16 %v1860_v52, %v1859_v50 }
0x104b   :  { %3071 = vmatmul.mubr.msk.bf16.vlgmr.msra.gmra.mxu0 %vm126_vm4, %v1862_v55  ;;  %3077 = vmatmul.mubr.msk.bf16.vlgmr.msra.gmra.mxu1 %vm234_vm3, %v1991_v56 }
0x104c   :  { %3081 = vmatpush3.bf16.xpose.msra.mxu0 %v2049_v57  ;;  %3082 = vmatprep.mubr.msk.bf16.mxu0 %vm3445_vm2, %v3444_v12 }
0x104d   :  { %3092 = vmatprep.subr.bf16.mxu0 %v3444_v12  ;;  %3088 = vmatprep.mubr.msk.bf16.mxu1 %vm3445_vm2, %v3444_v12 }
0x1053   :  { %3083 = vmatmul.mubr.msk.bf16.vlgmr.msra.gmra.mxu0 %vm234_vm3, %v2042_v58 }
0x1054   :  { %3094 = vmatprep.mubr.msk.bf16.mxu0 %vm3445_vm2, %v3444_v12 }
0x1103   :  { %v3919_v17 = vpop.f32.mrf.mxu1 }
0x1105   :  { %v3066_v59 = vpop.f32.mrf.mxu1 }
0x1107   :  { %v3921_v18 = vpop.f32.mrf.mxu1 }
0x1109   :  { %v3067_v61 = vpop.f32.mrf.mxu1 }
0x110b   :  { %v3923_v63 = vpop.f32.mrf.mxu0  ;;  %v2034_v1 = vpop.f32.mrf.mxu1 }
0x110c   :  { %v2035_v2 = vadd.f32 %v3549_v24, %v2034_v1 }
0x110d   :  { %v3072_v3 = vpop.f32.mrf.mxu0  ;;  %v3078_v4 = vpop.f32.mrf.mxu1 }
0x110e   :  { %v2092_v5 = vsel %vm126_vm4, %v2035_v2, -inf }
0x110f   :  { %2093 = vmax.xlane.f32.xlu0 %v2092_v5  ;;  %v3927_v7 = vpop.f32.mrf.mxu0  ;;  %v2037_v8 = vpop.f32.mrf.mxu1 }
0x1110   :  { %v2038_v9 = vadd.f32 %v3552_v27, %v2037_v8 }
0x1111   :  { %v3073_v10 = vpop.f32.mrf.mxu0  ;;  %v3079_v11 = vpop.f32.mrf.mxu1 }
0x1112   :  { %v2095_v13 = vsel %vm126_vm4, %v2038_v9, -inf }
0x1113   :  { %2096 = vmax.xlane.f32.xlu1 %v2095_v13  ;;  %v2085_v15 = vpop.f32.mrf.mxu0 }
0x1114   :  { %v2086_v16 = vadd.f32 %v3556_v33, %v2085_v15 }
0x1115   :  { %v3084_v21 = vpop.f32.mrf.mxu0 }
0x1116   :  { %v2098_v22 = vsel %vm126_vm4, %v2086_v16, -inf }
0x1117   :  { %2099 = vmax.xlane.f32.xlu0 %v2098_v22  ;;  %v2088_v28 = vpop.f32.mrf.mxu0 }
0x1118   :  { %v2089_v23 = vadd.f32 %v3560_v38, %v2088_v28 }
0x1119   :  { %v3085_v26 = vpop.f32.mrf.mxu0 }
0x111a   :  { %v2101_v32 = vsel %vm126_vm4, %v2089_v23, -inf }
0x111b   :  { %2102 = vmax.xlane.f32.xlu0 %v2101_v32 }
0x1124   :  { %2138 = vrot.lane.b32.xlu1 %v3809_v43, %s3452_s28 }
0x1198   :  { %v2094_v29 = vpop.xlane.xlu0 %2093 }
0x1199   :  { %v2104_v31 = vsub.f32 %v2035_v2, %v2094_v29 }
0x119b   :  { %v2108_v34 = vmul.f32 1.442695, %v2104_v31 }
0x119c   :  { %v2097_v35 = vpop.xlane.xlu1 %2096 }
0x119d   :  { %3275 = vpow2.f32 %v2108_v34  ;;  %v2105_v36 = vsub.f32 %v2038_v9, %v2097_v35 }
0x119f   :  { %v2110_v40 = vmul.f32 1.442695, %v2105_v36 }
0x11a0   :  { %v2139_v47 = vpop.permute.xlu1 %2138  ;;  %v2100_v37 = vpop.xlane.xlu0 %2099 }
0x11a1   :  { %3277 = vpow2.f32 %v2110_v40  ;;  %v2106_v45 = vsub.f32 %v2086_v16, %v2100_v37  ;;  %3087 = vmatpush3.bf16.msra.mxu1 %v2139_v47 }
0x11a2   :  { %3098 = vmatprep.subr.bf16.mxu1 %v3444_v12 }
0x11a3   :  { %v2112_v39 = vmul.f32 1.442695, %v2106_v45 }
0x11a4   :  { %v2103_v60 = vpop.xlane.xlu0 %2102 }
0x11a5   :  { %3279 = vpow2.f32 %v2112_v39  ;;  %v2107_v53 = vsub.f32 %v2089_v23, %v2103_v60 }
0x11a7   :  { %v2114_v42 = vmul.f32 1.442695, %v2107_v53 }
0x11a9   :  { %3281 = vpow2.f32 %v2114_v42 }
0x11aa   :  { %v3276_v62 = vpop.eup %3275 }
0x11ab   :  { %v2116_v46 = vsel %vm126_vm4, %v3276_v62, 0.0 }
0x11ac   :  { %2117 = vadd.xlane.f32.xlu1 %v2116_v46 }
0x11ae   :  { %v3278_v48 = vpop.eup %3277 }
0x11af   :  { %v2119_v6 = vsel %vm126_vm4, %v3278_v48, 0.0 }
0x11b0   :  { %2120 = vadd.xlane.f32.xlu0 %v2119_v6 }
0x11b2   :  { %v3280_v49 = vpop.eup %3279 }
0x11b3   :  { %v2122_v50 = vsel %vm126_vm4, %v3280_v49, 0.0 }
0x11b4   :  { %2123 = vadd.xlane.f32.xlu1 %v2122_v50 }
0x11b6   :  { %v3282_v52 = vpop.eup %3281 }
0x11b7   :  { %v2125_v54 = vsel %vm126_vm4, %v3282_v52, 0.0 }
0x11b8   :  { %2126 = vadd.xlane.f32.xlu0 %v2125_v54 }
0x11c5   :  { %2267 = vrot.lane.b32.xlu1 %v3809_v43, %s3453_s29 }
0x11c9   :  { %2318 = vrot.lane.b32.xlu1 %v3807_v30, %s3453_s29 }
0x11cd   :  { %2316 = vrot.lane.b32.xlu1 %v3807_v30, %s3454_s30 }
0x11ce   :  { %2185 = vrot.lane.b32.xlu0 %v3807_v30, %s3452_s28 }
0x11d2   :  { %2265 = vrot.lane.b32.xlu0 %v3809_v43, %s3454_s30 }
0x1235   :  { %v2118_v55 = vpop.xlane.xlu1 %2117 }
0x1236   :  { %3283 = vrcp.f32 %v2118_v55 }
0x1239   :  { %v2121_v56 = vpop.xlane.xlu0 %2120 }
0x123a   :  { %3285 = vrcp.f32 %v2121_v56 }
0x123d   :  { %v2124_v57 = vpop.xlane.xlu1 %2123 }
0x123e   :  { %3287 = vrcp.f32 %v2124_v57 }
0x1241   :  { %v2127_v58 = vpop.xlane.xlu0 %2126  ;;  %v2268_v4 = vpop.permute.xlu1 %2267 }
0x1242   :  { %3289 = vrcp.f32 %v2127_v58  ;;  %v2273_v8 = vsel %vm234_vm3, %v2268_v4, 0 }
0x1243   :  { %v3284_v59 = vpop.eup %3283 }
0x1244   :  { %v2132_v2 = vmul.f32 %v3284_v59, %v3276_v62 }
0x1245   :  { %v2186_v61 = vpop.permute.xlu0 %2185  ;;  %v2319_v15 = vpop.permute.xlu1 %2318 }
0x1246   :  { %3093 = vmatpush3.bf16.msra.mxu0 %v2186_v61  ;;  %v2324_v22 = vsel %vm234_vm3, %v2319_v15, 0 }
0x1247   :  { %v3286_v1 = vpop.eup %3285  ;;  %3104 = vmatprep.subr.bf16.mxu0 %v3444_v12 }
0x1248   :  { %v2133_v3 = vmul.f32 %v3286_v1, %v3278_v48 }
0x1249   :  { %v2266_v21 = vpop.permute.xlu0 %2265  ;;  %v2317_v28 = vpop.permute.xlu1 %2316 }
0x124a   :  { %v2136_v5 = vpack.c.bf16 %v2133_v3, %v2132_v2 }
0x124b   :  { %v3288_v9 = vpop.eup %3287 }
0x124c   :  { %3089 = vmatmul.mubr.msk.bf16.vlgmr.msra.gmra.mxu1 %vm126_vm4, %v2136_v5  ;;  %v2134_v11 = vmul.f32 %v3288_v9, %v3280_v49 }
0x124d   :  { %3099 = vmatpush3.bf16.xpose.msra.mxu1 %v2273_v8  ;;  %3100 = vmatprep.mubr.msk.bf16.mxu1 %vm3445_vm2, %v3444_v12 }
0x124e   :  { %3110 = vmatprep.subr.bf16.mxu1 %v3444_v12 }
0x124f   :  { %v3290_v10 = vpop.eup %3289 }
0x1250   :  { %v2135_v13 = vmul.f32 %v3290_v10, %v3282_v52 }
0x1252   :  { %v2137_v16 = vpack.c.bf16 %v2135_v13, %v2134_v11  ;;  %v1682_v13 = vsel %vm139_vm5, %v3869_v41, 0.0 }
0x1253   :  { %v2803_v15 = vpack.c.bf16 %v1682_v13, %v1682_v13  ;;  %v3175_v13 = vld [vmem:[#allocation11 + $0x8] sm:$0xff]  }
0x1254   :  { %3095 = vmatmul.mubr.msk.bf16.vlgmr.msra.gmra.mxu0 %vm126_vm4, %v2137_v16  ;;  %3101 = vmatmul.mubr.msk.bf16.vlgmr.msra.gmra.mxu1 %vm234_vm3, %v2266_v21  ;;  %v1683_v16 = vsel %vm140_vm7, %v3871_v0, 0.0  ;;  %v1958_v0 = vsel %vm140_vm7, %v3921_v18, 0.0 }
0x1255   :  { %3105 = vmatpush3.bf16.xpose.msra.mxu0 %v2324_v22  ;;  %3106 = vmatprep.mubr.msk.bf16.mxu0 %vm3445_vm2, %v3444_v12  ;;  %v2804_v21 = vpack.c.bf16 %v1683_v16, %v1683_v16  ;;  %v1685_v22 = vsel %vm142_vm8, %v3877_v51, 0.0  ;;  %v3177_v16 = vld [vmem:[#allocation11] sm:$0xff]  }
0x1256   :  { %3116 = vmatprep.subr.bf16.mxu0 %v3444_v12  ;;  %3112 = vmatprep.mubr.msk.bf16.mxu1 %vm3445_vm2, %v3444_v12 }
0x125c   :  { %3107 = vmatmul.mubr.msk.bf16.vlgmr.msra.gmra.mxu0 %vm234_vm3, %v2317_v28  ;;  %v1684_v28 = vsel %vm141_vm6, %v3873_v44, 0.0  ;;  %v2808_v44 = vpack.c.bf16 %v1958_v0, %v1958_v0 }
0x125d   :  { %3118 = vmatprep.mubr.msk.bf16.mxu0 %vm3445_vm2, %v3444_v12  ;;  %v2805_v41 = vpack.c.bf16 %v1684_v28, %v1684_v28  ;;  %vm2608_vm2 = vcmask 785408  }
0x130c   :  { %v3969_v23 = vpop.f32.mrf.mxu1 }
0x130e   :  { %v3090_v26 = vpop.f32.mrf.mxu1 }
0x130f   :  { %v1957_v26 = vsel %vm139_vm5, %v3919_v17, 0.0 }
0x1310   :  { %v3971_v32 = vpop.f32.mrf.mxu1  ;;  %v2807_v51 = vpack.c.bf16 %v1957_v26, %v1957_v26 }
0x1312   :  { %v3091_v29 = vpop.f32.mrf.mxu1 }
0x1313   :  { %v1959_v29 = vsel %vm141_vm6, %v3923_v63, 0.0 }
0x1314   :  { %v3973_v31 = vpop.f32.mrf.mxu0  ;;  %v2309_v34 = vpop.f32.mrf.mxu1  ;;  %v2809_v17 = vpack.c.bf16 %v1959_v29, %v1959_v29 }
0x1315   :  { %v2310_v35 = vadd.f32 %v3549_v24, %v2309_v34  ;;  %v2233_v34 = vsel %vm140_vm7, %v3971_v32, 0.0 }
0x1316   :  { %v3096_v36 = vpop.f32.mrf.mxu0  ;;  %v3102_v40 = vpop.f32.mrf.mxu1 }
0x1317   :  { %v2367_v47 = vsel %vm126_vm4, %v2310_v35, -inf  ;;  %v2234_v40 = vsel %vm141_vm6, %v3973_v31, 0.0 }
0x1318   :  { %2368 = vmax.xlane.f32.xlu0 %v2367_v47  ;;  %v3977_v37 = vpop.f32.mrf.mxu0  ;;  %v2312_v45 = vpop.f32.mrf.mxu1 }
0x1319   :  { %v2313_v12 = vadd.f32 %v3552_v27, %v2312_v45  ;;  %v2235_v36 = vsel %vm142_vm8, %v3977_v37, 0.0 }
0x131a   :  { %v3097_v39 = vpop.f32.mrf.mxu0  ;;  %v3103_v60 = vpop.f32.mrf.mxu1  ;;  %v2814_v32 = vpack.c.bf16 %v2235_v36, %v2235_v36 }
0x131b   :  { %v2370_v53 = vsel %vm126_vm4, %v2313_v12, -inf }
0x131c   :  { %2371 = vmax.xlane.f32.xlu1 %v2370_v53  ;;  %v2360_v42 = vpop.f32.mrf.mxu0 }
0x131d   :  { %v2361_v62 = vadd.f32 %v3556_v33, %v2360_v42 }
0x131e   :  { %v3108_v46 = vpop.f32.mrf.mxu0 }
0x131f   :  { %v2373_v24 = vsel %vm126_vm4, %v2361_v62, -inf }
0x1320   :  { %2374 = vmax.xlane.f32.xlu0 %v2373_v24  ;;  %v2363_v48 = vpop.f32.mrf.mxu0 }
0x1321   :  { %v2364_v6 = vadd.f32 %v3560_v38, %v2363_v48 }
0x1322   :  { %v3109_v49 = vpop.f32.mrf.mxu0 }
0x1323   :  { %v2376_v50 = vsel %vm126_vm4, %v2364_v6, -inf }
0x1324   :  { %2377 = vmax.xlane.f32.xlu0 %v2376_v50 }
0x13a1   :  { %v2369_v27 = vpop.xlane.xlu0 %2368 }
0x13a2   :  { %v2379_v52 = vsub.f32 %v2310_v35, %v2369_v27  ;;  %v2232_v35 = vsel %vm139_vm5, %v3969_v23, 0.0  ;;  %v2813_v23 = vpack.c.bf16 %v2234_v40, %v2234_v40 }
0x13a3   :  { %v2811_v63 = vpack.c.bf16 %v2232_v35, %v2232_v35  ;;  %v2559_v35 = vshrl.u32 %v2558_v25, 7 }
0x13a4   :  { %v2383_v54 = vmul.f32 1.442695, %v2379_v52 }
0x13a5   :  { %v2372_v55 = vpop.xlane.xlu1 %2371  ;;  %v2560_v36 = vsub.s32 0, %v2559_v35 }
0x13a6   :  { %3291 = vpow2.f32 %v2383_v54  ;;  %v2380_v56 = vsub.f32 %v2313_v12, %v2372_v55 }
0x13a8   :  { %v2385_v57 = vmul.f32 1.442695, %v2380_v56 }
0x13a9   :  { %v2375_v58 = vpop.xlane.xlu0 %2374 }
0x13aa   :  { %3293 = vpow2.f32 %v2385_v57  ;;  %v2381_v33 = vsub.f32 %v2361_v62, %v2375_v58 }
0x13ac   :  { %v2387_v59 = vmul.f32 1.442695, %v2381_v33 }
0x13ad   :  { %v2378_v61 = vpop.xlane.xlu0 %2377 }
0x13ae   :  { %3295 = vpow2.f32 %v2387_v59  ;;  %v2382_v1 = vsub.f32 %v2364_v6, %v2378_v61 }
0x13b0   :  { %v2389_v2 = vmul.f32 1.442695, %v2382_v1 }
0x13b2   :  { %3297 = vpow2.f32 %v2389_v2 }
0x13b3   :  { %v3985_v38 = vpop.eup %3291 }
0x13b4   :  { %v2391_v3 = vsel %vm126_vm4, %v3985_v38, 0.0 }
0x13b5   :  { %2392 = vadd.xlane.f32.xlu1 %v2391_v3  ;;  %v3172_v3 = vld [vmem:[#allocation11 + $0x20] sm:$0xff]  }
0x13b7   :  { %v3989_v4 = vpop.eup %3293 }
0x13b8   :  { %v2394_v5 = vsel %vm126_vm4, %v3989_v4, 0.0 }
0x13b9   :  { %2395 = vadd.xlane.f32.xlu0 %v2394_v5  ;;  %v3174_v5 = vld [vmem:[#allocation11 + $0x10] sm:$0xff]  }
0x13bb   :  { %v3993_v8 = vpop.eup %3295 }
0x13bc   :  { %v2397_v9 = vsel %vm126_vm4, %v3993_v8, 0.0 }
0x13bd   :  { %2398 = vadd.xlane.f32.xlu1 %v2397_v9 }
0x13bf   :  { %v3997_v10 = vpop.eup %3297 }
0x13c0   :  { %v2400_v11 = vsel %vm126_vm4, %v3997_v10, 0.0 }
0x13c1   :  { %2401 = vadd.xlane.f32.xlu0 %v2400_v11 }
0x13ce   :  { %2413 = vrot.lane.b32.xlu1 %v3809_v43, %s3455_s7  ;;  %v2806_v43 = vpack.c.bf16 %v1685_v22, %v1685_v22 }
0x13d2   :  { %1698 = vrot.lane.b32.xlu1 %v2803_v15, %s3436_s24 }
0x13d6   :  { %1700 = vrot.lane.b32.xlu1 %v2804_v21, %s3436_s24 }
0x13d7   :  { %2460 = vrot.lane.b32.xlu0 %v3807_v30, %s3455_s7  ;;  %v1960_v30 = vsel %vm142_vm8, %v3927_v7, 0.0  ;;  %v2812_v7 = vpack.c.bf16 %v2233_v34, %v2233_v34 }
0x13d8   :  { %v2810_v18 = vpack.c.bf16 %v1960_v30, %v1960_v30 }
0x13da   :  { %1704 = vrot.lane.b32.xlu1 %v2806_v43, %s3436_s24 }
0x13db   :  { %1702 = vrot.lane.b32.xlu0 %v2805_v41, %s3436_s24 }
0x13de   :  { %1975 = vrot.lane.b32.xlu1 %v2808_v44, %s3453_s29 }
0x13df   :  { %1973 = vrot.lane.b32.xlu0 %v2807_v51, %s3453_s29 }
0x13e2   :  { %1979 = vrot.lane.b32.xlu1 %v2810_v18, %s3453_s29 }
0x13e3   :  { %1977 = vrot.lane.b32.xlu0 %v2809_v17, %s3453_s29 }
0x13e6   :  { %2250 = vrot.lane.b32.xlu1 %v2812_v7, %s3450_s26  ;;  %v2556_v7 = vld [vmem:[%s4093_s5] sm:$0x1]  ;;  %s3407_s5 = scalar_lea.vmem %s2678_s1, 512 }
0x13e7   :  { %2248 = vrot.lane.b32.xlu0 %v2811_v63, %s3450_s26  ;;  %v2557_v63 = vunpack.c.l.bf16 %v2556_v7  ;;  %p3408_p11 = scmp.ne.s32.totalorder %s2678_s1, %s3407_s5  ;;  %p3413_p13 = scmp.lt.s32.totalorder %s3407_s5, %s3407_s5 }
0x13e9   :  { %v2561_v40 = vrot.slane %v2557_v63, %v2560_v36  ;;  %p3414_p0 = por %p3413_p13, %p3412_p12 }
0x13ea   :  { %2254 = vrot.lane.b32.xlu1 %v2814_v32, %s3450_s26 }
0x13eb   :  { %2252 = vrot.lane.b32.xlu0 %v2813_v23, %s3450_s26  ;;  %p3415_p1 = pnand %p3414_p0, %p3408_p11 }
0x143e   :  { %v2393_v47 = vpop.xlane.xlu1 %2392 }
0x143f   :  { %3299 = vrcp.f32 %v2393_v47 }
0x1442   :  { %v2396_v45 = vpop.xlane.xlu0 %2395 }
0x1443   :  { %3301 = vrcp.f32 %v2396_v45 }
0x1446   :  { %v2399_v12 = vpop.xlane.xlu1 %2398 }
0x1447   :  { %3303 = vrcp.f32 %v2399_v12 }
0x144a   :  { %v2414_v37 = vpop.permute.xlu1 %2413  ;;  %v2402_v39 = vpop.xlane.xlu0 %2401 }
0x144b   :  { %3305 = vrcp.f32 %v2402_v39  ;;  %3111 = vmatpush3.bf16.msra.mxu1 %v2414_v37 }
0x144c   :  { %v3300_v31 = vpop.eup %3299 }
0x144d   :  { %v2407_v62 = vmul.f32 %v3300_v31, %v3985_v38  ;;  %v3171_v38 = vld [vmem:[#allocation11 + $0x28] sm:$0xff]  }
0x144e   :  { %v1699_v60 = vpop.permute.xlu1 %1698  ;;  %v2461_v53 = vpop.permute.xlu0 %2460  ;;  %3122 = vmatprep.subr.bf16.mxu1 %v3171_v38 }
0x144f   :  { %1711 = vst.msk [vmem:[#allocation2] sm:$0xf] %vm1710_vm14, %v1699_v60  ;;  %3117 = vmatpush3.bf16.msra.mxu0 %v2461_v53 }
0x1450   :  { %v3302_v42 = vpop.eup %3301 }
0x1451   :  { %v2408_v46 = vmul.f32 %v3302_v42, %v3989_v4  ;;  %v3173_v4 = vld [vmem:[#allocation11 + $0x18] sm:$0xff]  }
0x1452   :  { %v1701_v24 = vpop.permute.xlu1 %1700  ;;  %v1703_v48 = vpop.permute.xlu0 %1702 }
0x1453   :  { %1712 = vst.msk [vmem:[#allocation2 + $0x4] sm:$0xf] %vm1710_vm14, %v1701_v24  ;;  %1713 = vst.msk [vmem:[#allocation2 + $0x8] sm:$0xf] %vm1710_vm14, %v1703_v48  ;;  %v2411_v6 = vpack.c.bf16 %v2408_v46, %v2407_v62 }
0x1454   :  { %v3304_v49 = vpop.eup %3303 }
0x1455   :  { %3113 = vmatmul.mubr.msk.bf16.vlgmr.msra.gmra.mxu1 %vm126_vm4, %v2411_v6  ;;  %v2409_v54 = vmul.f32 %v3304_v49, %v3993_v8 }
0x1456   :  { %v1705_v50 = vpop.permute.xlu1 %1704  ;;  %v1974_v27 = vpop.permute.xlu0 %1973  ;;  %3123 = vmatpush3.bf16.msra.mxu1 %v3171_v38 }
0x1457   :  { %1714 = vst.msk [vmem:[#allocation2 + $0xc] sm:$0xf] %vm1710_vm14, %v1705_v50  ;;  %3124 = vmatprep.subr.bf16.mxu1 %v3172_v3 }
0x1458   :  { %1986 = vst.msk [vmem:[#allocation2] sm:$0xf] %vm1985_vm15, %v1974_v27  ;;  %v3306_v52 = vpop.eup %3305 }
0x1459   :  { %v2410_v55 = vmul.f32 %v3306_v52, %v3997_v10 }
0x145a   :  { %v1976_v56 = vpop.permute.xlu1 %1975  ;;  %v1978_v57 = vpop.permute.xlu0 %1977  ;;  %3125 = vmatpush3.bf16.msra.mxu1 %v3172_v3 }
0x145b   :  { %1987 = vst.msk [vmem:[#allocation2 + $0x4] sm:$0xf] %vm1985_vm15, %v1976_v56  ;;  %1988 = vst.msk [vmem:[#allocation2 + $0x8] sm:$0xf] %vm1985_vm15, %v1978_v57  ;;  %v2412_v58 = vpack.c.bf16 %v2410_v55, %v2409_v54  ;;  %3126 = vmatprep.subr.bf16.mxu1 %v3173_v4 }
0x145d   :  { %3119 = vmatmul.mubr.msk.bf16.vlgmr.msra.gmra.mxu0 %vm126_vm4, %v2412_v58 }
0x145e   :  { %v1980_v33 = vpop.permute.xlu1 %1979  ;;  %v2249_v59 = vpop.permute.xlu0 %2248  ;;  %3127 = vmatpush3.bf16.msra.mxu1 %v3173_v4 }
0x145f   :  { %1989 = vst.msk [vmem:[#allocation2 + $0xc] sm:$0xf] %vm1985_vm15, %v1980_v33  ;;  %3128 = vmatprep.subr.bf16.mxu1 %v3174_v5 }
0x1460   :  { %2261 = vst.msk [vmem:[#allocation2] sm:$0xf] %vm2260_vm0, %v2249_v59 }
0x1462   :  { %v2251_v61 = vpop.permute.xlu1 %2250  ;;  %v2253_v1 = vpop.permute.xlu0 %2252  ;;  %3129 = vmatpush3.bf16.msra.mxu1 %v3174_v5 }
0x1463   :  { %2262 = vst.msk [vmem:[#allocation2 + $0x4] sm:$0xf] %vm2260_vm0, %v2251_v61  ;;  %2263 = vst.msk [vmem:[#allocation2 + $0x8] sm:$0xf] %vm2260_vm0, %v2253_v1  ;;  %3130 = vmatprep.subr.bf16.mxu1 %v3175_v13 }
0x1466   :  { %v2255_v2 = vpop.permute.xlu1 %2254  ;;  %3131 = vmatpush3.bf16.msra.mxu1 %v3175_v13 }
0x1467   :  { %2264 = vst.msk [vmem:[#allocation2 + $0xc] sm:$0xf] %vm2260_vm0, %v2255_v2  ;;  %3132 = vmatprep.subr.bf16.mxu1 %v3177_v16 }
0x146a   :  { %3133 = vmatpush3.bf16.msra.mxu1 %v3177_v16 }
0x1515   :  { %v2453_v8 = vpop.f32.mrf.mxu1 }
0x1516   :  { %v2507_v9 = vsel %vm139_vm5, %v2453_v8, 0.0 }
0x1517   :  { %v2815_v10 = vpack.c.bf16 %v2507_v9, %v2507_v9  ;;  %v3114_v11 = vpop.f32.mrf.mxu1 }
0x1519   :  { %2523 = vrot.lane.b32.xlu0 %v2815_v10, %s3447_s4  ;;  %v2456_v15 = vpop.f32.mrf.mxu1 }
0x151a   :  { %v2508_v21 = vsel %vm140_vm7, %v2456_v15, 0.0 }
0x151b   :  { %v2816_v22 = vpack.c.bf16 %v2508_v21, %v2508_v21  ;;  %v3115_v28 = vpop.f32.mrf.mxu1 }
0x151d   :  { %2525 = vrot.lane.b32.xlu1 %v2816_v22, %s3447_s4  ;;  %v2500_v14 = vpop.f32.mrf.mxu0 }
0x151e   :  { %v2509_v43 = vsel %vm141_vm6, %v2500_v14, 0.0 }
0x151f   :  { %v2817_v41 = vpack.c.bf16 %v2509_v43, %v2509_v43  ;;  %v3120_v0 = vpop.f32.mrf.mxu0 }
0x1521   :  { %2527 = vrot.lane.b32.xlu0 %v2817_v41, %s3447_s4  ;;  %v2503_v26 = vpop.f32.mrf.mxu0 }
0x1522   :  { %v2510_v20 = vsel %vm142_vm8, %v2503_v26, 0.0 }
0x1523   :  { %v2818_v44 = vpack.c.bf16 %v2510_v20, %v2510_v20  ;;  %v3121_v51 = vpop.f32.mrf.mxu0 }
0x1525   :  { %2529 = vrot.lane.b32.xlu1 %v2818_v44, %s3447_s4 }
0x158b   :  { %v2524_v30 = vpop.permute.xlu0 %2523 }
0x158c   :  { %2536 = vst.msk [vmem:[#allocation2] sm:$0xf] %vm2535_vm1, %v2524_v30 }
0x158f   :  { %v2526_v29 = vpop.permute.xlu1 %2525 }
0x1590   :  { %2537 = vst.msk [vmem:[#allocation2 + $0x4] sm:$0xf] %vm2535_vm1, %v2526_v29 }
0x1593   :  { %v2528_v19 = vpop.permute.xlu0 %2527 }
0x1594   :  { %2538 = vst.msk [vmem:[#allocation2 + $0x8] sm:$0xf] %vm2535_vm1, %v2528_v19 }
0x1597   :  { %v2530_v18 = vpop.permute.xlu1 %2529  ;;  %v3176_v17 = vld [vmem:[#allocation2] sm:$0xff]  }
0x1598   :  { %2539 = vst.msk [vmem:[#allocation2 + $0xc] sm:$0xf] %vm2535_vm1, %v2530_v18  ;;  %3134 = vmatprep.mubr.msk.bf16.mxu1 %vm2608_vm2, %v3176_v17 }
0x159f   :  { %v3178_v34 = vld [vmem:[#allocation2 + $0x8] sm:$0xff]  }
0x15a0   :  { %3135 = vmatmul.mubr.msk.bf16.vlgmr.msra.gmra.mxu1 %vm2608_vm2, %v3178_v34 }
0x1660   :  { %v3136_v32 = vpop.f32.mrf.mxu1 }
0x1661   :  { %v2658_v23 = vadd.f32 %v3136_v32, %v2561_v40 }
0x1662   :  { %v2649_v47 = vpop.f32.mrf.mxu1 }
0x1663   :  { %v2666_v45 = vmax.f32 %v2658_v23, 0.0  ;;  %v2650_v12 = vadd.f32 %v2649_v47, %v2561_v40 }
0x1664   :  { %v3137_v37 = vpop.f32.mrf.mxu1 }
0x1665   :  { %2670 = vst [vmem:[#allocation12 + $0x10] sm:$0xff] %v2666_v45  ;;  %v2664_v39 = vmax.f32 %v2650_v12, 0.0  ;;  %v2661_v31 = vadd.f32 %v3137_v37, %v2561_v40 }
0x1666   :  { %v2652_v60 = vpop.f32.mrf.mxu1 }
0x1667   :  { %2668 = vst [vmem:[#allocation12] sm:$0xff] %v2664_v39  ;;  %v2667_v53 = vmax.f32 %v2661_v31, 0.0  ;;  %v2653_v42 = vadd.f32 %v2652_v60, %v2561_v40 }
0x1669   :  { %2671 = vst [vmem:[#allocation12 + $0x18] sm:$0xff] %v2667_v53  ;;  %v2665_v62 = vmax.f32 %v2653_v42, 0.0 }
0x166b   :  { %2669 = vst [vmem:[#allocation12 + $0x8] sm:$0xff] %v2665_v62 }
0x166c   :  { %3418 = shalt.err (!%p3415_p1)
}
0x166d   :  { %2683 = dma.vmem_to_hbm [thread:$0]  %s2678_s1, 512, %s4094_s6, [#allocation5], %s3440_s11, %s3440_s11, %s3441_s12  }
0x166e   :  { %3433 = dma.done.wait [#allocation5], 512  }
0x166f   :  { %3434 = vsyncadd [#allocation5], 4294966784 }
0x1670   :  { %2687 = vsyncpa [#allocation4], 1 }
0x1671   :  { %2688 = vsyncpa [#allocation7], 1 }
0x1672   :  { %2689 = vsyncpa [#allocation10], 1 }
0x1673   :  { %2690 = vsyncpa [#allocation5], 1 }

</bundles_post_ra>
